<compile_context>
chip_gen: v7x
topology: tpu7x:2x2x1
jax: 0.10.0
libtpu: 0.0.40
codegen_flags: <defaults>
</compile_context>

<pallas_src>
import functools

import jax
import jax.numpy as jnp
from jax.experimental import pallas as pl
from jax.experimental.pallas import tpu as pltpu


# ----------------------------------------------------------------------------
# helpers
# ----------------------------------------------------------------------------
def _gelu(x):
    # TODO(synk): PyTorch nn.GELU default is the exact erf-GELU; erf lowering in
    # Mosaic is not guaranteed, so the tanh approximation is used here.
    c = jnp.float32(0.7978845608028654)  # sqrt(2/pi)
    return 0.5 * x * (1.0 + jnp.tanh(c * (x + 0.044715 * x * x * x)))


def _layernorm(x, g, b, eps):
    mean = jnp.mean(x, axis=-1, keepdims=True)
    xc = x - mean
    var = jnp.mean(xc * xc, axis=-1, keepdims=True)
    return xc * jax.lax.rsqrt(var + eps) * g + b


def _round_up(x, m):
    return (x + m - 1) // m * m


def _pick_bblk(batch, seq):
    """Batch-tile size: fold batch into the matmul M dim (target >=256 rows),
    but keep >=2 parallel grid steps when that target is unreachable."""
    divs = [d for d in range(1, batch + 1) if batch % d == 0]
    for d in divs:
        if d * seq >= 256:
            return d
    half = [d for d in divs if d <= batch // 2]
    return half[-1] if half else batch


def _pick_tile(total, target):
    """Largest multiple of 128 <= target that divides `total` (a mult. of 128)."""
    t = max(128, (min(total, target) // 128) * 128)
    while total % t != 0:
        t -= 128
    return t


@functools.lru_cache(maxsize=1)
def _vmem_limit():
    # ~75% of physical VMEM: ~96 MiB on v5e/v6e (128 MiB), ~48 MiB on v7x (64 MiB).
    try:
        cap = pltpu.get_tpu_info().vmem_capacity_bytes
    except Exception:
        cap = 64 * 1024 * 1024
    return int(cap * 3 // 4)


# ----------------------------------------------------------------------------
# kernel 1: embedding prologue
#   one-hot gather of tok_emb rows -> +pos -> LN(1e-12) -> project_in
# ----------------------------------------------------------------------------
def _embed_kernel(ids_ref, emb_ref, pos_ref, lng_ref, lnb_ref, w_ref, b_ref,
                  o_ref, *, bblk, seq):
    m = bblk * seq
    vp, e = emb_ref.shape
    ids = ids_ref[...].reshape(m, 1)                                  # int32
    iota = jax.lax.broadcasted_iota(jnp.int32, (m, vp), 1)
    onehot = jnp.where(iota == ids, 1.0, 0.0).astype(jnp.bfloat16)    # (m, Vp)
    tok = jnp.dot(onehot, emb_ref[...],
                  preferred_element_type=jnp.float32)                 # (m, E)
    x = (tok.reshape(bblk, seq, e) + pos_ref[...][None]).reshape(m, e)
    xn = _layernorm(x, lng_ref[...], lnb_ref[...], 1e-12)
    # nn.Dropout(p=0.01) is identity at inference time.
    h = jnp.dot(xn.astype(jnp.bfloat16), w_ref[...],
                preferred_element_type=jnp.float32) + b_ref[...]
    o_ref[...] = h.reshape(bblk, seq, -1).astype(o_ref.dtype)


def embed_project(token_ids, p):
    B, N = token_ids.shape
    E = p["pos_emb"].shape[1]
    H = p["proj_in_w"].shape[1]
    Vp = p["tok_emb_pad"].shape[0]
    bblk = _pick_bblk(B, N)
    ids = token_ids.reshape(B, N, 1).astype(jnp.int32)
    pos = p["pos_emb"][:N]
    full = lambda b: (0, 0)
    return pl.pallas_call(
        functools.partial(_embed_kernel, bblk=bblk, seq=N),
        out_shape=jax.ShapeDtypeStruct((B, N, H), jnp.bfloat16),
        grid=(B // bblk,),
        in_specs=[
            pl.BlockSpec((bblk, N, 1), lambda b: (b, 0, 0)),
            pl.BlockSpec((Vp, E), full),
            pl.BlockSpec((N, E), full),
            pl.BlockSpec((1, E), full), pl.BlockSpec((1, E), full),
            pl.BlockSpec((E, H), full), pl.BlockSpec((1, H), full),
        ],
        out_specs=pl.BlockSpec((bblk, N, H), lambda b: (b, 0, 0)),
        compiler_params=pltpu.CompilerParams(
            dimension_semantics=("parallel",),
            vmem_limit_bytes=_vmem_limit()),
    )(ids, p["tok_emb_pad"], pos, p["ln_g"], p["ln_b"],
      p["proj_in_w"], p["proj_in_b"])


# ----------------------------------------------------------------------------
# kernel 2: ALL pre-norm transformer layers fused in one pallas_call
#   grid=(batch_tiles, n_layers); residual stream resident in f32 VMEM scratch
# ----------------------------------------------------------------------------
def _layers_kernel(h_ref, ln1g_ref, ln1b_ref, wqkv_ref, wo_ref, bo_ref,
                   ln2g_ref, ln2b_ref, w1_ref, b1_ref, w2_ref, b2_ref,
                   o_ref, x_sc, *, heads, dhp, scale, bblk, seq):
    l = pl.program_id(1)
    m = bblk * seq
    hsz = x_sc.shape[1]

    @pl.when(l == 0)
    def _():  # load the residual stream once per batch tile (kept f32 in VMEM)
        x_sc[...] = h_ref[...].reshape(m, hsz).astype(jnp.float32)

    x = x_sc[...]                                                    # (m, H) f32
    inner_p = heads * dhp

    # ---- pre-norm attention: fused QKV, per-head softmax, fused out-proj ----
    hn = _layernorm(x, ln1g_ref[0], ln1b_ref[0], 1e-5)
    qkv = jnp.dot(hn.astype(jnp.bfloat16), wqkv_ref[0],
                  preferred_element_type=jnp.float32)                # (m, 3*inner_p)
    wo = wo_ref[0]                                                   # (inner_p, H)
    attn = jnp.zeros_like(x)                                         # f32 accumulator
    for hh in range(heads):                                          # static unroll
        off = hh * dhp                                               # 128-aligned
        q = (qkv[:, off:off + dhp] * scale).astype(jnp.bfloat16)
        k = qkv[:, inner_p + off:inner_p + off + dhp].astype(jnp.bfloat16)
        v = qkv[:, 2 * inner_p + off:2 * inner_p + off + dhp].astype(jnp.bfloat16)
        q = q.reshape(bblk, seq, dhp)
        k = k.reshape(bblk, seq, dhp)
        v = v.reshape(bblk, seq, dhp)
        s = jnp.einsum('bqd,bkd->bqk', q, k,
                       preferred_element_type=jnp.float32)           # (bblk, N, N)
        s = s - jnp.max(s, axis=-1, keepdims=True)
        e = jnp.exp(s)
        prob = (e / jnp.sum(e, axis=-1, keepdims=True)).astype(jnp.bfloat16)
        pv = jnp.einsum('bqk,bkd->bqd', prob, v,
                        preferred_element_type=jnp.float32)          # (bblk, N, dhp)
        attn = attn + jnp.dot(pv.reshape(m, dhp).astype(jnp.bfloat16),
                              wo[off:off + dhp, :],
                              preferred_element_type=jnp.float32)
    h1 = x + attn + bo_ref[0]                                        # residual (fused)

    # ---- pre-norm feedforward ----
    hn2 = _layernorm(h1, ln2g_ref[0], ln2b_ref[0], 1e-5)
    f = jnp.dot(hn2.astype(jnp.bfloat16), w1_ref[0],
                preferred_element_type=jnp.float32) + b1_ref[0]
    f = _gelu(f)
    f = jnp.dot(f.astype(jnp.bfloat16), w2_ref[0],
                preferred_element_type=jnp.float32) + b2_ref[0]
    x_new = h1 + f                                                   # residual (fused)
    x_sc[...] = x_new

    @pl.when(l == pl.num_programs(1) - 1)
    def _():
        o_ref[...] = x_new.reshape(bblk, seq, hsz).astype(o_ref.dtype)


def transformer_layers(h, p, *, heads, dim_head):
    B, N, H = h.shape
    L = p["wqkv"].shape[0]
    dhp = p["wqkv"].shape[2] // (3 * heads)
    FF = p["ff_w1"].shape[2]
    bblk = _pick_bblk(B, N)
    hmap = lambda b, l: (b, 0, 0)   # constant over l -> residual block resident
    wmap = lambda b, l: (l, 0, 0)   # streamed per layer (auto-pipelined)
    # TODO(synk): on v7x with very large H/FF, switch the constant-index blocks
    # to pipeline_mode=pl.Buffered(1) / tile ff_inner to stay inside 64 MiB VMEM.
    return pl.pallas_call(
        functools.partial(_layers_kernel, heads=heads, dhp=dhp,
                          scale=float(dim_head) ** -0.5, bblk=bblk, seq=N),
        out_shape=jax.ShapeDtypeStruct((B, N, H), jnp.bfloat16),
        grid=(B // bblk, L),
        in_specs=[
            pl.BlockSpec((bblk, N, H), hmap),
            pl.BlockSpec((1, 1, H), wmap), pl.BlockSpec((1, 1, H), wmap),
            pl.BlockSpec((1, H, 3 * heads * dhp), wmap),
            pl.BlockSpec((1, heads * dhp, H), wmap),
            pl.BlockSpec((1, 1, H), wmap),
            pl.BlockSpec((1, 1, H), wmap), pl.BlockSpec((1, 1, H), wmap),
            pl.BlockSpec((1, H, FF), wmap), pl.BlockSpec((1, 1, FF), wmap),
            pl.BlockSpec((1, FF, H), wmap), pl.BlockSpec((1, 1, H), wmap),
        ],
        out_specs=pl.BlockSpec((bblk, N, H), hmap),
        scratch_shapes=[pltpu.VMEM((bblk * N, H), jnp.float32)],
        compiler_params=pltpu.CompilerParams(
            dimension_semantics=("parallel", "arbitrary"),
            vmem_limit_bytes=_vmem_limit()),
    )(h, p["ln1_g"], p["ln1_b"], p["wqkv"], p["wo"], p["bo"],
      p["ln2_g"], p["ln2_b"], p["ff_w1"], p["ff_b1"], p["ff_w2"], p["ff_b2"])


# ----------------------------------------------------------------------------
# kernel 3: output head (final LN -> project_out -> Token_Prediction -> logits)
#   vocab axis tiled; trunk computed once per batch tile and stashed in VMEM
# ----------------------------------------------------------------------------
def _head_kernel(h_ref, fng_ref, fnb_ref, pw_ref, pb_ref, tpw_ref, tpb_ref,
                 tplg_ref, tplb_ref, embt_ref, bias_ref, o_ref, t_sc,
                 *, bblk, seq):
    v = pl.program_id(1)
    m = bblk * seq

    @pl.when(v == 0)
    def _():
        x = h_ref[...].reshape(m, h_ref.shape[2]).astype(jnp.float32)
        xn = _layernorm(x, fng_ref[...], fnb_ref[...], 1e-5)   # Encoder final norm
        e = jnp.dot(xn.astype(jnp.bfloat16), pw_ref[...],
                    preferred_element_type=jnp.float32) + pb_ref[...]
        t = _gelu(jnp.dot(e.astype(jnp.bfloat16), tpw_ref[...],
                          preferred_element_type=jnp.float32) + tpb_ref[...])
        t = _layernorm(t, tplg_ref[...], tplb_ref[...], 1e-12)
        t_sc[...] = t.astype(jnp.bfloat16)

    logits = jnp.dot(t_sc[...], embt_ref[...],
                     preferred_element_type=jnp.float32)              # (m, vt)
    logits = logits.reshape(bblk, seq, -1) + bias_ref[...][None]
    o_ref[...] = logits.astype(o_ref.dtype)


def output_head(h, p):
    B, N, H = h.shape
    E = p["proj_out_w"].shape[1]
    Vp = p["tok_emb_t_pad"].shape[1]
    bblk = _pick_bblk(B, N)
    vt = _pick_tile(Vp, 2048)
    const = lambda b, v: (0, 0)
    return pl.pallas_call(
        functools.partial(_head_kernel, bblk=bblk, seq=N),
        out_shape=jax.ShapeDtypeStruct((B, N, Vp), jnp.float32),
        grid=(B // bblk, Vp // vt),
        in_specs=[
            pl.BlockSpec((bblk, N, H), lambda b, v: (b, 0, 0)),
            pl.BlockSpec((1, H), const), pl.BlockSpec((1, H), const),
            pl.BlockSpec((H, E), const), pl.BlockSpec((1, E), const),
            pl.BlockSpec((E, E), const), pl.BlockSpec((1, E), const),
            pl.BlockSpec((1, E), const), pl.BlockSpec((1, E), const),
            pl.BlockSpec((E, vt), lambda b, v: (0, v)),
            pl.BlockSpec((N, vt), lambda b, v: (0, v)),
        ],
        out_specs=pl.BlockSpec((bblk, N, vt), lambda b, v: (b, 0, v)),
        scratch_shapes=[pltpu.VMEM((bblk * N, E), jnp.bfloat16)],
        compiler_params=pltpu.CompilerParams(
            dimension_semantics=("parallel", "arbitrary"),
            vmem_limit_bytes=_vmem_limit()),
    )(h, p["final_norm_g"], p["final_norm_b"], p["proj_out_w"], p["proj_out_b"],
      p["tp_w"], p["tp_b"], p["tp_ln_g"], p["tp_ln_b"],
      p["tok_emb_t_pad"], p["bias_pad"])


# ----------------------------------------------------------------------------
# parameter init (deterministic; device-ready layout: bf16 matmul weights,
# f32 norms/biases, stacked per-layer weights with leading L axis, per-head
# q/k/v/wo padding to 128 lanes, 128-padded vocab, pre-transposed tok_emb)
# ----------------------------------------------------------------------------
def init_params(key, *, num_tokens, codebook_sizes, hidden_size, embed_dim,
                n_layers, heads, dim_head, ff_mult):
    V = codebook_sizes + 1
    Vp = _round_up(V, 128)                     # lane-dense logits / gather table
    dhp = _round_up(dim_head, 128)             # lane-aligned per-head slices
    inner = heads * dim_head
    ff_inner = hidden_size * ff_mult
    keys = iter(jax.random.split(key, 16 + 8 * n_layers))

    def nrm(shape, scale=0.02):
        return scale * jax.random.normal(next(keys), shape, dtype=jnp.float32)

    def row(v):
        return jnp.reshape(v, (1, -1)).astype(jnp.float32)

    def pad_head_cols(w):   # (H, heads*dim_head) -> (H, heads*dhp), zero-padded
        w = w.reshape(hidden_size, heads, dim_head)
        w = jnp.pad(w, ((0, 0), (0, 0), (0, dhp - dim_head)))
        return w.reshape(hidden_size, heads * dhp)

    def pad_head_rows(w):   # (heads*dim_head, H) -> (heads*dhp, H), zero-padded
        w = w.reshape(heads, dim_head, hidden_size)
        w = jnp.pad(w, ((0, 0), (0, dhp - dim_head), (0, 0)))
        return w.reshape(heads * dhp, hidden_size)

    tok_emb = nrm((V, embed_dim), 1.0)                     # nn.Embedding ~ N(0,1)
    tok_emb_pad = jnp.zeros((Vp, embed_dim), jnp.float32).at[:V].set(tok_emb)

    ln1_g, ln1_b, wqkv, wo, bo = [], [], [], [], []
    ln2_g, ln2_b, w1, b1, w2, b2 = [], [], [], [], [], []
    for _ in range(n_layers):
        wq = nrm((hidden_size, inner))                     # bias=False in x-transformers
        wk = nrm((hidden_size, inner))
        wv = nrm((hidden_size, inner))
        ln1_g.append(jnp.ones((1, hidden_size), jnp.float32))
        ln1_b.append(jnp.zeros((1, hidden_size), jnp.float32))
        wqkv.append(jnp.concatenate(
            [pad_head_cols(wq), pad_head_cols(wk), pad_head_cols(wv)],
            axis=1).astype(jnp.bfloat16))
        wo.append(pad_head_rows(nrm((inner, hidden_size))).astype(jnp.bfloat16))
        bo.append(jnp.zeros((1, hidden_size), jnp.float32))
        ln2_g.append(jnp.ones((1, hidden_size), jnp.float32))
        ln2_b.append(jnp.zeros((1, hidden_size), jnp.float32))
        w1.append(nrm((hidden_size, ff_inner)).astype(jnp.bfloat16))
        b1.append(jnp.zeros((1, ff_inner), jnp.float32))
        w2.append(nrm((ff_inner, hidden_size)).astype(jnp.bfloat16))
        b2.append(jnp.zeros((1, hidden_size), jnp.float32))

    return {
        # token embedding: gather table and pre-transposed logits weights
        "tok_emb_pad": tok_emb_pad.astype(jnp.bfloat16),       # (Vp, E)
        "tok_emb_t_pad": tok_emb_pad.T.astype(jnp.bfloat16),   # (E, Vp)
        "pos_emb": nrm((num_tokens + 1, embed_dim), 1.0),
        "ln_g": row(jnp.ones((embed_dim,))),
        "ln_b": row(jnp.zeros((embed_dim,))),
        # ContinuousTransformerWrapper project_in / project_out
        "proj_in_w": nrm((embed_dim, hidden_size)).astype(jnp.bfloat16),
        "proj_in_b": row(jnp.zeros((hidden_size,))),
        "proj_out_w": nrm((hidden_size, embed_dim)).astype(jnp.bfloat16),
        "proj_out_b": row(jnp.zeros((embed_dim,))),
        # Encoder final (pre-norm) LayerNorm
        "final_norm_g": row(jnp.ones((hidden_size,))),
        "final_norm_b": row(jnp.zeros((hidden_size,))),
        # Token_Prediction head
        "tp_w": nrm((embed_dim, embed_dim)).astype(jnp.bfloat16),
        "tp_b": row(jnp.zeros((embed_dim,))),
        "tp_ln_g": row(jnp.ones((embed_dim,))),
        "tp_ln_b": row(jnp.zeros((embed_dim,))),
        # self.bias = zeros(num_tokens, codebook_sizes + 1), vocab-padded
        "bias_pad": jnp.zeros((num_tokens, Vp), jnp.float32),
        # stacked per-layer params (leading L axis) for the fused-layers kernel
        "ln1_g": jnp.stack(ln1_g), "ln1_b": jnp.stack(ln1_b),
        "wqkv": jnp.stack(wqkv), "wo": jnp.stack(wo), "bo": jnp.stack(bo),
        "ln2_g": jnp.stack(ln2_g), "ln2_b": jnp.stack(ln2_b),
        "ff_w1": jnp.stack(w1), "ff_b1": jnp.stack(b1),
        "ff_w2": jnp.stack(w2), "ff_b2": jnp.stack(b2),
    }


# ----------------------------------------------------------------------------
# forward pass (mirrors Transformer.forward)
# ----------------------------------------------------------------------------
def transformer_forward(token_ids, params, *, heads, dim_head, codebook_sizes):
    h = embed_project(token_ids, params)                         # (B, N, H) bf16
    h = transformer_layers(h, params, heads=heads, dim_head=dim_head)
    logits = output_head(h, params)                              # (B, N, Vp) f32
    # drop padded vocab columns and the mask-token column (reference [:, :, :-1])
    return logits[:, :, :codebook_sizes]


# ----------------------------------------------------------------------------
if __name__ == "__main__":
    # small, forward-consistent shapes (H/E chosen as 128-multiples per review)
    num_tokens = 8          # sequence length
    codebook_sizes = 16     # vocab = 17 (incl. mask token)
    hidden_size = 128
    embed_dim = 128
    n_layers = 2
    heads = 4
    dim_head = 64           # x-transformers Attention DEFAULT_DIM_HEAD
    ff_mult = 4
    batch = 2

    key = jax.random.PRNGKey(0)
    kp, kx = jax.random.split(key)
    params = init_params(
        kp, num_tokens=num_tokens, codebook_sizes=codebook_sizes,
        hidden_size=hidden_size, embed_dim=embed_dim, n_layers=n_layers,
        heads=heads, dim_head=dim_head, ff_mult=ff_mult)
    token_ids = jax.random.randint(kx, (batch, num_tokens), 0, codebook_sizes + 1,
                                   dtype=jnp.int32)

    fwd = jax.jit(functools.partial(transformer_forward, heads=heads,
                                    dim_head=dim_head,
                                    codebook_sizes=codebook_sizes))
    logits = fwd(token_ids, params)
    jax.block_until_ready(logits)

    assert logits.shape == (batch, num_tokens, codebook_sizes), logits.shape
    assert bool(jnp.all(jnp.isfinite(logits)))
    print("KERNEL_OK")
</pallas_src>

<mosaic_0001>
module attributes {stable_mosaic.version = 11 : i64} {
  func.func @_head_kernel(%arg0: i32, %arg1: i32, %arg2: memref<1x8x128xbf16, #tpu.memory_space<vmem>>, %arg3: memref<1x128xf32, #tpu.memory_space<vmem>>, %arg4: memref<1x128xf32, #tpu.memory_space<vmem>>, %arg5: memref<128x128xbf16, #tpu.memory_space<vmem>>, %arg6: memref<1x128xf32, #tpu.memory_space<vmem>>, %arg7: memref<128x128xbf16, #tpu.memory_space<vmem>>, %arg8: memref<1x128xf32, #tpu.memory_space<vmem>>, %arg9: memref<1x128xf32, #tpu.memory_space<vmem>>, %arg10: memref<1x128xf32, #tpu.memory_space<vmem>>, %arg11: memref<128x128xbf16, #tpu.memory_space<vmem>>, %arg12: memref<8x128xf32, #tpu.memory_space<vmem>>, %arg13: memref<1x8x128xf32, #tpu.memory_space<vmem>>, %arg14: memref<8x128xbf16, #tpu.memory_space<vmem>>) attributes {dimension_semantics = [#tpu.dimension_semantics<parallel>, #tpu.dimension_semantics<arbitrary>], iteration_bounds = array<i64: 2, 1>, scalar_prefetch = 0 : i64, scratch_operands = 1 : i64, tpu.core_type = #tpu.core_type<tc>, window_params = [{transform_indices = @transform_0, window_bounds = array<i64: 1, 8, 128>}, {pipeline_mode = #tpu.pipeline_mode<synchronous>, transform_indices = @transform_1, window_bounds = array<i64: 1, 128>}, {pipeline_mode = #tpu.pipeline_mode<synchronous>, transform_indices = @transform_2, window_bounds = array<i64: 1, 128>}, {pipeline_mode = #tpu.pipeline_mode<synchronous>, transform_indices = @transform_3, window_bounds = array<i64: 128, 128>}, {pipeline_mode = #tpu.pipeline_mode<synchronous>, transform_indices = @transform_4, window_bounds = array<i64: 1, 128>}, {pipeline_mode = #tpu.pipeline_mode<synchronous>, transform_indices = @transform_5, window_bounds = array<i64: 128, 128>}, {pipeline_mode = #tpu.pipeline_mode<synchronous>, transform_indices = @transform_6, window_bounds = array<i64: 1, 128>}, {pipeline_mode = #tpu.pipeline_mode<synchronous>, transform_indices = @transform_7, window_bounds = array<i64: 1, 128>}, {pipeline_mode = #tpu.pipeline_mode<synchronous>, transform_indices = @transform_8, window_bounds = array<i64: 1, 128>}, {transform_indices = @transform_9, window_bounds = array<i64: 128, 128>}, {transform_indices = @transform_10, window_bounds = array<i64: 8, 128>}, {transform_indices = @transform_11, window_bounds = array<i64: 1, 8, 128>}]} {
    %c0_i32 = arith.constant 0 : i32
    %0 = arith.cmpi eq, %arg1, %c0_i32 : i32
    %1 = arith.extui %0 : i1 to i32
    %c0_i32_0 = arith.constant 0 : i32
    %2 = arith.cmpi ne, %1, %c0_i32_0 : i32
    scf.if %2 {
      %c0_9 = arith.constant 0 : index
      %c0_10 = arith.constant 0 : index
      %c0_11 = arith.constant 0 : index
      %11 = vector.load %arg2[%c0_9, %c0_10, %c0_11] : memref<1x8x128xbf16, #tpu.memory_space<vmem>>, vector<1x8x128xbf16>
      %12 = vector.shape_cast %11 : vector<1x8x128xbf16> to vector<8x128xbf16>
      %13 = arith.extf %12 : vector<8x128xbf16> to vector<8x128xf32>
      %c0_12 = arith.constant 0 : index
      %c0_13 = arith.constant 0 : index
      %14 = vector.load %arg3[%c0_12, %c0_13] : memref<1x128xf32, #tpu.memory_space<vmem>>, vector<1x128xf32>
      %c0_14 = arith.constant 0 : index
      %c0_15 = arith.constant 0 : index
      %15 = vector.load %arg4[%c0_14, %c0_15] : memref<1x128xf32, #tpu.memory_space<vmem>>, vector<1x128xf32>
      %cst_16 = arith.constant dense<0.000000e+00> : vector<8xf32>
      %16 = vector.multi_reduction <add>, %13, %cst_16 [1] : vector<8x128xf32> to vector<8xf32>
      %17 = vector.shape_cast %16 : vector<8xf32> to vector<8x1xf32>
      %cst_17 = arith.constant 1.280000e+02 : f32
      %18 = vector.broadcast %cst_17 : f32 to vector<8x1xf32>
      %19 = arith.divf %17, %18 : vector<8x1xf32>
      %20 = vector.broadcast %19 : vector<8x1xf32> to vector<8x128xf32>
      %21 = arith.subf %13, %20 : vector<8x128xf32>
      %22 = arith.mulf %21, %21 : vector<8x128xf32>
      %cst_18 = arith.constant dense<0.000000e+00> : vector<8xf32>
      %23 = vector.multi_reduction <add>, %22, %cst_18 [1] : vector<8x128xf32> to vector<8xf32>
      %24 = vector.shape_cast %23 : vector<8xf32> to vector<8x1xf32>
      %cst_19 = arith.constant 1.280000e+02 : f32
      %25 = vector.broadcast %cst_19 : f32 to vector<8x1xf32>
      %26 = arith.divf %24, %25 : vector<8x1xf32>
      %cst_20 = arith.constant 9.99999974E-6 : f32
      %27 = vector.broadcast %cst_20 : f32 to vector<8x1xf32>
      %28 = arith.addf %26, %27 : vector<8x1xf32>
      %29 = math.rsqrt %28 : vector<8x1xf32>
      %30 = vector.broadcast %29 : vector<8x1xf32> to vector<8x128xf32>
      %31 = arith.mulf %21, %30 : vector<8x128xf32>
      %32 = vector.broadcast %14 : vector<1x128xf32> to vector<8x128xf32>
      %33 = arith.mulf %31, %32 : vector<8x128xf32>
      %34 = vector.broadcast %15 : vector<1x128xf32> to vector<8x128xf32>
      %35 = arith.addf %33, %34 : vector<8x128xf32>
      %36 = arith.truncf %35 : vector<8x128xf32> to vector<8x128xbf16>
      %c0_21 = arith.constant 0 : index
      %c0_22 = arith.constant 0 : index
      %37 = vector.load %arg5[%c0_21, %c0_22] : memref<128x128xbf16, #tpu.memory_space<vmem>>, vector<128x128xbf16>
      %cst_23 = arith.constant dense<0.000000e+00> : vector<8x128xf32>
      %38 = tpu.matmul %36, %37, %cst_23 {dimension_numbers = #tpu.dot_dimension_numbers<[1], [0], [0], [1], [0, 0, 1, 1], [], []>} : vector<8x128xbf16>, vector<128x128xbf16>, vector<8x128xf32> -> vector<8x128xf32>
      %c0_24 = arith.constant 0 : index
      %c0_25 = arith.constant 0 : index
      %39 = vector.load %arg6[%c0_24, %c0_25] : memref<1x128xf32, #tpu.memory_space<vmem>>, vector<1x128xf32>
      %40 = vector.broadcast %39 : vector<1x128xf32> to vector<8x128xf32>
      %41 = arith.addf %38, %40 : vector<8x128xf32>
      %42 = arith.truncf %41 : vector<8x128xf32> to vector<8x128xbf16>
      %c0_26 = arith.constant 0 : index
      %c0_27 = arith.constant 0 : index
      %43 = vector.load %arg7[%c0_26, %c0_27] : memref<128x128xbf16, #tpu.memory_space<vmem>>, vector<128x128xbf16>
      %cst_28 = arith.constant dense<0.000000e+00> : vector<8x128xf32>
      %44 = tpu.matmul %42, %43, %cst_28 {dimension_numbers = #tpu.dot_dimension_numbers<[1], [0], [0], [1], [0, 0, 1, 1], [], []>} : vector<8x128xbf16>, vector<128x128xbf16>, vector<8x128xf32> -> vector<8x128xf32>
      %c0_29 = arith.constant 0 : index
      %c0_30 = arith.constant 0 : index
      %45 = vector.load %arg8[%c0_29, %c0_30] : memref<1x128xf32, #tpu.memory_space<vmem>>, vector<1x128xf32>
      %46 = vector.broadcast %45 : vector<1x128xf32> to vector<8x128xf32>
      %47 = arith.addf %44, %46 : vector<8x128xf32>
      %cst_31 = arith.constant 5.000000e-01 : f32
      %48 = vector.broadcast %cst_31 : f32 to vector<8x128xf32>
      %49 = arith.mulf %48, %47 : vector<8x128xf32>
      %cst_32 = arith.constant 4.471500e-02 : f32
      %50 = vector.broadcast %cst_32 : f32 to vector<8x128xf32>
      %51 = arith.mulf %50, %47 : vector<8x128xf32>
      %52 = arith.mulf %51, %47 : vector<8x128xf32>
      %53 = arith.mulf %52, %47 : vector<8x128xf32>
      %54 = arith.addf %47, %53 : vector<8x128xf32>
      %cst_33 = arith.constant 0.797884583 : f32
      %55 = vector.broadcast %cst_33 : f32 to vector<8x128xf32>
      %56 = arith.mulf %55, %54 : vector<8x128xf32>
      %57 = math.tanh %56 : vector<8x128xf32>
      %cst_34 = arith.constant 1.000000e+00 : f32
      %58 = vector.broadcast %cst_34 : f32 to vector<8x128xf32>
      %59 = arith.addf %58, %57 : vector<8x128xf32>
      %60 = arith.mulf %49, %59 : vector<8x128xf32>
      %c0_35 = arith.constant 0 : index
      %c0_36 = arith.constant 0 : index
      %61 = vector.load %arg9[%c0_35, %c0_36] : memref<1x128xf32, #tpu.memory_space<vmem>>, vector<1x128xf32>
      %c0_37 = arith.constant 0 : index
      %c0_38 = arith.constant 0 : index
      %62 = vector.load %arg10[%c0_37, %c0_38] : memref<1x128xf32, #tpu.memory_space<vmem>>, vector<1x128xf32>
      %cst_39 = arith.constant dense<0.000000e+00> : vector<8xf32>
      %63 = vector.multi_reduction <add>, %60, %cst_39 [1] : vector<8x128xf32> to vector<8xf32>
      %64 = vector.shape_cast %63 : vector<8xf32> to vector<8x1xf32>
      %cst_40 = arith.constant 1.280000e+02 : f32
      %65 = vector.broadcast %cst_40 : f32 to vector<8x1xf32>
      %66 = arith.divf %64, %65 : vector<8x1xf32>
      %67 = vector.broadcast %66 : vector<8x1xf32> to vector<8x128xf32>
      %68 = arith.subf %60, %67 : vector<8x128xf32>
      %69 = arith.mulf %68, %68 : vector<8x128xf32>
      %cst_41 = arith.constant dense<0.000000e+00> : vector<8xf32>
      %70 = vector.multi_reduction <add>, %69, %cst_41 [1] : vector<8x128xf32> to vector<8xf32>
      %71 = vector.shape_cast %70 : vector<8xf32> to vector<8x1xf32>
      %cst_42 = arith.constant 1.280000e+02 : f32
      %72 = vector.broadcast %cst_42 : f32 to vector<8x1xf32>
      %73 = arith.divf %71, %72 : vector<8x1xf32>
      %cst_43 = arith.constant 9.99999996E-13 : f32
      %74 = vector.broadcast %cst_43 : f32 to vector<8x1xf32>
      %75 = arith.addf %73, %74 : vector<8x1xf32>
      %76 = math.rsqrt %75 : vector<8x1xf32>
      %77 = vector.broadcast %76 : vector<8x1xf32> to vector<8x128xf32>
      %78 = arith.mulf %68, %77 : vector<8x128xf32>
      %79 = vector.broadcast %61 : vector<1x128xf32> to vector<8x128xf32>
      %80 = arith.mulf %78, %79 : vector<8x128xf32>
      %81 = vector.broadcast %62 : vector<1x128xf32> to vector<8x128xf32>
      %82 = arith.addf %80, %81 : vector<8x128xf32>
      %83 = arith.truncf %82 : vector<8x128xf32> to vector<8x128xbf16>
      %c0_44 = arith.constant 0 : index
      %c0_45 = arith.constant 0 : index
      %84 = vector.load %arg14[%c0_44, %c0_45] : memref<8x128xbf16, #tpu.memory_space<vmem>>, vector<8x128xbf16>
      tpu.vector_store %arg14[%c0_44, %c0_45], %83 {strides = array<i32>} : memref<8x128xbf16, #tpu.memory_space<vmem>>, vector<8x128xbf16>,
    } else {
    }
    %c0 = arith.constant 0 : index
    %c0_1 = arith.constant 0 : index
    %3 = vector.load %arg14[%c0, %c0_1] : memref<8x128xbf16, #tpu.memory_space<vmem>>, vector<8x128xbf16>
    %c0_2 = arith.constant 0 : index
    %c0_3 = arith.constant 0 : index
    %4 = vector.load %arg11[%c0_2, %c0_3] : memref<128x128xbf16, #tpu.memory_space<vmem>>, vector<128x128xbf16>
    %cst = arith.constant dense<0.000000e+00> : vector<8x128xf32>
    %5 = tpu.matmul %3, %4, %cst {dimension_numbers = #tpu.dot_dimension_numbers<[1], [0], [0], [1], [0, 0, 1, 1], [], []>} : vector<8x128xbf16>, vector<128x128xbf16>, vector<8x128xf32> -> vector<8x128xf32>
    %6 = vector.shape_cast %5 : vector<8x128xf32> to vector<1x8x128xf32>
    %c0_4 = arith.constant 0 : index
    %c0_5 = arith.constant 0 : index
    %7 = vector.load %arg12[%c0_4, %c0_5] : memref<8x128xf32, #tpu.memory_space<vmem>>, vector<8x128xf32>
    %8 = vector.shape_cast %7 : vector<8x128xf32> to vector<1x8x128xf32>
    %9 = arith.addf %6, %8 : vector<1x8x128xf32>
    %c0_6 = arith.constant 0 : index
    %c0_7 = arith.constant 0 : index
    %c0_8 = arith.constant 0 : index
    %10 = vector.load %arg13[%c0_6, %c0_7, %c0_8] : memref<1x8x128xf32, #tpu.memory_space<vmem>>, vector<1x8x128xf32>
    tpu.vector_store %arg13[%c0_6, %c0_7, %c0_8], %9 {strides = array<i32>} : memref<1x8x128xf32, #tpu.memory_space<vmem>>, vector<1x8x128xf32>,
    return
  }
  func.func @transform_0(%arg0: i32, %arg1: i32) -> (i32, i32, i32) {
    %c0_i32 = arith.constant 0 : i32
    %c0_i32_0 = arith.constant 0 : i32
    %c0_i32_1 = arith.constant 0 : i32
    return %arg0, %c0_i32, %c0_i32_0 : i32, i32, i32
  }
  func.func @transform_1(%arg0: i32, %arg1: i32) -> (i32, i32) {
    %c0_i32 = arith.constant 0 : i32
    %c0_i32_0 = arith.constant 0 : i32
    %c0_i32_1 = arith.constant 0 : i32
    return %c0_i32, %c0_i32_0 : i32, i32
  }
  func.func @transform_2(%arg0: i32, %arg1: i32) -> (i32, i32) {
    %c0_i32 = arith.constant 0 : i32
    %c0_i32_0 = arith.constant 0 : i32
    %c0_i32_1 = arith.constant 0 : i32
    return %c0_i32, %c0_i32_0 : i32, i32
  }
  func.func @transform_3(%arg0: i32, %arg1: i32) -> (i32, i32) {
    %c0_i32 = arith.constant 0 : i32
    %c0_i32_0 = arith.constant 0 : i32
    %c0_i32_1 = arith.constant 0 : i32
    return %c0_i32, %c0_i32_0 : i32, i32
  }
  func.func @transform_4(%arg0: i32, %arg1: i32) -> (i32, i32) {
    %c0_i32 = arith.constant 0 : i32
    %c0_i32_0 = arith.constant 0 : i32
    %c0_i32_1 = arith.constant 0 : i32
    return %c0_i32, %c0_i32_0 : i32, i32
  }
  func.func @transform_5(%arg0: i32, %arg1: i32) -> (i32, i32) {
    %c0_i32 = arith.constant 0 : i32
    %c0_i32_0 = arith.constant 0 : i32
    %c0_i32_1 = arith.constant 0 : i32
    return %c0_i32, %c0_i32_0 : i32, i32
  }
  func.func @transform_6(%arg0: i32, %arg1: i32) -> (i32, i32) {
    %c0_i32 = arith.constant 0 : i32
    %c0_i32_0 = arith.constant 0 : i32
    %c0_i32_1 = arith.constant 0 : i32
    return %c0_i32, %c0_i32_0 : i32, i32
  }
  func.func @transform_7(%arg0: i32, %arg1: i32) -> (i32, i32) {
    %c0_i32 = arith.constant 0 : i32
    %c0_i32_0 = arith.constant 0 : i32
    %c0_i32_1 = arith.constant 0 : i32
    return %c0_i32, %c0_i32_0 : i32, i32
  }
  func.func @transform_8(%arg0: i32, %arg1: i32) -> (i32, i32) {
    %c0_i32 = arith.constant 0 : i32
    %c0_i32_0 = arith.constant 0 : i32
    %c0_i32_1 = arith.constant 0 : i32
    return %c0_i32, %c0_i32_0 : i32, i32
  }
  func.func @transform_9(%arg0: i32, %arg1: i32) -> (i32, i32) {
    %c0_i32 = arith.constant 0 : i32
    %c0_i32_0 = arith.constant 0 : i32
    return %c0_i32, %arg1 : i32, i32
  }
  func.func @transform_10(%arg0: i32, %arg1: i32) -> (i32, i32) {
    %c0_i32 = arith.constant 0 : i32
    %c0_i32_0 = arith.constant 0 : i32
    return %c0_i32, %arg1 : i32, i32
  }
  func.func @transform_11(%arg0: i32, %arg1: i32) -> (i32, i32, i32) {
    %c0_i32 = arith.constant 0 : i32
    %c0_i32_0 = arith.constant 0 : i32
    return %arg0, %c0_i32, %arg1 : i32, i32, i32
  }
}

module attributes {stable_mosaic.version = 11 : i64} {
  func.func @_layers_kernel(%arg0: i32, %arg1: i32, %arg2: memref<1x8x128xbf16, #tpu.memory_space<vmem>>, %arg3: memref<1x1x128xf32, #tpu.memory_space<vmem>>, %arg4: memref<1x1x128xf32, #tpu.memory_space<vmem>>, %arg5: memref<1x128x1536xbf16, #tpu.memory_space<vmem>>, %arg6: memref<1x512x128xbf16, #tpu.memory_space<vmem>>, %arg7: memref<1x1x128xf32, #tpu.memory_space<vmem>>, %arg8: memref<1x1x128xf32, #tpu.memory_space<vmem>>, %arg9: memref<1x1x128xf32, #tpu.memory_space<vmem>>, %arg10: memref<1x128x512xbf16, #tpu.memory_space<vmem>>, %arg11: memref<1x1x512xf32, #tpu.memory_space<vmem>>, %arg12: memref<1x512x128xbf16, #tpu.memory_space<vmem>>, %arg13: memref<1x1x128xf32, #tpu.memory_space<vmem>>, %arg14: memref<1x8x128xbf16, #tpu.memory_space<vmem>>, %arg15: memref<8x128xf32, #tpu.memory_space<vmem>>) attributes {dimension_semantics = [#tpu.dimension_semantics<parallel>, #tpu.dimension_semantics<arbitrary>], iteration_bounds = array<i64: 2, 2>, scalar_prefetch = 0 : i64, scratch_operands = 1 : i64, tpu.core_type = #tpu.core_type<tc>, window_params = [{transform_indices = @transform_0, window_bounds = array<i64: 1, 8, 128>}, {transform_indices = @transform_1, window_bounds = array<i64: 1, 1, 128>}, {transform_indices = @transform_2, window_bounds = array<i64: 1, 1, 128>}, {transform_indices = @transform_3, window_bounds = array<i64: 1, 128, 1536>}, {transform_indices = @transform_4, window_bounds = array<i64: 1, 512, 128>}, {transform_indices = @transform_5, window_bounds = array<i64: 1, 1, 128>}, {transform_indices = @transform_6, window_bounds = array<i64: 1, 1, 128>}, {transform_indices = @transform_7, window_bounds = array<i64: 1, 1, 128>}, {transform_indices = @transform_8, window_bounds = array<i64: 1, 128, 512>}, {transform_indices = @transform_9, window_bounds = array<i64: 1, 1, 512>}, {transform_indices = @transform_10, window_bounds = array<i64: 1, 512, 128>}, {transform_indices = @transform_11, window_bounds = array<i64: 1, 1, 128>}, {transform_indices = @transform_12, window_bounds = array<i64: 1, 8, 128>}]} {
    %c0_i32 = arith.constant 0 : i32
    %0 = arith.cmpi eq, %arg1, %c0_i32 : i32
    %1 = arith.extui %0 : i1 to i32
    %c0_i32_0 = arith.constant 0 : i32
    %2 = arith.cmpi ne, %1, %c0_i32_0 : i32
    scf.if %2 {
      %c0_79 = arith.constant 0 : index
      %c0_80 = arith.constant 0 : index
      %c0_81 = arith.constant 0 : index
      %210 = vector.load %arg2[%c0_79, %c0_80, %c0_81] : memref<1x8x128xbf16, #tpu.memory_space<vmem>>, vector<1x8x128xbf16>
      %211 = vector.shape_cast %210 : vector<1x8x128xbf16> to vector<8x128xbf16>
      %212 = arith.extf %211 : vector<8x128xbf16> to vector<8x128xf32>
      %c0_82 = arith.constant 0 : index
      %c0_83 = arith.constant 0 : index
      %213 = vector.load %arg15[%c0_82, %c0_83] : memref<8x128xf32, #tpu.memory_space<vmem>>, vector<8x128xf32>
      tpu.vector_store %arg15[%c0_82, %c0_83], %212 {strides = array<i32>} : memref<8x128xf32, #tpu.memory_space<vmem>>, vector<8x128xf32>,
    } else {
    }
    %c0 = arith.constant 0 : index
    %c0_1 = arith.constant 0 : index
    %3 = vector.load %arg15[%c0, %c0_1] : memref<8x128xf32, #tpu.memory_space<vmem>>, vector<8x128xf32>
    %c0_2 = arith.constant 0 : index
    %c0_3 = arith.constant 0 : index
    %c0_4 = arith.constant 0 : index
    %4 = vector.load %arg3[%c0_2, %c0_3, %c0_4] : memref<1x1x128xf32, #tpu.memory_space<vmem>>, vector<1x1x128xf32>
    %5 = vector.shape_cast %4 : vector<1x1x128xf32> to vector<1x128xf32>
    %c0_5 = arith.constant 0 : index
    %c0_6 = arith.constant 0 : index
    %c0_7 = arith.constant 0 : index
    %6 = vector.load %arg4[%c0_5, %c0_6, %c0_7] : memref<1x1x128xf32, #tpu.memory_space<vmem>>, vector<1x1x128xf32>
    %7 = vector.shape_cast %6 : vector<1x1x128xf32> to vector<1x128xf32>
    %cst = arith.constant dense<0.000000e+00> : vector<8xf32>
    %8 = vector.multi_reduction <add>, %3, %cst [1] : vector<8x128xf32> to vector<8xf32>
    %9 = vector.shape_cast %8 : vector<8xf32> to vector<8x1xf32>
    %cst_8 = arith.constant 1.280000e+02 : f32
    %10 = vector.broadcast %cst_8 : f32 to vector<8x1xf32>
    %11 = arith.divf %9, %10 : vector<8x1xf32>
    %12 = vector.broadcast %11 : vector<8x1xf32> to vector<8x128xf32>
    %13 = arith.subf %3, %12 : vector<8x128xf32>
    %14 = arith.mulf %13, %13 : vector<8x128xf32>
    %cst_9 = arith.constant dense<0.000000e+00> : vector<8xf32>
    %15 = vector.multi_reduction <add>, %14, %cst_9 [1] : vector<8x128xf32> to vector<8xf32>
    %16 = vector.shape_cast %15 : vector<8xf32> to vector<8x1xf32>
    %cst_10 = arith.constant 1.280000e+02 : f32
    %17 = vector.broadcast %cst_10 : f32 to vector<8x1xf32>
    %18 = arith.divf %16, %17 : vector<8x1xf32>
    %cst_11 = arith.constant 9.99999974E-6 : f32
    %19 = vector.broadcast %cst_11 : f32 to vector<8x1xf32>
    %20 = arith.addf %18, %19 : vector<8x1xf32>
    %21 = math.rsqrt %20 : vector<8x1xf32>
    %22 = vector.broadcast %21 : vector<8x1xf32> to vector<8x128xf32>
    %23 = arith.mulf %13, %22 : vector<8x128xf32>
    %24 = vector.broadcast %5 : vector<1x128xf32> to vector<8x128xf32>
    %25 = arith.mulf %23, %24 : vector<8x128xf32>
    %26 = vector.broadcast %7 : vector<1x128xf32> to vector<8x128xf32>
    %27 = arith.addf %25, %26 : vector<8x128xf32>
    %28 = arith.truncf %27 : vector<8x128xf32> to vector<8x128xbf16>
    %c0_12 = arith.constant 0 : index
    %c0_13 = arith.constant 0 : index
    %c0_14 = arith.constant 0 : index
    %29 = vector.load %arg5[%c0_12, %c0_13, %c0_14] : memref<1x128x1536xbf16, #tpu.memory_space<vmem>>, vector<1x128x1536xbf16>
    %30 = vector.shape_cast %29 : vector<1x128x1536xbf16> to vector<128x1536xbf16>
    %cst_15 = arith.constant dense<0.000000e+00> : vector<8x1536xf32>
    %31 = tpu.matmul %28, %30, %cst_15 {dimension_numbers = #tpu.dot_dimension_numbers<[1], [0], [0], [1], [0, 0, 1, 1], [], []>} : vector<8x128xbf16>, vector<128x1536xbf16>, vector<8x1536xf32> -> vector<8x1536xf32>
    %c0_16 = arith.constant 0 : index
    %c0_17 = arith.constant 0 : index
    %c0_18 = arith.constant 0 : index
    %32 = vector.load %arg6[%c0_16, %c0_17, %c0_18] : memref<1x512x128xbf16, #tpu.memory_space<vmem>>, vector<1x512x128xbf16>
    %33 = vector.shape_cast %32 : vector<1x512x128xbf16> to vector<512x128xbf16>
    %cst_19 = arith.constant 0.000000e+00 : f32
    %34 = vector.broadcast %cst_19 : f32 to vector<8x128xf32>
    %35 = vector.extract_strided_slice %31 {offsets = [0, 0], sizes = [8, 128], strides = [1, 1]} : vector<8x1536xf32> to vector<8x128xf32>
    %cst_20 = arith.constant 1.250000e-01 : f32
    %36 = vector.broadcast %cst_20 : f32 to vector<8x128xf32>
    %37 = arith.mulf %35, %36 : vector<8x128xf32>
    %38 = arith.truncf %37 : vector<8x128xf32> to vector<8x128xbf16>
    %39 = vector.extract_strided_slice %31 {offsets = [0, 512], sizes = [8, 128], strides = [1, 1]} : vector<8x1536xf32> to vector<8x128xf32>
    %40 = arith.truncf %39 : vector<8x128xf32> to vector<8x128xbf16>
    %41 = vector.extract_strided_slice %31 {offsets = [0, 1024], sizes = [8, 128], strides = [1, 1]} : vector<8x1536xf32> to vector<8x128xf32>
    %42 = arith.truncf %41 : vector<8x128xf32> to vector<8x128xbf16>
    %43 = vector.shape_cast %38 : vector<8x128xbf16> to vector<1x8x128xbf16>
    %44 = vector.shape_cast %40 : vector<8x128xbf16> to vector<1x8x128xbf16>
    %45 = vector.shape_cast %42 : vector<8x128xbf16> to vector<1x8x128xbf16>
    "tpu.trace_start"() <{level = 10 : i32, message = "bqd,bkd->bqk"}> : () -> ()
    %cst_21 = arith.constant dense<0.000000e+00> : vector<1x8x8xf32>
    %46 = tpu.matmul %43, %44, %cst_21 {dimension_numbers = #tpu.dot_dimension_numbers<[2], [2], [1], [1], [0, 0, 0, 1, 1, 1], [0], [0]>} : vector<1x8x128xbf16>, vector<1x8x128xbf16>, vector<1x8x8xf32> -> vector<1x8x8xf32>
    "tpu.trace_stop"() : () -> ()
    %cst_22 = arith.constant dense<0xFF800000> : vector<1x8xf32>
    %47 = vector.multi_reduction <maximumf>, %46, %cst_22 [2] : vector<1x8x8xf32> to vector<1x8xf32>
    %48 = vector.shape_cast %47 : vector<1x8xf32> to vector<1x8x1xf32>
    %49 = vector.broadcast %48 : vector<1x8x1xf32> to vector<1x8x8xf32>
    %50 = arith.subf %46, %49 : vector<1x8x8xf32>
    %51 = math.exp %50 : vector<1x8x8xf32>
    %cst_23 = arith.constant dense<0.000000e+00> : vector<1x8xf32>
    %52 = vector.multi_reduction <add>, %51, %cst_23 [2] : vector<1x8x8xf32> to vector<1x8xf32>
    %53 = vector.shape_cast %52 : vector<1x8xf32> to vector<1x8x1xf32>
    %54 = vector.broadcast %53 : vector<1x8x1xf32> to vector<1x8x8xf32>
    %55 = arith.divf %51, %54 : vector<1x8x8xf32>
    %56 = arith.truncf %55 : vector<1x8x8xf32> to vector<1x8x8xbf16>
    "tpu.trace_start"() <{level = 10 : i32, message = "bqk,bkd->bqd"}> : () -> ()
    %cst_24 = arith.constant dense<0.000000e+00> : vector<1x8x128xf32>
    %57 = tpu.matmul %56, %45, %cst_24 {dimension_numbers = #tpu.dot_dimension_numbers<[2], [1], [1], [2], [0, 0, 0, 1, 1, 2], [0], [0]>} : vector<1x8x8xbf16>, vector<1x8x128xbf16>, vector<1x8x128xf32> -> vector<1x8x128xf32>
    "tpu.trace_stop"() : () -> ()
    %58 = vector.shape_cast %57 : vector<1x8x128xf32> to vector<8x128xf32>
    %59 = arith.truncf %58 : vector<8x128xf32> to vector<8x128xbf16>
    %60 = vector.extract_strided_slice %33 {offsets = [0, 0], sizes = [128, 128], strides = [1, 1]} : vector<512x128xbf16> to vector<128x128xbf16>
    %cst_25 = arith.constant dense<0.000000e+00> : vector<8x128xf32>
    %61 = tpu.matmul %59, %60, %cst_25 {dimension_numbers = #tpu.dot_dimension_numbers<[1], [0], [0], [1], [0, 0, 1, 1], [], []>} : vector<8x128xbf16>, vector<128x128xbf16>, vector<8x128xf32> -> vector<8x128xf32>
    %62 = arith.addf %34, %61 : vector<8x128xf32>
    %63 = vector.extract_strided_slice %31 {offsets = [0, 128], sizes = [8, 128], strides = [1, 1]} : vector<8x1536xf32> to vector<8x128xf32>
    %cst_26 = arith.constant 1.250000e-01 : f32
    %64 = vector.broadcast %cst_26 : f32 to vector<8x128xf32>
    %65 = arith.mulf %63, %64 : vector<8x128xf32>
    %66 = arith.truncf %65 : vector<8x128xf32> to vector<8x128xbf16>
    %67 = vector.extract_strided_slice %31 {offsets = [0, 640], sizes = [8, 128], strides = [1, 1]} : vector<8x1536xf32> to vector<8x128xf32>
    %68 = arith.truncf %67 : vector<8x128xf32> to vector<8x128xbf16>
    %69 = vector.extract_strided_slice %31 {offsets = [0, 1152], sizes = [8, 128], strides = [1, 1]} : vector<8x1536xf32> to vector<8x128xf32>
    %70 = arith.truncf %69 : vector<8x128xf32> to vector<8x128xbf16>
    %71 = vector.shape_cast %66 : vector<8x128xbf16> to vector<1x8x128xbf16>
    %72 = vector.shape_cast %68 : vector<8x128xbf16> to vector<1x8x128xbf16>
    %73 = vector.shape_cast %70 : vector<8x128xbf16> to vector<1x8x128xbf16>
    "tpu.trace_start"() <{level = 10 : i32, message = "bqd,bkd->bqk"}> : () -> ()
    %cst_27 = arith.constant dense<0.000000e+00> : vector<1x8x8xf32>
    %74 = tpu.matmul %71, %72, %cst_27 {dimension_numbers = #tpu.dot_dimension_numbers<[2], [2], [1], [1], [0, 0, 0, 1, 1, 1], [0], [0]>} : vector<1x8x128xbf16>, vector<1x8x128xbf16>, vector<1x8x8xf32> -> vector<1x8x8xf32>
    "tpu.trace_stop"() : () -> ()
    %cst_28 = arith.constant dense<0xFF800000> : vector<1x8xf32>
    %75 = vector.multi_reduction <maximumf>, %74, %cst_28 [2] : vector<1x8x8xf32> to vector<1x8xf32>
    %76 = vector.shape_cast %75 : vector<1x8xf32> to vector<1x8x1xf32>
    %77 = vector.broadcast %76 : vector<1x8x1xf32> to vector<1x8x8xf32>
    %78 = arith.subf %74, %77 : vector<1x8x8xf32>
    %79 = math.exp %78 : vector<1x8x8xf32>
    %cst_29 = arith.constant dense<0.000000e+00> : vector<1x8xf32>
    %80 = vector.multi_reduction <add>, %79, %cst_29 [2] : vector<1x8x8xf32> to vector<1x8xf32>
    %81 = vector.shape_cast %80 : vector<1x8xf32> to vector<1x8x1xf32>
    %82 = vector.broadcast %81 : vector<1x8x1xf32> to vector<1x8x8xf32>
    %83 = arith.divf %79, %82 : vector<1x8x8xf32>
    %84 = arith.truncf %83 : vector<1x8x8xf32> to vector<1x8x8xbf16>
    "tpu.trace_start"() <{level = 10 : i32, message = "bqk,bkd->bqd"}> : () -> ()
    %cst_30 = arith.constant dense<0.000000e+00> : vector<1x8x128xf32>
    %85 = tpu.matmul %84, %73, %cst_30 {dimension_numbers = #tpu.dot_dimension_numbers<[2], [1], [1], [2], [0, 0, 0, 1, 1, 2], [0], [0]>} : vector<1x8x8xbf16>, vector<1x8x128xbf16>, vector<1x8x128xf32> -> vector<1x8x128xf32>
    "tpu.trace_stop"() : () -> ()
    %86 = vector.shape_cast %85 : vector<1x8x128xf32> to vector<8x128xf32>
    %87 = arith.truncf %86 : vector<8x128xf32> to vector<8x128xbf16>
    %88 = vector.extract_strided_slice %33 {offsets = [128, 0], sizes = [128, 128], strides = [1, 1]} : vector<512x128xbf16> to vector<128x128xbf16>
    %cst_31 = arith.constant dense<0.000000e+00> : vector<8x128xf32>
    %89 = tpu.matmul %87, %88, %cst_31 {dimension_numbers = #tpu.dot_dimension_numbers<[1], [0], [0], [1], [0, 0, 1, 1], [], []>} : vector<8x128xbf16>, vector<128x128xbf16>, vector<8x128xf32> -> vector<8x128xf32>
    %90 = arith.addf %62, %89 : vector<8x128xf32>
    %91 = vector.extract_strided_slice %31 {offsets = [0, 256], sizes = [8, 128], strides = [1, 1]} : vector<8x1536xf32> to vector<8x128xf32>
    %cst_32 = arith.constant 1.250000e-01 : f32
    %92 = vector.broadcast %cst_32 : f32 to vector<8x128xf32>
    %93 = arith.mulf %91, %92 : vector<8x128xf32>
    %94 = arith.truncf %93 : vector<8x128xf32> to vector<8x128xbf16>
    %95 = vector.extract_strided_slice %31 {offsets = [0, 768], sizes = [8, 128], strides = [1, 1]} : vector<8x1536xf32> to vector<8x128xf32>
    %96 = arith.truncf %95 : vector<8x128xf32> to vector<8x128xbf16>
    %97 = vector.extract_strided_slice %31 {offsets = [0, 1280], sizes = [8, 128], strides = [1, 1]} : vector<8x1536xf32> to vector<8x128xf32>
    %98 = arith.truncf %97 : vector<8x128xf32> to vector<8x128xbf16>
    %99 = vector.shape_cast %94 : vector<8x128xbf16> to vector<1x8x128xbf16>
    %100 = vector.shape_cast %96 : vector<8x128xbf16> to vector<1x8x128xbf16>
    %101 = vector.shape_cast %98 : vector<8x128xbf16> to vector<1x8x128xbf16>
    "tpu.trace_start"() <{level = 10 : i32, message = "bqd,bkd->bqk"}> : () -> ()
    %cst_33 = arith.constant dense<0.000000e+00> : vector<1x8x8xf32>
    %102 = tpu.matmul %99, %100, %cst_33 {dimension_numbers = #tpu.dot_dimension_numbers<[2], [2], [1], [1], [0, 0, 0, 1, 1, 1], [0], [0]>} : vector<1x8x128xbf16>, vector<1x8x128xbf16>, vector<1x8x8xf32> -> vector<1x8x8xf32>
    "tpu.trace_stop"() : () -> ()
    %cst_34 = arith.constant dense<0xFF800000> : vector<1x8xf32>
    %103 = vector.multi_reduction <maximumf>, %102, %cst_34 [2] : vector<1x8x8xf32> to vector<1x8xf32>
    %104 = vector.shape_cast %103 : vector<1x8xf32> to vector<1x8x1xf32>
    %105 = vector.broadcast %104 : vector<1x8x1xf32> to vector<1x8x8xf32>
    %106 = arith.subf %102, %105 : vector<1x8x8xf32>
    %107 = math.exp %106 : vector<1x8x8xf32>
    %cst_35 = arith.constant dense<0.000000e+00> : vector<1x8xf32>
    %108 = vector.multi_reduction <add>, %107, %cst_35 [2] : vector<1x8x8xf32> to vector<1x8xf32>
    %109 = vector.shape_cast %108 : vector<1x8xf32> to vector<1x8x1xf32>
    %110 = vector.broadcast %109 : vector<1x8x1xf32> to vector<1x8x8xf32>
    %111 = arith.divf %107, %110 : vector<1x8x8xf32>
    %112 = arith.truncf %111 : vector<1x8x8xf32> to vector<1x8x8xbf16>
    "tpu.trace_start"() <{level = 10 : i32, message = "bqk,bkd->bqd"}> : () -> ()
    %cst_36 = arith.constant dense<0.000000e+00> : vector<1x8x128xf32>
    %113 = tpu.matmul %112, %101, %cst_36 {dimension_numbers = #tpu.dot_dimension_numbers<[2], [1], [1], [2], [0, 0, 0, 1, 1, 2], [0], [0]>} : vector<1x8x8xbf16>, vector<1x8x128xbf16>, vector<1x8x128xf32> -> vector<1x8x128xf32>
    "tpu.trace_stop"() : () -> ()
    %114 = vector.shape_cast %113 : vector<1x8x128xf32> to vector<8x128xf32>
    %115 = arith.truncf %114 : vector<8x128xf32> to vector<8x128xbf16>
    %116 = vector.extract_strided_slice %33 {offsets = [256, 0], sizes = [128, 128], strides = [1, 1]} : vector<512x128xbf16> to vector<128x128xbf16>
    %cst_37 = arith.constant dense<0.000000e+00> : vector<8x128xf32>
    %117 = tpu.matmul %115, %116, %cst_37 {dimension_numbers = #tpu.dot_dimension_numbers<[1], [0], [0], [1], [0, 0, 1, 1], [], []>} : vector<8x128xbf16>, vector<128x128xbf16>, vector<8x128xf32> -> vector<8x128xf32>
    %118 = arith.addf %90, %117 : vector<8x128xf32>
    %119 = vector.extract_strided_slice %31 {offsets = [0, 384], sizes = [8, 128], strides = [1, 1]} : vector<8x1536xf32> to vector<8x128xf32>
    %cst_38 = arith.constant 1.250000e-01 : f32
    %120 = vector.broadcast %cst_38 : f32 to vector<8x128xf32>
    %121 = arith.mulf %119, %120 : vector<8x128xf32>
    %122 = arith.truncf %121 : vector<8x128xf32> to vector<8x128xbf16>
    %123 = vector.extract_strided_slice %31 {offsets = [0, 896], sizes = [8, 128], strides = [1, 1]} : vector<8x1536xf32> to vector<8x128xf32>
    %124 = arith.truncf %123 : vector<8x128xf32> to vector<8x128xbf16>
    %125 = vector.extract_strided_slice %31 {offsets = [0, 1408], sizes = [8, 128], strides = [1, 1]} : vector<8x1536xf32> to vector<8x128xf32>
    %126 = arith.truncf %125 : vector<8x128xf32> to vector<8x128xbf16>
    %127 = vector.shape_cast %122 : vector<8x128xbf16> to vector<1x8x128xbf16>
    %128 = vector.shape_cast %124 : vector<8x128xbf16> to vector<1x8x128xbf16>
    %129 = vector.shape_cast %126 : vector<8x128xbf16> to vector<1x8x128xbf16>
    "tpu.trace_start"() <{level = 10 : i32, message = "bqd,bkd->bqk"}> : () -> ()
    %cst_39 = arith.constant dense<0.000000e+00> : vector<1x8x8xf32>
    %130 = tpu.matmul %127, %128, %cst_39 {dimension_numbers = #tpu.dot_dimension_numbers<[2], [2], [1], [1], [0, 0, 0, 1, 1, 1], [0], [0]>} : vector<1x8x128xbf16>, vector<1x8x128xbf16>, vector<1x8x8xf32> -> vector<1x8x8xf32>
    "tpu.trace_stop"() : () -> ()
    %cst_40 = arith.constant dense<0xFF800000> : vector<1x8xf32>
    %131 = vector.multi_reduction <maximumf>, %130, %cst_40 [2] : vector<1x8x8xf32> to vector<1x8xf32>
    %132 = vector.shape_cast %131 : vector<1x8xf32> to vector<1x8x1xf32>
    %133 = vector.broadcast %132 : vector<1x8x1xf32> to vector<1x8x8xf32>
    %134 = arith.subf %130, %133 : vector<1x8x8xf32>
    %135 = math.exp %134 : vector<1x8x8xf32>
    %cst_41 = arith.constant dense<0.000000e+00> : vector<1x8xf32>
    %136 = vector.multi_reduction <add>, %135, %cst_41 [2] : vector<1x8x8xf32> to vector<1x8xf32>
    %137 = vector.shape_cast %136 : vector<1x8xf32> to vector<1x8x1xf32>
    %138 = vector.broadcast %137 : vector<1x8x1xf32> to vector<1x8x8xf32>
    %139 = arith.divf %135, %138 : vector<1x8x8xf32>
    %140 = arith.truncf %139 : vector<1x8x8xf32> to vector<1x8x8xbf16>
    "tpu.trace_start"() <{level = 10 : i32, message = "bqk,bkd->bqd"}> : () -> ()
    %cst_42 = arith.constant dense<0.000000e+00> : vector<1x8x128xf32>
    %141 = tpu.matmul %140, %129, %cst_42 {dimension_numbers = #tpu.dot_dimension_numbers<[2], [1], [1], [2], [0, 0, 0, 1, 1, 2], [0], [0]>} : vector<1x8x8xbf16>, vector<1x8x128xbf16>, vector<1x8x128xf32> -> vector<1x8x128xf32>
    "tpu.trace_stop"() : () -> ()
    %142 = vector.shape_cast %141 : vector<1x8x128xf32> to vector<8x128xf32>
    %143 = arith.truncf %142 : vector<8x128xf32> to vector<8x128xbf16>
    %144 = vector.extract_strided_slice %33 {offsets = [384, 0], sizes = [128, 128], strides = [1, 1]} : vector<512x128xbf16> to vector<128x128xbf16>
    %cst_43 = arith.constant dense<0.000000e+00> : vector<8x128xf32>
    %145 = tpu.matmul %143, %144, %cst_43 {dimension_numbers = #tpu.dot_dimension_numbers<[1], [0], [0], [1], [0, 0, 1, 1], [], []>} : vector<8x128xbf16>, vector<128x128xbf16>, vector<8x128xf32> -> vector<8x128xf32>
    %146 = arith.addf %118, %145 : vector<8x128xf32>
    %147 = arith.addf %3, %146 : vector<8x128xf32>
    %c0_44 = arith.constant 0 : index
    %c0_45 = arith.constant 0 : index
    %c0_46 = arith.constant 0 : index
    %148 = vector.load %arg7[%c0_44, %c0_45, %c0_46] : memref<1x1x128xf32, #tpu.memory_space<vmem>>, vector<1x1x128xf32>
    %149 = vector.shape_cast %148 : vector<1x1x128xf32> to vector<1x128xf32>
    %150 = vector.broadcast %149 : vector<1x128xf32> to vector<8x128xf32>
    %151 = arith.addf %147, %150 : vector<8x128xf32>
    %c0_47 = arith.constant 0 : index
    %c0_48 = arith.constant 0 : index
    %c0_49 = arith.constant 0 : index
    %152 = vector.load %arg8[%c0_47, %c0_48, %c0_49] : memref<1x1x128xf32, #tpu.memory_space<vmem>>, vector<1x1x128xf32>
    %153 = vector.shape_cast %152 : vector<1x1x128xf32> to vector<1x128xf32>
    %c0_50 = arith.constant 0 : index
    %c0_51 = arith.constant 0 : index
    %c0_52 = arith.constant 0 : index
    %154 = vector.load %arg9[%c0_50, %c0_51, %c0_52] : memref<1x1x128xf32, #tpu.memory_space<vmem>>, vector<1x1x128xf32>
    %155 = vector.shape_cast %154 : vector<1x1x128xf32> to vector<1x128xf32>
    %cst_53 = arith.constant dense<0.000000e+00> : vector<8xf32>
    %156 = vector.multi_reduction <add>, %151, %cst_53 [1] : vector<8x128xf32> to vector<8xf32>
    %157 = vector.shape_cast %156 : vector<8xf32> to vector<8x1xf32>
    %cst_54 = arith.constant 1.280000e+02 : f32
    %158 = vector.broadcast %cst_54 : f32 to vector<8x1xf32>
    %159 = arith.divf %157, %158 : vector<8x1xf32>
    %160 = vector.broadcast %159 : vector<8x1xf32> to vector<8x128xf32>
    %161 = arith.subf %151, %160 : vector<8x128xf32>
    %162 = arith.mulf %161, %161 : vector<8x128xf32>
    %cst_55 = arith.constant dense<0.000000e+00> : vector<8xf32>
    %163 = vector.multi_reduction <add>, %162, %cst_55 [1] : vector<8x128xf32> to vector<8xf32>
    %164 = vector.shape_cast %163 : vector<8xf32> to vector<8x1xf32>
    %cst_56 = arith.constant 1.280000e+02 : f32
    %165 = vector.broadcast %cst_56 : f32 to vector<8x1xf32>
    %166 = arith.divf %164, %165 : vector<8x1xf32>
    %cst_57 = arith.constant 9.99999974E-6 : f32
    %167 = vector.broadcast %cst_57 : f32 to vector<8x1xf32>
    %168 = arith.addf %166, %167 : vector<8x1xf32>
    %169 = math.rsqrt %168 : vector<8x1xf32>
    %170 = vector.broadcast %169 : vector<8x1xf32> to vector<8x128xf32>
    %171 = arith.mulf %161, %170 : vector<8x128xf32>
    %172 = vector.broadcast %153 : vector<1x128xf32> to vector<8x128xf32>
    %173 = arith.mulf %171, %172 : vector<8x128xf32>
    %174 = vector.broadcast %155 : vector<1x128xf32> to vector<8x128xf32>
    %175 = arith.addf %173, %174 : vector<8x128xf32>
    %176 = arith.truncf %175 : vector<8x128xf32> to vector<8x128xbf16>
    %c0_58 = arith.constant 0 : index
    %c0_59 = arith.constant 0 : index
    %c0_60 = arith.constant 0 : index
    %177 = vector.load %arg10[%c0_58, %c0_59, %c0_60] : memref<1x128x512xbf16, #tpu.memory_space<vmem>>, vector<1x128x512xbf16>
    %178 = vector.shape_cast %177 : vector<1x128x512xbf16> to vector<128x512xbf16>
    %cst_61 = arith.constant dense<0.000000e+00> : vector<8x512xf32>
    %179 = tpu.matmul %176, %178, %cst_61 {dimension_numbers = #tpu.dot_dimension_numbers<[1], [0], [0], [1], [0, 0, 1, 1], [], []>} : vector<8x128xbf16>, vector<128x512xbf16>, vector<8x512xf32> -> vector<8x512xf32>
    %c0_62 = arith.constant 0 : index
    %c0_63 = arith.constant 0 : index
    %c0_64 = arith.constant 0 : index
    %180 = vector.load %arg11[%c0_62, %c0_63, %c0_64] : memref<1x1x512xf32, #tpu.memory_space<vmem>>, vector<1x1x512xf32>
    %181 = vector.shape_cast %180 : vector<1x1x512xf32> to vector<1x512xf32>
    %182 = vector.broadcast %181 : vector<1x512xf32> to vector<8x512xf32>
    %183 = arith.addf %179, %182 : vector<8x512xf32>
    %cst_65 = arith.constant 5.000000e-01 : f32
    %184 = vector.broadcast %cst_65 : f32 to vector<8x512xf32>
    %185 = arith.mulf %184, %183 : vector<8x512xf32>
    %cst_66 = arith.constant 4.471500e-02 : f32
    %186 = vector.broadcast %cst_66 : f32 to vector<8x512xf32>
    %187 = arith.mulf %186, %183 : vector<8x512xf32>
    %188 = arith.mulf %187, %183 : vector<8x512xf32>
    %189 = arith.mulf %188, %183 : vector<8x512xf32>
    %190 = arith.addf %183, %189 : vector<8x512xf32>
    %cst_67 = arith.constant 0.797884583 : f32
    %191 = vector.broadcast %cst_67 : f32 to vector<8x512xf32>
    %192 = arith.mulf %191, %190 : vector<8x512xf32>
    %193 = math.tanh %192 : vector<8x512xf32>
    %cst_68 = arith.constant 1.000000e+00 : f32
    %194 = vector.broadcast %cst_68 : f32 to vector<8x512xf32>
    %195 = arith.addf %194, %193 : vector<8x512xf32>
    %196 = arith.mulf %185, %195 : vector<8x512xf32>
    %197 = arith.truncf %196 : vector<8x512xf32> to vector<8x512xbf16>
    %c0_69 = arith.constant 0 : index
    %c0_70 = arith.constant 0 : index
    %c0_71 = arith.constant 0 : index
    %198 = vector.load %arg12[%c0_69, %c0_70, %c0_71] : memref<1x512x128xbf16, #tpu.memory_space<vmem>>, vector<1x512x128xbf16>
    %199 = vector.shape_cast %198 : vector<1x512x128xbf16> to vector<512x128xbf16>
    %cst_72 = arith.constant dense<0.000000e+00> : vector<8x128xf32>
    %200 = tpu.matmul %197, %199, %cst_72 {dimension_numbers = #tpu.dot_dimension_numbers<[1], [0], [0], [1], [0, 0, 1, 1], [], []>} : vector<8x512xbf16>, vector<512x128xbf16>, vector<8x128xf32> -> vector<8x128xf32>
    %c0_73 = arith.constant 0 : index
    %c0_74 = arith.constant 0 : index
    %c0_75 = arith.constant 0 : index
    %201 = vector.load %arg13[%c0_73, %c0_74, %c0_75] : memref<1x1x128xf32, #tpu.memory_space<vmem>>, vector<1x1x128xf32>
    %202 = vector.shape_cast %201 : vector<1x1x128xf32> to vector<1x128xf32>
    %203 = vector.broadcast %202 : vector<1x128xf32> to vector<8x128xf32>
    %204 = arith.addf %200, %203 : vector<8x128xf32>
    %205 = arith.addf %151, %204 : vector<8x128xf32>
    %c0_76 = arith.constant 0 : index
    %c0_77 = arith.constant 0 : index
    %206 = vector.load %arg15[%c0_76, %c0_77] : memref<8x128xf32, #tpu.memory_space<vmem>>, vector<8x128xf32>
    tpu.vector_store %arg15[%c0_76, %c0_77], %205 {strides = array<i32>} : memref<8x128xf32, #tpu.memory_space<vmem>>, vector<8x128xf32>,
    %c1_i32 = arith.constant 1 : i32
    %207 = arith.cmpi eq, %arg1, %c1_i32 : i32
    %208 = arith.extui %207 : i1 to i32
    %c0_i32_78 = arith.constant 0 : i32
    %209 = arith.cmpi ne, %208, %c0_i32_78 : i32
    scf.if %209 {
      %210 = vector.shape_cast %205 : vector<8x128xf32> to vector<1x8x128xf32>
      %211 = arith.truncf %210 : vector<1x8x128xf32> to vector<1x8x128xbf16>
      %c0_79 = arith.constant 0 : index
      %c0_80 = arith.constant 0 : index
      %c0_81 = arith.constant 0 : index
      %212 = vector.load %arg14[%c0_79, %c0_80, %c0_81] : memref<1x8x128xbf16, #tpu.memory_space<vmem>>, vector<1x8x128xbf16>
      tpu.vector_store %arg14[%c0_79, %c0_80, %c0_81], %211 {strides = array<i32>} : memref<1x8x128xbf16, #tpu.memory_space<vmem>>, vector<1x8x128xbf16>,
    } else {
    }
    return
  }
  func.func @transform_0(%arg0: i32, %arg1: i32) -> (i32, i32, i32) {
    %c0_i32 = arith.constant 0 : i32
    %c0_i32_0 = arith.constant 0 : i32
    %c0_i32_1 = arith.constant 0 : i32
    return %arg0, %c0_i32, %c0_i32_0 : i32, i32, i32
  }
  func.func @transform_1(%arg0: i32, %arg1: i32) -> (i32, i32, i32) {
    %c0_i32 = arith.constant 0 : i32
    %c0_i32_0 = arith.constant 0 : i32
    %c0_i32_1 = arith.constant 0 : i32
    return %arg1, %c0_i32, %c0_i32_0 : i32, i32, i32
  }
  func.func @transform_2(%arg0: i32, %arg1: i32) -> (i32, i32, i32) {
    %c0_i32 = arith.constant 0 : i32
    %c0_i32_0 = arith.constant 0 : i32
    %c0_i32_1 = arith.constant 0 : i32
    return %arg1, %c0_i32, %c0_i32_0 : i32, i32, i32
  }
  func.func @transform_3(%arg0: i32, %arg1: i32) -> (i32, i32, i32) {
    %c0_i32 = arith.constant 0 : i32
    %c0_i32_0 = arith.constant 0 : i32
    %c0_i32_1 = arith.constant 0 : i32
    return %arg1, %c0_i32, %c0_i32_0 : i32, i32, i32
  }
  func.func @transform_4(%arg0: i32, %arg1: i32) -> (i32, i32, i32) {
    %c0_i32 = arith.constant 0 : i32
    %c0_i32_0 = arith.constant 0 : i32
    %c0_i32_1 = arith.constant 0 : i32
    return %arg1, %c0_i32, %c0_i32_0 : i32, i32, i32
  }
  func.func @transform_5(%arg0: i32, %arg1: i32) -> (i32, i32, i32) {
    %c0_i32 = arith.constant 0 : i32
    %c0_i32_0 = arith.constant 0 : i32
    %c0_i32_1 = arith.constant 0 : i32
    return %arg1, %c0_i32, %c0_i32_0 : i32, i32, i32
  }
  func.func @transform_6(%arg0: i32, %arg1: i32) -> (i32, i32, i32) {
    %c0_i32 = arith.constant 0 : i32
    %c0_i32_0 = arith.constant 0 : i32
    %c0_i32_1 = arith.constant 0 : i32
    return %arg1, %c0_i32, %c0_i32_0 : i32, i32, i32
  }
  func.func @transform_7(%arg0: i32, %arg1: i32) -> (i32, i32, i32) {
    %c0_i32 = arith.constant 0 : i32
    %c0_i32_0 = arith.constant 0 : i32
    %c0_i32_1 = arith.constant 0 : i32
    return %arg1, %c0_i32, %c0_i32_0 : i32, i32, i32
  }
  func.func @transform_8(%arg0: i32, %arg1: i32) -> (i32, i32, i32) {
    %c0_i32 = arith.constant 0 : i32
    %c0_i32_0 = arith.constant 0 : i32
    %c0_i32_1 = arith.constant 0 : i32
    return %arg1, %c0_i32, %c0_i32_0 : i32, i32, i32
  }
  func.func @transform_9(%arg0: i32, %arg1: i32) -> (i32, i32, i32) {
    %c0_i32 = arith.constant 0 : i32
    %c0_i32_0 = arith.constant 0 : i32
    %c0_i32_1 = arith.constant 0 : i32
    return %arg1, %c0_i32, %c0_i32_0 : i32, i32, i32
  }
  func.func @transform_10(%arg0: i32, %arg1: i32) -> (i32, i32, i32) {
    %c0_i32 = arith.constant 0 : i32
    %c0_i32_0 = arith.constant 0 : i32
    %c0_i32_1 = arith.constant 0 : i32
    return %arg1, %c0_i32, %c0_i32_0 : i32, i32, i32
  }
  func.func @transform_11(%arg0: i32, %arg1: i32) -> (i32, i32, i32) {
    %c0_i32 = arith.constant 0 : i32
    %c0_i32_0 = arith.constant 0 : i32
    %c0_i32_1 = arith.constant 0 : i32
    return %arg1, %c0_i32, %c0_i32_0 : i32, i32, i32
  }
  func.func @transform_12(%arg0: i32, %arg1: i32) -> (i32, i32, i32) {
    %c0_i32 = arith.constant 0 : i32
    %c0_i32_0 = arith.constant 0 : i32
    %c0_i32_1 = arith.constant 0 : i32
    return %arg0, %c0_i32, %c0_i32_0 : i32, i32, i32
  }
}

module attributes {stable_mosaic.version = 11 : i64} {
  func.func @_embed_kernel(%arg0: i32, %arg1: memref<1x8x1xi32, #tpu.memory_space<vmem>>, %arg2: memref<128x128xbf16, #tpu.memory_space<vmem>>, %arg3: memref<8x128xf32, #tpu.memory_space<vmem>>, %arg4: memref<1x128xf32, #tpu.memory_space<vmem>>, %arg5: memref<1x128xf32, #tpu.memory_space<vmem>>, %arg6: memref<128x128xbf16, #tpu.memory_space<vmem>>, %arg7: memref<1x128xf32, #tpu.memory_space<vmem>>, %arg8: memref<1x8x128xbf16, #tpu.memory_space<vmem>>) attributes {dimension_semantics = [#tpu.dimension_semantics<parallel>], iteration_bounds = array<i64: 2>, scalar_prefetch = 0 : i64, scratch_operands = 0 : i64, tpu.core_type = #tpu.core_type<tc>, window_params = [{transform_indices = @transform_0, window_bounds = array<i64: 1, 8, 1>}, {pipeline_mode = #tpu.pipeline_mode<synchronous>, transform_indices = @transform_1, window_bounds = array<i64: 128, 128>}, {pipeline_mode = #tpu.pipeline_mode<synchronous>, transform_indices = @transform_2, window_bounds = array<i64: 8, 128>}, {pipeline_mode = #tpu.pipeline_mode<synchronous>, transform_indices = @transform_3, window_bounds = array<i64: 1, 128>}, {pipeline_mode = #tpu.pipeline_mode<synchronous>, transform_indices = @transform_4, window_bounds = array<i64: 1, 128>}, {pipeline_mode = #tpu.pipeline_mode<synchronous>, transform_indices = @transform_5, window_bounds = array<i64: 128, 128>}, {pipeline_mode = #tpu.pipeline_mode<synchronous>, transform_indices = @transform_6, window_bounds = array<i64: 1, 128>}, {transform_indices = @transform_7, window_bounds = array<i64: 1, 8, 128>}]} {
    %c0 = arith.constant 0 : index
    %c0_0 = arith.constant 0 : index
    %c0_1 = arith.constant 0 : index
    %0 = vector.load %arg1[%c0, %c0_0, %c0_1] : memref<1x8x1xi32, #tpu.memory_space<vmem>>, vector<1x8x1xi32>
    %1 = vector.shape_cast %0 : vector<1x8x1xi32> to vector<8x1xi32>
    %2 = tpu.iota {dimensions = array<i32: 1>} : vector<8x128xi32>
    %3 = vector.broadcast %1 : vector<8x1xi32> to vector<8x128xi32>
    %4 = arith.cmpi eq, %2, %3 : vector<8x128xi32>
    %cst = arith.constant 1.000000e+00 : f32
    %cst_2 = arith.constant 0.000000e+00 : f32
    %5 = vector.broadcast %cst : f32 to vector<8x128xf32>
    %6 = vector.broadcast %cst_2 : f32 to vector<8x128xf32>
    %7 = arith.select %4, %5, %6 : vector<8x128xi1>, vector<8x128xf32>
    %8 = arith.truncf %7 : vector<8x128xf32> to vector<8x128xbf16>
    %c0_3 = arith.constant 0 : index
    %c0_4 = arith.constant 0 : index
    %9 = vector.load %arg2[%c0_3, %c0_4] : memref<128x128xbf16, #tpu.memory_space<vmem>>, vector<128x128xbf16>
    %cst_5 = arith.constant dense<0.000000e+00> : vector<8x128xf32>
    %10 = tpu.matmul %8, %9, %cst_5 {dimension_numbers = #tpu.dot_dimension_numbers<[1], [0], [0], [1], [0, 0, 1, 1], [], []>} : vector<8x128xbf16>, vector<128x128xbf16>, vector<8x128xf32> -> vector<8x128xf32>
    %11 = vector.shape_cast %10 : vector<8x128xf32> to vector<1x8x128xf32>
    %c0_6 = arith.constant 0 : index
    %c0_7 = arith.constant 0 : index
    %12 = vector.load %arg3[%c0_6, %c0_7] : memref<8x128xf32, #tpu.memory_space<vmem>>, vector<8x128xf32>
    %13 = vector.shape_cast %12 : vector<8x128xf32> to vector<1x8x128xf32>
    %14 = arith.addf %11, %13 : vector<1x8x128xf32>
    %15 = vector.shape_cast %14 : vector<1x8x128xf32> to vector<8x128xf32>
    %c0_8 = arith.constant 0 : index
    %c0_9 = arith.constant 0 : index
    %16 = vector.load %arg4[%c0_8, %c0_9] : memref<1x128xf32, #tpu.memory_space<vmem>>, vector<1x128xf32>
    %c0_10 = arith.constant 0 : index
    %c0_11 = arith.constant 0 : index
    %17 = vector.load %arg5[%c0_10, %c0_11] : memref<1x128xf32, #tpu.memory_space<vmem>>, vector<1x128xf32>
    %cst_12 = arith.constant dense<0.000000e+00> : vector<8xf32>
    %18 = vector.multi_reduction <add>, %15, %cst_12 [1] : vector<8x128xf32> to vector<8xf32>
    %19 = vector.shape_cast %18 : vector<8xf32> to vector<8x1xf32>
    %cst_13 = arith.constant 1.280000e+02 : f32
    %20 = vector.broadcast %cst_13 : f32 to vector<8x1xf32>
    %21 = arith.divf %19, %20 : vector<8x1xf32>
    %22 = vector.broadcast %21 : vector<8x1xf32> to vector<8x128xf32>
    %23 = arith.subf %15, %22 : vector<8x128xf32>
    %24 = arith.mulf %23, %23 : vector<8x128xf32>
    %cst_14 = arith.constant dense<0.000000e+00> : vector<8xf32>
    %25 = vector.multi_reduction <add>, %24, %cst_14 [1] : vector<8x128xf32> to vector<8xf32>
    %26 = vector.shape_cast %25 : vector<8xf32> to vector<8x1xf32>
    %cst_15 = arith.constant 1.280000e+02 : f32
    %27 = vector.broadcast %cst_15 : f32 to vector<8x1xf32>
    %28 = arith.divf %26, %27 : vector<8x1xf32>
    %cst_16 = arith.constant 9.99999996E-13 : f32
    %29 = vector.broadcast %cst_16 : f32 to vector<8x1xf32>
    %30 = arith.addf %28, %29 : vector<8x1xf32>
    %31 = math.rsqrt %30 : vector<8x1xf32>
    %32 = vector.broadcast %31 : vector<8x1xf32> to vector<8x128xf32>
    %33 = arith.mulf %23, %32 : vector<8x128xf32>
    %34 = vector.broadcast %16 : vector<1x128xf32> to vector<8x128xf32>
    %35 = arith.mulf %33, %34 : vector<8x128xf32>
    %36 = vector.broadcast %17 : vector<1x128xf32> to vector<8x128xf32>
    %37 = arith.addf %35, %36 : vector<8x128xf32>
    %38 = arith.truncf %37 : vector<8x128xf32> to vector<8x128xbf16>
    %c0_17 = arith.constant 0 : index
    %c0_18 = arith.constant 0 : index
    %39 = vector.load %arg6[%c0_17, %c0_18] : memref<128x128xbf16, #tpu.memory_space<vmem>>, vector<128x128xbf16>
    %cst_19 = arith.constant dense<0.000000e+00> : vector<8x128xf32>
    %40 = tpu.matmul %38, %39, %cst_19 {dimension_numbers = #tpu.dot_dimension_numbers<[1], [0], [0], [1], [0, 0, 1, 1], [], []>} : vector<8x128xbf16>, vector<128x128xbf16>, vector<8x128xf32> -> vector<8x128xf32>
    %c0_20 = arith.constant 0 : index
    %c0_21 = arith.constant 0 : index
    %41 = vector.load %arg7[%c0_20, %c0_21] : memref<1x128xf32, #tpu.memory_space<vmem>>, vector<1x128xf32>
    %42 = vector.broadcast %41 : vector<1x128xf32> to vector<8x128xf32>
    %43 = arith.addf %40, %42 : vector<8x128xf32>
    %44 = vector.shape_cast %43 : vector<8x128xf32> to vector<1x8x128xf32>
    %45 = arith.truncf %44 : vector<1x8x128xf32> to vector<1x8x128xbf16>
    %c0_22 = arith.constant 0 : index
    %c0_23 = arith.constant 0 : index
    %c0_24 = arith.constant 0 : index
    %46 = vector.load %arg8[%c0_22, %c0_23, %c0_24] : memref<1x8x128xbf16, #tpu.memory_space<vmem>>, vector<1x8x128xbf16>
    tpu.vector_store %arg8[%c0_22, %c0_23, %c0_24], %45 {strides = array<i32>} : memref<1x8x128xbf16, #tpu.memory_space<vmem>>, vector<1x8x128xbf16>,
    return
  }
  func.func @transform_0(%arg0: i32) -> (i32, i32, i32) {
    %c0_i32 = arith.constant 0 : i32
    %c0_i32_0 = arith.constant 0 : i32
    %c0_i32_1 = arith.constant 0 : i32
    return %arg0, %c0_i32, %c0_i32_0 : i32, i32, i32
  }
  func.func @transform_1(%arg0: i32) -> (i32, i32) {
    %c0_i32 = arith.constant 0 : i32
    %c0_i32_0 = arith.constant 0 : i32
    %c0_i32_1 = arith.constant 0 : i32
    return %c0_i32, %c0_i32_0 : i32, i32
  }
  func.func @transform_2(%arg0: i32) -> (i32, i32) {
    %c0_i32 = arith.constant 0 : i32
    %c0_i32_0 = arith.constant 0 : i32
    %c0_i32_1 = arith.constant 0 : i32
    return %c0_i32, %c0_i32_0 : i32, i32
  }
  func.func @transform_3(%arg0: i32) -> (i32, i32) {
    %c0_i32 = arith.constant 0 : i32
    %c0_i32_0 = arith.constant 0 : i32
    %c0_i32_1 = arith.constant 0 : i32
    return %c0_i32, %c0_i32_0 : i32, i32
  }
  func.func @transform_4(%arg0: i32) -> (i32, i32) {
    %c0_i32 = arith.constant 0 : i32
    %c0_i32_0 = arith.constant 0 : i32
    %c0_i32_1 = arith.constant 0 : i32
    return %c0_i32, %c0_i32_0 : i32, i32
  }
  func.func @transform_5(%arg0: i32) -> (i32, i32) {
    %c0_i32 = arith.constant 0 : i32
    %c0_i32_0 = arith.constant 0 : i32
    %c0_i32_1 = arith.constant 0 : i32
    return %c0_i32, %c0_i32_0 : i32, i32
  }
  func.func @transform_6(%arg0: i32) -> (i32, i32) {
    %c0_i32 = arith.constant 0 : i32
    %c0_i32_0 = arith.constant 0 : i32
    %c0_i32_1 = arith.constant 0 : i32
    return %c0_i32, %c0_i32_0 : i32, i32
  }
  func.func @transform_7(%arg0: i32) -> (i32, i32, i32) {
    %c0_i32 = arith.constant 0 : i32
    %c0_i32_0 = arith.constant 0 : i32
    %c0_i32_1 = arith.constant 0 : i32
    return %arg0, %c0_i32, %c0_i32_0 : i32, i32, i32
  }
}

</mosaic_0001>

<bundles_post_ra>
// kernel: transformer_forward.5
= control target key start
LH: loop header
LB: loop body
LE: loop exit
PB: predicated region body
PF: predicated region fallthrough
CT: control target
= control target key end

     0   :  { %s1543_s0 = inlined_call_operand.vmem [shape: bf16[2,8,128], index: 0, kind: input, shape index: {}]   ;;  %s1544_s1 = inlined_call_operand.vmem [shape: f32[1,128], index: 1, kind: input, shape index: {}]   ;;  %s1545_s2 = inlined_call_operand.vmem [shape: f32[1,128], index: 2, kind: input, shape index: {}]   ;;  %s1546_s3 = inlined_call_operand.vmem [shape: bf16[128,128], index: 3, kind: input, shape index: {}]   ;;  %s1547_s4 = inlined_call_operand.vmem [shape: f32[1,128], index: 4, kind: input, shape index: {}]   ;;  %s1548_s5 = inlined_call_operand.vmem [shape: bf16[128,128], index: 5, kind: input, shape index: {}]   ;;  %s1549_s6 = inlined_call_operand.vmem [shape: f32[1,128], index: 6, kind: input, shape index: {}]   ;;  %s1550_s7 = inlined_call_operand.vmem [shape: f32[1,128], index: 7, kind: input, shape index: {}]   ;;  %s1551_s8 = inlined_call_operand.vmem [shape: f32[1,128], index: 8, kind: input, shape index: {}]   ;;  %s1552_s9 = inlined_call_operand.vmem [shape: bf16[128,128], index: 9, kind: input, shape index: {}]   ;;  %s1553_s10 = inlined_call_operand.vmem [shape: f32[8,128], index: 10, kind: input, shape index: {}]   ;;  %s1554_s11 = inlined_call_operand.hbm [shape: f32[2,8,128], index: 11, kind: output, shape index: {}]  }
   0x1   :  { %1555 = sst [smem:[#allocation6_spill]] %s1543_s0 }
   0x2   :  { %16 = vsyncpa [#allocation4], 0 }
   0x3   :  { %18 = vsyncpa [#allocation4 + $0x1], 0  ;;  %s1308_s17 = smov 0   ;;  %s1310_s18 = smov 0  }
   0x4   :  { %s1312_s19 = smov 0   ;;  %s1314_s20 = smov 0  }
   0x5   :  { %s1316_s21 = smov 0   ;;  %s1318_s22 = smov 0  }
   0x6 LB: > { %s948_s23 = sadd.s32 4294967295, %s1243_s22   ;;  %s949_s24 = sadd.s32 4294967294, %s1243_s22   ;;  %s1243_s22 = sphi %s1318_s22, %s24_s22   ;;  %s1239_s21 = sphi %s1316_s21, %s1563_s21   ;;  %s1235_s20 = sphi %s1314_s20, %s1562_s20   ;;  %s1231_s19 = sphi %s1312_s19, %s1561_s19   ;;  %s1227_s18 = sphi %s1310_s18, %s1560_s18   ;;  %s1223_s17 = sphi %s1308_s17, %s1559_s17  }
   0x7   : > { %s36_s25 = sadd.s32 1, %s1239_s21  ;;  %s291_s26 = sadd.s32 1, %s1231_s19 }
   0x8   : > { %p38_p0 = scmp.ge.s32.totalorder %s36_s25, 2  ;;  %p301_p1 = scmp.ne.s32.totalorder %s1231_s19, %s1227_s18 }
   0x9   : > { %p302_p2 = scmp.eq.s32.totalorder %s948_s23, 1  ;;  %p307_p3 = scmp.ne.s32.totalorder %s1227_s18, %s1223_s17 }
   0xa   : > { %s1565_s25 = smov (%p38_p0, %s36_s25), 0  ;;  %p308_p5 = scmp.eq.s32.totalorder %s949_s24, 1 }
   0xb   : > { %p1348_p4 = por %p302_p2, %p301_p1  ;;  %s286_s28 = ssub.s32 %s1239_s21, %s1565_s25 }
   0xc   : > { %p954_p6 = scmp.ge.s32.totalorder %s1243_s22, 1  ;;  %p289_p7 = scmp.eq.s32.totalorder %s286_s28, 0 }
   0xd   : > { %p1355_p8 = por %p308_p5, %p307_p3  ;;  %p371_p9 = scmp.lt.s32.totalorder %s1243_s22, 3 }
   0xe   : > { %s1361_s30 = scalar_select %p289_p7, %s1231_s19, %s291_s26  }
   0xf   : > { %p372_p10 = pnand %p954_p6, %p371_p9 }
  0x10   : > { %p418_p11 = scmp.lt.s32.totalorder (!%p372_p10), %s1235_s20, 1  ;;  %s1558_s0 = sld [smem:[#allocation6_spill]] (!%p372_p10)  ;;  %v1135_v2 = vld [vmem:[%s1546_s3] sm:$0xff] (!%p372_p10)   ;;  %v1245_v3 = vmov (!%p372_p10), 0.0   ;;  %v1136_v4 = vld [vmem:[%s1546_s3 + $0x8] sm:$0xff] (!%p372_p10)   ;;  %v1137_v9 = vld [vmem:[%s1546_s3 + $0x10] sm:$0xff] (!%p372_p10)  }
  0x11   : > { %375 = sbr.rel (%p372_p10) target bundleno = 1348 (0x544), region = 64  ;;  %1018 = vmatprep.subr.bf16.mxu0 (!%p372_p10), %v1245_v3  ;;  %1038 = vmatprep.subr.bf16.mxu1 (!%p372_p10), %v1245_v3  ;;  %v1138_v10 = vld [vmem:[%s1546_s3 + $0x18] sm:$0xff] (!%p372_p10)   ;;  %v1139_v11 = vld [vmem:[%s1546_s3 + $0x20] sm:$0xff] (!%p372_p10)   ;;  %vm1246_vm0 = vmmov (!%p372_p10), 0   ;;  %v1140_v12 = vld [vmem:[%s1546_s3 + $0x28] sm:$0xff] (!%p372_p10)   ;;  %s415_s14 = sand.u32 (!%p372_p10), 1, %s1227_s18  }
  0x12   : > { %1019 = vmatpush3.bf16.msra.mxu0 (!%p372_p10), %v1135_v2  ;;  %1034 = vmatprep.mubr.msk.bf16.mxu0 (!%p372_p10), %vm1246_vm0, %v1245_v3  ;;  %v1141_v13 = vld [vmem:[%s1546_s3 + $0x30] sm:$0xff] (!%p372_p10)   ;;  %v1142_v14 = vld [vmem:[%s1546_s3 + $0x38] sm:$0xff] (!%p372_p10)   ;;  %v1143_v15 = vld [vmem:[%s1548_s5] sm:$0xff] (!%p372_p10)   ;;  %s955_s15 = sshll.u32 (!%p372_p10), %s415_s14, 3  ;;  %s988_s24 = sshll.u32 (!%p372_p10), %s1235_s20, 7 }
  0x13   : > { %1020 = vmatprep.subr.bf16.mxu0 (!%p372_p10), %v1245_v3  ;;  %1054 = vmatprep.mubr.msk.bf16.mxu1 (!%p372_p10), %vm1246_vm0, %v1245_v3  ;;  %v1144_v16 = vld [vmem:[%s1548_s5 + $0x8] sm:$0xff] (!%p372_p10)   ;;  %v1145_v17 = vld [vmem:[%s1548_s5 + $0x10] sm:$0xff] (!%p372_p10)   ;;  %v1146_v18 = vld [vmem:[%s1548_s5 + $0x18] sm:$0xff] (!%p372_p10)   ;;  %s417_s26 = scalar_lea.vmem (!%p372_p10), [#allocation3], %s955_s15  ;;  %s1247_s15 = smov (!%p372_p10), [#allocation3]  }
  0x14   : > { %1039 = vmatpush3.bf16.msra.mxu1 (!%p372_p10), %v1143_v15  ;;  %v1147_v19 = vld [vmem:[%s1548_s5 + $0x20] sm:$0xff] (!%p372_p10)   ;;  %v1148_v20 = vld [vmem:[%s1548_s5 + $0x28] sm:$0xff] (!%p372_p10)   ;;  %v1149_v21 = vld [vmem:[%s1548_s5 + $0x30] sm:$0xff] (!%p372_p10)   ;;  %s850_s28 = sshll.u32 (!%p372_p10), %s417_s26, 4  ;;  %s1169_s23 = sshll.u32 (!%p372_p10), %s1247_s15, 4  ;;  %s1498_s28 = int_to_ptr.vmem [resolvable:$true] %s850_s28  ;;  %s1170_s23 = int_to_ptr.vmem [resolvable:$false] %s1169_s23 }
  0x15   : > { %1040 = vmatprep.subr.bf16.mxu1 (!%p372_p10), %v1245_v3  ;;  %v957_v26 = vld [vmem:[%s1544_s1] ss:$0 sm:$0xff] (!%p372_p10)  ;;  %v1150_v32 = vld [vmem:[%s1548_s5 + $0x38] sm:$0xff] (!%p372_p10)   ;;  %v1152_v60 = vld [vmem:[%s1552_s9 + $0x8] sm:$0xff] (!%p372_p10)   ;;  %p1172_p1 = scmp.lt.s32.totalorder (!%p372_p10), %s1498_s28, %s1170_s23 }
  0x16   : > { %1021 = vmatpush3.bf16.msra.mxu0 (!%p372_p10), %v1136_v4  ;;  %v958_v28 = vld [vmem:[%s1545_s2] ss:$0 sm:$0xff] (!%p372_p10)  ;;  %v1153_v61 = vld [vmem:[%s1552_s9 + $0x10] sm:$0xff] (!%p372_p10)   ;;  %v1154_v62 = vld [vmem:[%s1552_s9 + $0x18] sm:$0xff] (!%p372_p10)  }
  0x17   : > { %1022 = vmatprep.subr.bf16.mxu0 (!%p372_p10), %v1245_v3  ;;  %v959_v33 = vld [vmem:[%s1547_s4] ss:$0 sm:$0xff] (!%p372_p10)  ;;  %v1158_v2 = vld [vmem:[%s1552_s9 + $0x38] sm:$0xff] (!%p372_p10)  }
  0x18   : > { %s419_s12 = scalar_select %p418_p11, %s1235_s20, 1  ;;  %1041 = vmatpush3.bf16.msra.mxu1 %v1144_v16  ;;  %v968_v40 = vld [vmem:[%s1549_s6] ss:$0 sm:$0xff] }
  0x19   : > { %1042 = vmatprep.subr.bf16.mxu1 %v1245_v3  ;;  %v1151_v59 = vld [vmem:[%s1552_s9] sm:$0xff]   ;;  %s1165_s20 = scalar_lea.vmem %s1498_s28, 128 }
  0x1a   : > { %s956_s13 = sshll.u32 %s419_s12, 2  ;;  %1023 = vmatpush3.bf16.msra.mxu0 %v1137_v9  ;;  %v1155_v63 = vld [vmem:[%s1552_s9 + $0x20] sm:$0xff]   ;;  %p1166_p12 = scmp.ne.s32.totalorder %s1498_s28, %s1165_s20 }
  0x1b   : > { %s421_s16 = scalar_lea.vmem %s1558_s0, %s956_s13  ;;  %1024 = vmatprep.subr.bf16.mxu0 %v1245_v3  ;;  %s1496_s0 = scalar_lea.hbm %s1554_s11, %s988_s24 }
  0x1c   : > { %v435_v0 = vld [vmem:[%s421_s16] sm:$0xf]  ;;  %1043 = vmatpush3.bf16.msra.mxu1 %v1145_v17  ;;  %s836_s16 = scalar_lea.sflag [#allocation4], %s415_s14  ;;  %p1167_p13 = pnand %p1166_p12, %p1348_p4 }
  0x1d   : > { %v436_v1 = vunpack.c.l.bf16 %v435_v0  ;;  %1044 = vmatprep.subr.bf16.mxu1 %v1245_v3  ;;  %v1156_v0 = vld [vmem:[%s1552_s9 + $0x28] sm:$0xff]   ;;  %s1171_s12 = scalar_lea.vmem %s1170_s23, 256 }
  0x1e   : > { %1025 = vmatpush3.bf16.msra.mxu0 %v1138_v10  ;;  %v978_v10 = vld [vmem:[%s1551_s8] ss:$0 sm:$0xff]  ;;  %p1168_p0 = pneg %p1167_p13  ;;  %p1173_p2 = scmp.lt.s32.totalorder %s1171_s12, %s1165_s20 }
  0x1f   : > { %439 = vadd.xlane.f32.xlu0 %v436_v1  ;;  %1026 = vmatprep.subr.bf16.mxu0 %v1245_v3 }
  0x20   : > { %1045 = vmatpush3.bf16.msra.mxu1 %v1146_v18  ;;  %p1174_p3 = por %p1173_p2, %p1172_p1 }
  0x21   : > { %1046 = vmatprep.subr.bf16.mxu1 %v1245_v3 }
  0x22   : > { %1027 = vmatpush3.bf16.msra.mxu0 %v1139_v11  ;;  %p1175_p5 = pnand %p1174_p3, %p1168_p0 }
  0x23   : > { %1028 = vmatprep.subr.bf16.mxu0 %v1245_v3 }
  0x24   : > { %1047 = vmatpush3.bf16.msra.mxu1 %v1147_v19 }
  0x25   : > { %1048 = vmatprep.subr.bf16.mxu1 %v1245_v3 }
  0x26   : > { %1029 = vmatpush3.bf16.msra.mxu0 %v1140_v12 }
  0x27   : > { %1030 = vmatprep.subr.bf16.mxu0 %v1245_v3 }
  0x28   : > { %1049 = vmatpush3.bf16.msra.mxu1 %v1148_v20 }
  0x29   : > { %1050 = vmatprep.subr.bf16.mxu1 %v1245_v3 }
  0x2a   : > { %1031 = vmatpush3.bf16.msra.mxu0 %v1141_v13 }
  0x2b   : > { %1032 = vmatprep.subr.bf16.mxu0 %v1245_v3 }
  0x2c   : > { %1051 = vmatpush3.bf16.msra.mxu1 %v1149_v21 }
  0x2d   : > { %1052 = vmatprep.subr.bf16.mxu1 %v1245_v3 }
  0x2e   : > { %1033 = vmatpush3.bf16.msra.mxu0 %v1142_v14  ;;  %v832_v14 = vld [vmem:[%s1553_s10] sm:$0xff] }
  0x2f   : > { %1058 = vmatprep.subr.bf16.mxu0 %v1245_v3 }
  0x30   : > { %1053 = vmatpush3.bf16.msra.mxu1 %v1150_v32 }
  0xac   : > { %v440_v5 = vpop.xlane.xlu0 %439 }
  0xad   : > { %v442_v6 = vmul.f32 0.0078125, %v440_v5 }
  0xaf   : > { %v443_v7 = vsub.f32 %v436_v1, %v442_v6  ;;  %v1157_v1 = vld [vmem:[%s1552_s9 + $0x30] sm:$0xff]  }
  0xb1   : > { %v444_v8 = vmul.f32 %v443_v7, %v443_v7 }
  0xb3   : > { %445 = vadd.xlane.f32.xlu0 %v444_v8  ;;  %v977_v8 = vld [vmem:[%s1550_s7] ss:$0 sm:$0xff] }
 0x140   : > { %v446_v22 = vpop.xlane.xlu0 %445 }
 0x141   : > { %v447_v23 = vmul.f32 0.0078125, %v446_v22 }
 0x143   : > { %v448_v24 = vadd.f32 1e-05, %v447_v23 }
 0x145   : > { %1159 = vrsqrt.f32 %v448_v24 }
 0x14f   : > { %v1160_v25 = vpop.eup %1159 }
 0x150   : > { %v450_v27 = vmul.f32 %v1160_v25, %v443_v7 }
 0x152   : > { %v457_v29 = vmul.f32 %v957_v26, %v450_v27 }
 0x154   : > { %v464_v30 = vadd.f32 %v958_v28, %v457_v29 }
 0x156   : > { %v465_v31 = vpack.c.bf16 %v464_v30, %v464_v30 }
 0x158   : > { %1035 = vmatmul.mubr.bf16.vlgmr.msra.gmra.mrb[0].mxu0 %v465_v31 }
 0x159   : > { %1074 = vmatprep.mubr.msk.bf16.mxu0 %vm1246_vm0, %v1245_v3  ;;  %1059 = vmatpush3.bf16.msra.mxu0 %v1151_v59 }
 0x15a   : > { %1060 = vmatprep.subr.bf16.mxu0 %v1245_v3 }
 0x15d   : > { %1061 = vmatpush3.bf16.msra.mxu0 %v1152_v60 }
 0x15e   : > { %1062 = vmatprep.subr.bf16.mxu0 %v1245_v3 }
 0x161   : > { %1063 = vmatpush3.bf16.msra.mxu0 %v1153_v61 }
 0x162   : > { %1064 = vmatprep.subr.bf16.mxu0 %v1245_v3 }
 0x165   : > { %1065 = vmatpush3.bf16.msra.mxu0 %v1154_v62 }
 0x166   : > { %1066 = vmatprep.subr.bf16.mxu0 %v1245_v3 }
 0x169   : > { %1067 = vmatpush3.bf16.msra.mxu0 %v1155_v63 }
 0x16a   : > { %1068 = vmatprep.subr.bf16.mxu0 %v1245_v3 }
 0x16d   : > { %1069 = vmatpush3.bf16.msra.mxu0 %v1156_v0 }
 0x16e   : > { %1070 = vmatprep.subr.bf16.mxu0 %v1245_v3 }
 0x171   : > { %1071 = vmatpush3.bf16.msra.mxu0 %v1157_v1 }
 0x172   : > { %1072 = vmatprep.subr.bf16.mxu0 %v1245_v3 }
 0x175   : > { %1073 = vmatpush3.bf16.msra.mxu0 %v1158_v2 }
 0x22b   : > { %v571_v34 = vpop.f32.mrb[0].mxu0 }
 0x22c   : > { %v572_v35 = vadd.f32 %v959_v33, %v571_v34  ;;  %v1036_v36 = vpop.f32.mrb[1].mxu0 }
 0x22d   : > { %v574_v37 = vpop.f32.mrb[2].mxu0 }
 0x22e   : > { %v577_v38 = vpack.c.bf16 %v572_v35, %v572_v35  ;;  %v1037_v39 = vpop.f32.mrb[3].mxu0 }
 0x230   : > { %1055 = vmatmul.mubr.bf16.vlgmr.msra.gmra.mrb[0].mxu1 %v577_v38 }
 0x303   : > { %v683_v41 = vpop.f32.mrb[0].mxu1 }
 0x304   : > { %v684_v42 = vadd.f32 %v968_v40, %v683_v41  ;;  %v1056_v43 = vpop.f32.mrb[1].mxu1 }
 0x305   : > { %v686_v44 = vpop.f32.mrb[2].mxu1 }
 0x306   : > { %v690_v45 = vmul.f32 0.044715, %v684_v42  ;;  %v1057_v46 = vpop.f32.mrb[3].mxu1  ;;  %v689_v52 = vmul.f32 0.5, %v684_v42 }
 0x308   : > { %v691_v47 = vmul.f32 %v690_v45, %v684_v42 }
 0x30a   : > { %v692_v48 = vmul.f32 %v691_v47, %v684_v42 }
 0x30c   : > { %v693_v49 = vadd.f32 %v692_v48, %v684_v42 }
 0x30e   : > { %v694_v50 = vmul.f32 0.7978846, %v693_v49 }
 0x310   : > { %1161 = vtanh.f32 %v694_v50 }
 0x31a   : > { %v1162_v51 = vpop.eup %1161 }
 0x31b   : > { %v696_v53 = vadd.f32 1.0, %v1162_v51 }
 0x31d   : > { %v697_v54 = vmul.f32 %v696_v53, %v689_v52 }
 0x31f   : > { %700 = vadd.xlane.f32.xlu1 %v697_v54 }
 0x3ac   : > { %v701_v55 = vpop.xlane.xlu1 %700 }
 0x3ad   : > { %v702_v56 = vmul.f32 0.0078125, %v701_v55 }
 0x3af   : > { %v703_v57 = vsub.f32 %v697_v54, %v702_v56 }
 0x3b1   : > { %v704_v58 = vmul.f32 %v703_v57, %v703_v57 }
 0x3b3   : > { %705 = vadd.xlane.f32.xlu1 %v704_v58 }
 0x440   : > { %v706_v4 = vpop.xlane.xlu1 %705 }
 0x441   : > { %v707_v5 = vmul.f32 0.0078125, %v706_v4 }
 0x443   : > { %v708_v6 = vadd.f32 1e-12, %v707_v5 }
 0x445   : > { %1163 = vrsqrt.f32 %v708_v6 }
 0x44f   : > { %v1164_v7 = vpop.eup %1163 }
 0x450   : > { %v710_v9 = vmul.f32 %v1164_v7, %v703_v57 }
 0x452   : > { %v717_v11 = vmul.f32 %v977_v8, %v710_v9 }
 0x454   : > { %v724_v12 = vadd.f32 %v978_v10, %v717_v11 }
 0x456   : > { %v725_v3 = vpack.c.bf16 %v724_v12, %v724_v12 }
 0x458   : > { %726 = vst [vmem:[#allocation2] sm:$0xf] %v725_v3 }
 0x45f   : > { %v727_v13 = vld [vmem:[#allocation2] sm:$0xf] }
 0x460   : > { %1075 = vmatmul.mubr.bf16.vlgmr.msra.gmra.mrb[4].mxu0 %v727_v13 }
 0x533   : > { %v826_v15 = vpop.f32.mrb[4].mxu0 }
 0x534   : > { %v833_v16 = vadd.f32 %v832_v14, %v826_v15  ;;  %v1076_v17 = vpop.f32.mrb[5].mxu0 }
 0x535   : > { %v829_v18 = vpop.f32.mrb[6].mxu0 }
 0x536   : > { %834 = vst [vmem:[%s417_s26] sm:$0xff] %v833_v16  ;;  %v1077_v19 = vpop.f32.mrb[7].mxu0 }
 0x537   : > { %1178 = shalt.err (!%p1175_p5)
}
 0x538   : > { %s1179_s14 = scalar_lea.hbm %s1496_s0, 128  ;;  %s1183_s13 = scalar_lea.hbm %s1554_s11, 256 }
 0x539   : > { %p1180_p6 = scmp.ne.s32.totalorder %s1496_s0, %s1179_s14  ;;  %p1184_p10 = scmp.lt.u32.totalorder %s1496_s0, %s1554_s11 }
 0x53a   : > { %p1185_p11 = scmp.lt.u32.totalorder %s1183_s13, %s1179_s14  ;;  %p1187_p13 = scmp.lt.u32.totalorder %s1179_s14, %s1496_s0 }
 0x53b   : > { %p1181_p7 = pnand %p1180_p6, %p1348_p4 }
 0x53c   : > { %p1186_p12 = por %p1185_p11, %p1184_p10 }
 0x53d   : > { %p1182_p9 = pneg %p1181_p7 }
 0x53e   : > { %p1188_p0 = por %p1187_p13, %p1186_p12 }
 0x540   : > { %p1189_p1 = pnand %p1188_p0, %p1182_p9 }
 0x542   : > { %1192 = shalt.err (!%p1189_p1)
}
 0x543   : > { %1078 = dma.vmem_to_hbm [thread:$0]  (%p1348_p4), %s1498_s28, 128, %s1496_s0, %s836_s16  }
 0x544 PF: > { %p1084_p2 = scmp.ge.s32.totalorder %s1243_s22, 2  ;;  %s862_s20 = sand.u32 1, %s1223_s17  }
 0x545   : > { %s863_s12 = scalar_lea.sflag [#allocation4], %s862_s20 }
 0x546   : > { %p1081_p3 = pnand %p1084_p2, %p1355_p8 }
 0x548   : > { %1218 = dma.done.wait (!%p1081_p3), %s863_s12, 128  }
 0x549   : > { %1220 = vsyncadd (!%p1081_p3), %s863_s12, 4294967168  ;;  %s24_s22 = sadd.s32 1, %s1243_s22   ;;  %s1559_s17 = smov %s1227_s18 }
 0x54a   : > { %p21_p5 = scmp.ge.s32.totalorder %s24_s22, 4   ;;  %s1560_s18 = smov %s1231_s19 }
 0x54b   : > { %s1561_s19 = smov %s1361_s30  ;;  %s1562_s20 = smov %s1239_s21 }
 0x54c   : > { %s1563_s21 = smov %s1565_s25  ;;  %23 = sbr.rel (!%p21_p5) target bundleno = 6 (0x6), region = 109 }
 0x553   :  { %868 = vsyncpa [#allocation4], 1 }
 0x554   :  { %870 = vsyncpa [#allocation4 + $0x1], 1 }

// kernel: transformer_forward.3
= control target key start
LH: loop header
LB: loop body
LE: loop exit
PB: predicated region body
PF: predicated region fallthrough
CT: control target
= control target key end

     0   :  { %12 = vsyncpa [#allocation3], 0  ;;  %s833_s24 = smov 0   ;;  %s947_s0 = inlined_call_operand.vmem [shape: s32[2,8,1], index: 0, kind: input, shape index: {}]   ;;  %s948_s1 = inlined_call_operand.vmem [shape: bf16[128,128], index: 1, kind: input, shape index: {}]   ;;  %s949_s2 = inlined_call_operand.vmem [shape: f32[8,128], index: 2, kind: input, shape index: {}]   ;;  %s950_s3 = inlined_call_operand.vmem [shape: f32[1,128], index: 3, kind: input, shape index: {}]   ;;  %s951_s4 = inlined_call_operand.vmem [shape: f32[1,128], index: 4, kind: input, shape index: {}]   ;;  %s952_s5 = inlined_call_operand.hbm [shape: bf16[128,128], index: 5, kind: input, shape index: {}]   ;;  %s953_s6 = inlined_call_operand.vmem [shape: f32[1,128], index: 6, kind: input, shape index: {}]   ;;  %s954_s7 = inlined_call_operand.vmem [shape: bf16[2,8,128], index: 7, kind: output, shape index: {}]  }
   0x1 LB: > { %s839_s25 = sadd.s32 4294967295, %s784_s24   ;;  %p614_p0 = scmp.ge.s32.totalorder %s784_s24, 1  ;;  %s784_s24 = sphi %s833_s24, %s18_s24  }
   0x2   : > { %p201_p1 = scmp.lt.s32.totalorder %s784_s24, 3  ;;  %s786_s26 = smov [#allocation2]  }
   0x3   : > { %s225_s27 = sshll.u32 %s786_s26, 4  ;;  %p955_p3 = scmp.eq.s32.totalorder %s839_s25, 0  ;;  %s226_s27 = int_to_ptr.vmem [resolvable:$true] %s225_s27 }
   0x4   : > { %p843_p2 = pnand %p614_p0, %p201_p1  ;;  %s746_s9 = scalar_lea.hbm %s952_s5, 1024 }
   0x5   : > { %p747_p6 = scmp.ne.s32.totalorder %s952_s5, %s746_s9  ;;  %p753_p10 = scmp.lt.u32.totalorder %s746_s9, %s952_s5 }
   0x6   : > { %s957_s28 = scalar_select %p843_p2, 1, 0 }
   0x7   : > { %p706_p4 = pneg %p843_p2 }
   0x9   : > { %p852_p5 = pnand %p955_p3, %p706_p4 }
   0xb   : > { %p748_p7 = pneg %p852_p5 }
   0xd   : > { %p749_p8 = pnand %p748_p7, %p747_p6 }
   0xf   : > { %p750_p9 = pneg %p749_p8 }
  0x11   : > { %p755_p11 = pnand %p753_p10, %p750_p9 }
  0x13   : > { %758 = shalt.err (!%p755_p11)
}
  0x14   : > { %s759_s14 = scalar_lea.vmem %s226_s27, 1024  ;;  %p767_p1 = scmp.lt.s32.totalorder %s226_s27, %s226_s27 }
  0x15   : > { %p760_p12 = scmp.ne.s32.totalorder %s226_s27, %s759_s14  ;;  %p768_p4 = scmp.lt.s32.totalorder %s759_s14, %s759_s14 }
  0x17   : > { %p762_p13 = pnand %p760_p12, %p748_p7  ;;  %p769_p3 = por %p768_p4, %p767_p1 }
  0x19   : > { %p763_p0 = pneg %p762_p13 }
  0x1b   : > { %p770_p2 = pnand %p769_p3, %p763_p0 }
  0x1d   : > { %773 = shalt.err (!%p770_p2)
}
  0x1e   : > { %s787_s15 = smov 64   ;;  %s788_s16 = smov 4  }
  0x1f   : > { %709 = dma.hbm_to_vmem [thread:$0]  (!%p852_p5), %s952_s5, 1024, %s226_s27, [#allocation3], %s787_s15, %s787_s15, %s788_s16  }
  0x20   : > { %p959_p6 = scmp.ne.s32.totalorder %s957_s28, 0 }
  0x21   : > { %p960_p8 = scmp.eq.s32.totalorder (!%p959_p6), %s839_s25, 0 }
  0x22   : > { %251 = sbr.rel (%p959_p6) target bundleno = 922 (0x39a), region = 48 }
  0x29   : > { %779 = dma.done.wait (%p960_p8), [#allocation3], 1024   ;;  %p961_p7 = pmov %p960_p8 }
  0x2a   : > { %p281_p2 = scmp.lt.s32.totalorder %s839_s25, 1  ;;  %v789_v0 = vmov 0   ;;  %v790_v1 = vmov 0.0   ;;  %v728_v3 = vld [vmem:[%s948_s1] sm:$0xff]   ;;  %vm791_vm0 = vmmov 0   ;;  %v729_v4 = vld [vmem:[%s948_s1 + $0x8] sm:$0xff]   ;;  %v291_v11 = vlaneseq }
  0x2b   : > { %781 = vsyncadd (%p961_p7), [#allocation3], 4294966272  ;;  %727 = vset.pattern.permute.xlu0 %v789_v0  ;;  %662 = vmatprep.subr.bf16.mxu0 %v790_v1  ;;  %v730_v5 = vld [vmem:[%s948_s1 + $0x10] sm:$0xff]   ;;  %v731_v6 = vld [vmem:[%s948_s1 + $0x18] sm:$0xff]   ;;  %v792_v14 = vmov 1.0|1.0  }
  0x2c   : > { %s963_s25 = smov (!%p281_p2, %s839_s25), 1  ;;  %682 = vmatprep.subr.bf16.mxu1 %v790_v1  ;;  %678 = vmatprep.mubr.msk.bf16.mxu0 %vm791_vm0, %v790_v1  ;;  %v732_v7 = vld [vmem:[%s948_s1 + $0x20] sm:$0xff]   ;;  %v733_v8 = vld [vmem:[%s948_s1 + $0x28] sm:$0xff]   ;;  %v734_v9 = vld [vmem:[%s948_s1 + $0x30] sm:$0xff]   ;;  %v292_v12 = vand.u32 127, %v291_v11 }
  0x2d   : > { %s619_s19 = sshll.u32 %s963_s25, 3  ;;  %698 = vmatprep.mubr.msk.bf16.mxu1 %vm791_vm0, %v790_v1  ;;  %663 = vmatpush3.bf16.msra.mxu0 %v728_v3  ;;  %v735_v10 = vld [vmem:[%s948_s1 + $0x38] sm:$0xff]   ;;  %v403_v15 = vld [vmem:[%s949_s2] sm:$0xff]  ;;  %v737_v22 = vld [vmem:[#allocation2 + $0x8] sm:$0xff]   ;;  %s620_s28 = sshll.u32 %s963_s25, 2 }
  0x2e   : > { %s284_s22 = scalar_lea.vmem %s947_s0, %s619_s19  ;;  %664 = vmatprep.subr.bf16.mxu0 %v790_v1  ;;  %v736_v21 = vld [vmem:[#allocation2] sm:$0xff]   ;;  %v738_v27 = vld [vmem:[#allocation2 + $0x10] sm:$0xff]   ;;  %v739_v28 = vld [vmem:[#allocation2 + $0x18] sm:$0xff]   ;;  %s288_s8 = scalar_lea.vmem %s954_s7, %s620_s28 }
  0x2f   : > { %v290_v2 = vld [vmem:[%s284_s22] sm:$0xff]  ;;  %683 = vmatpush3.bf16.msra.mxu1 %v736_v21  ;;  %v741_v30 = vld [vmem:[#allocation2 + $0x28] sm:$0xff]   ;;  %v742_v31 = vld [vmem:[#allocation2 + $0x30] sm:$0xff]  }
  0x30   : > { %294 = vperm.xlu0 %727, %v290_v2   ;;  %684 = vmatprep.subr.bf16.mxu1 %v790_v1  ;;  %v740_v29 = vld [vmem:[#allocation2 + $0x20] sm:$0xff]   ;;  %v743_v32 = vld [vmem:[#allocation2 + $0x38] sm:$0xff]  }
  0x31   : > { %665 = vmatpush3.bf16.msra.mxu0 %v729_v4  ;;  %v631_v37 = vld [vmem:[%s950_s3] ss:$0 sm:$0xff] }
  0x32   : > { %666 = vmatprep.subr.bf16.mxu0 %v790_v1  ;;  %v632_v39 = vld [vmem:[%s951_s4] ss:$0 sm:$0xff] }
  0x33   : > { %685 = vmatpush3.bf16.msra.mxu1 %v737_v22  ;;  %v633_v43 = vld [vmem:[%s953_s6] ss:$0 sm:$0xff] }
  0x34   : > { %686 = vmatprep.subr.bf16.mxu1 %v790_v1 }
  0x35   : > { %667 = vmatpush3.bf16.msra.mxu0 %v730_v5 }
  0x36   : > { %668 = vmatprep.subr.bf16.mxu0 %v790_v1 }
  0x37   : > { %687 = vmatpush3.bf16.msra.mxu1 %v738_v27 }
  0x38   : > { %688 = vmatprep.subr.bf16.mxu1 %v790_v1 }
  0x39   : > { %669 = vmatpush3.bf16.msra.mxu0 %v731_v6 }
  0x3a   : > { %670 = vmatprep.subr.bf16.mxu0 %v790_v1 }
  0x3b   : > { %689 = vmatpush3.bf16.msra.mxu1 %v739_v28 }
  0x3c   : > { %690 = vmatprep.subr.bf16.mxu1 %v790_v1 }
  0x3d   : > { %671 = vmatpush3.bf16.msra.mxu0 %v732_v7 }
  0x3e   : > { %672 = vmatprep.subr.bf16.mxu0 %v790_v1 }
  0x3f   : > { %691 = vmatpush3.bf16.msra.mxu1 %v740_v29 }
  0x40   : > { %692 = vmatprep.subr.bf16.mxu1 %v790_v1 }
  0x41   : > { %673 = vmatpush3.bf16.msra.mxu0 %v733_v8 }
  0x42   : > { %674 = vmatprep.subr.bf16.mxu0 %v790_v1 }
  0x43   : > { %693 = vmatpush3.bf16.msra.mxu1 %v741_v30 }
  0x44   : > { %694 = vmatprep.subr.bf16.mxu1 %v790_v1 }
  0x45   : > { %675 = vmatpush3.bf16.msra.mxu0 %v734_v9 }
  0x46   : > { %676 = vmatprep.subr.bf16.mxu0 %v790_v1 }
  0x47   : > { %695 = vmatpush3.bf16.msra.mxu1 %v742_v31 }
  0x48   : > { %696 = vmatprep.subr.bf16.mxu1 %v790_v1 }
  0x49   : > { %677 = vmatpush3.bf16.msra.mxu0 %v735_v10 }
  0x4b   : > { %697 = vmatpush3.bf16.msra.mxu1 %v743_v32 }
  0xaf   : > { %v295_v13 = vpop.permute.xlu0 %294 }
  0xb0   : > { %vm296_vm1 = vcmp.eq.s32.totalorder %v292_v12, %v295_v13 }
  0xb1   : > { %vm629_vm2 = vmpackc.low %vm296_vm1, %vm296_vm1 }
  0xb2   : > { %679 = vmatmul.mubr.msk.bf16.vlgmr.msra.gmra.mrb[0].mxu0 %vm629_vm2, %v792_v14 }
 0x185   : > { %v397_v16 = vpop.f32.mrb[0].mxu0 }
 0x186   : > { %v404_v17 = vadd.f32 %v403_v15, %v397_v16  ;;  %v680_v18 = vpop.f32.mrb[1].mxu0 }
 0x187   : > { %v400_v19 = vpop.f32.mrb[2].mxu0 }
 0x188   : > { %407 = vadd.xlane.f32.xlu0 %v404_v17  ;;  %v681_v20 = vpop.f32.mrb[3].mxu0 }
 0x215   : > { %v408_v23 = vpop.xlane.xlu0 %407 }
 0x216   : > { %v410_v24 = vmul.f32 0.0078125, %v408_v23 }
 0x218   : > { %v411_v25 = vsub.f32 %v404_v17, %v410_v24 }
 0x21a   : > { %v412_v26 = vmul.f32 %v411_v25, %v411_v25 }
 0x21c   : > { %413 = vadd.xlane.f32.xlu1 %v412_v26 }
 0x2a9   : > { %v414_v33 = vpop.xlane.xlu1 %413 }
 0x2aa   : > { %v415_v34 = vmul.f32 0.0078125, %v414_v33 }
 0x2ac   : > { %v416_v35 = vadd.f32 1e-12, %v415_v34 }
 0x2ae   : > { %744 = vrsqrt.f32 %v416_v35 }
 0x2b8   : > { %v745_v36 = vpop.eup %744 }
 0x2b9   : > { %v418_v38 = vmul.f32 %v745_v36, %v411_v25 }
 0x2bb   : > { %v425_v40 = vmul.f32 %v631_v37, %v418_v38 }
 0x2bd   : > { %v432_v41 = vadd.f32 %v632_v39, %v425_v40 }
 0x2bf   : > { %v433_v42 = vpack.c.bf16 %v432_v41, %v432_v41 }
 0x2c1   : > { %699 = vmatmul.mubr.bf16.vlgmr.msra.gmra.mrb[0].mxu1 %v433_v42 }
 0x394   : > { %v539_v44 = vpop.f32.mrb[0].mxu1 }
 0x395   : > { %v540_v45 = vadd.f32 %v633_v43, %v539_v44  ;;  %v700_v46 = vpop.f32.mrb[1].mxu1 }
 0x396   : > { %v542_v47 = vpop.f32.mrb[2].mxu1 }
 0x397   : > { %v545_v48 = vpack.c.bf16 %v540_v45, %v540_v45  ;;  %v701_v49 = vpop.f32.mrb[3].mxu1 }
 0x399   : > { %546 = vst [vmem:[%s288_s8] sm:$0xf] %v545_v48 }
 0x39a PF: > { %s18_s24 = sadd.s32 1, %s784_s24  }
 0x39b   : > { %p15_p3 = scmp.ge.s32.totalorder %s18_s24, 4  }
 0x39d   :  { %17 = sbr.rel (!%p15_p3) target bundleno = 1 (0x1), region = 83 }
 0x3a4   :  { %566 = vsyncpa [#allocation3], 1 }
 0x3a5   :  { %568 = vsyncpa [#allocation3 + $0x1], 1 }

// kernel: transformer_forward.4
= control target key start
LH: loop header
LB: loop body
LE: loop exit
PB: predicated region body
PF: predicated region fallthrough
CT: control target
= control target key end

     0   :  { %s5099_s0 = inlined_call_operand.vmem [shape: bf16[2,8,128], index: 0, kind: input, shape index: {}]   ;;  %s5100_s1 = inlined_call_operand.vmem [shape: f32[2,1,128], index: 1, kind: input, shape index: {}]   ;;  %s5101_s2 = inlined_call_operand.vmem [shape: f32[2,1,128], index: 2, kind: input, shape index: {}]   ;;  %s5102_s3 = inlined_call_operand.hbm [shape: bf16[2,128,1536], index: 3, kind: input, shape index: {}]   ;;  %s5103_s4 = inlined_call_operand.hbm [shape: bf16[2,512,128], index: 4, kind: input, shape index: {}]   ;;  %s5104_s5 = inlined_call_operand.vmem [shape: f32[2,1,128], index: 5, kind: input, shape index: {}]   ;;  %s5105_s6 = inlined_call_operand.vmem [shape: f32[2,1,128], index: 6, kind: input, shape index: {}]   ;;  %s5106_s7 = inlined_call_operand.vmem [shape: f32[2,1,128], index: 7, kind: input, shape index: {}]   ;;  %s5107_s8 = inlined_call_operand.hbm [shape: bf16[2,128,512], index: 8, kind: input, shape index: {}]   ;;  %s5108_s9 = inlined_call_operand.vmem [shape: f32[2,1,512], index: 9, kind: input, shape index: {}]   ;;  %s5109_s10 = inlined_call_operand.hbm [shape: bf16[2,512,128], index: 10, kind: input, shape index: {}]   ;;  %s5110_s11 = inlined_call_operand.vmem [shape: f32[2,1,128], index: 11, kind: input, shape index: {}]   ;;  %s5111_s12 = inlined_call_operand.vmem [shape: bf16[2,8,128], index: 12, kind: output, shape index: {}]  }
   0x1   :  { %5123 = sst [smem:[#allocation22_spill]] %s5099_s0 }
   0x2   :  { %5124 = sst [smem:[#allocation23_spill]] %s5102_s3 }
   0x3   :  { %5125 = sst [smem:[#allocation24_spill]] %s5103_s4 }
   0x4   :  { %5126 = sst [smem:[#allocation25_spill]] %s5105_s6 }
   0x5   :  { %5127 = sst [smem:[#allocation26_spill]] %s5106_s7 }
   0x6   :  { %5128 = sst [smem:[#allocation27_spill]] %s5107_s8 }
   0x7   :  { %5129 = sst [smem:[#allocation28_spill]] %s5108_s9 }
   0x8   :  { %5130 = sst [smem:[#allocation29_spill]] %s5109_s10 }
   0x9   :  { %5131 = sst [smem:[#allocation30_spill]] %s5110_s11 }
   0xa   :  { %5132 = sst [smem:[#allocation31_spill]] %s5111_s12 }
   0xb   :  { %17 = vsyncpa [#allocation4], 0 }
   0xc   :  { %19 = vsyncpa [#allocation4 + $0x1], 0 }
   0xd   :  { %20 = vsyncpa [#allocation6], 0 }
   0xe   :  { %22 = vsyncpa [#allocation6 + $0x1], 0 }
   0xf   :  { %23 = vsyncpa [#allocation9], 0 }
  0x10   :  { %25 = vsyncpa [#allocation9 + $0x1], 0  ;;  %s4426_s21 = smov 0   ;;  %s4428_s22 = smov 0  }
  0x11   :  { %s4430_s23 = smov 0   ;;  %s4432_s24 = smov 0  }
  0x12   :  { %s4434_s25 = smov 0   ;;  %s4436_s26 = smov 0  }
  0x13   :  { %s4438_s27 = smov 0   ;;  %s4440_s28 = smov 0  }
  0x14 LB: > { %5133 = sst [smem:[#allocation13_spill]] %s4322_s22  ;;  %s5112_s29 = sadd.s32 4294967295, %s4346_s28   ;;  %s4346_s28 = sphi %s4440_s28, %s31_s28   ;;  %s4342_s27 = sphi %s4438_s27, %s5176_s27   ;;  %s4338_s26 = sphi %s4436_s26, %s5175_s26   ;;  %s4334_s25 = sphi %s4434_s25, %s5174_s25   ;;  %s4330_s24 = sphi %s4432_s24, %s5173_s24   ;;  %s4326_s23 = sphi %s4430_s23, %s5172_s23   ;;  %s4322_s22 = sphi %s4428_s22, %s5171_s22   ;;  %s4318_s21 = sphi %s4426_s21, %s5170_s21  }
  0x15   : > { %5134 = sst [smem:[#allocation14_spill]] %s4326_s23  ;;  %s40_s30 = sadd.s32 1, %s4338_s26 }
  0x16   : > { %5135 = sst [smem:[#allocation15_spill]] %s4338_s26  ;;  %p41_p0 = scmp.ge.s32.totalorder %s40_s30, 2 }
  0x17   : > { %5136 = sst [smem:[#allocation16_spill]] %s4342_s27  ;;  %s43_s13 = sadd.s32 1, %s4342_s27 }
  0x18   : > { %5137 = sst [smem:[#allocation17_spill]] %s4346_s28  ;;  %s128_s14 = sadd.s32 1, %s4326_s23 }
  0x19   : > { %p135_p1 = scmp.ne.s32.totalorder %s4326_s23, %s4322_s22  ;;  %s5178_s30 = smov (%p41_p0, %s40_s30), 0 }
  0x1a   : > { %5138 = sst [smem:[#allocation18_spill]] %s5178_s30  ;;  %s5180_s13 = smov (!%p41_p0, %s43_s13), %s4342_s27 }
  0x1b   : > { %s125_s15 = ssub.s32 %s4338_s26, %s5178_s30  ;;  %p136_p2 = scmp.eq.s32.totalorder %s4346_s28, 0 }
  0x1c   : > { %p45_p3 = scmp.ge.s32.totalorder %s5180_s13, 2  ;;  %p126_p4 = scmp.eq.s32.totalorder %s125_s15, 0 }
  0x1d   : > { %p137_p5 = por %p136_p2, %p135_p1  ;;  %p141_p6 = scmp.ne.s32.totalorder %s4322_s22, %s4318_s21 }
  0x1e   : > { %s5182_s13 = smov (%p45_p3, %s5180_s13), 0  ;;  %p142_p7 = scmp.eq.s32.totalorder %s5112_s29, 0 }
  0x1f   : > { %5139 = sst [smem:[#allocation19_spill]] %s5182_s13  ;;  %p3793_p8 = scmp.lt.s32.totalorder %s4346_s28, 4 }
  0x20   : > { %s4480_s16 = scalar_select %p126_p4, %s4326_s23, %s128_s14  }
  0x21   : > { %s4486_s17 = sand.u32 1, %s4326_s23   ;;  %p4488_p9 = por %p142_p7, %p141_p6 }
  0x22   : > { %5140 = sst [smem:[#allocation20_spill]] %s4480_s16  ;;  %s439_s19 = sand.u32 1, %s4346_s28  }
  0x23   : > { %s5141_s18 = scalar_select %p4488_p9, 1, 0 }
  0x24   : > { %p4493_p10 = pnand %p3793_p8, %p137_p5  ;;  %s4498_s21 = sshll.u32 %s4486_s17, 8 }
  0x25   : > { %s4501_s14 = sshll.u32 %s4338_s26, 12  ;;  %s5143_s4 = sld [smem:[#allocation24_spill]] }
  0x26   : > { %s443_s30 = scalar_lea.vmem [#allocation5], %s4498_s21  ;;  %s4513_s16 = scalar_lea.sflag [#allocation6], %s439_s19 }
  0x27   : > { %s450_s27 = sshll.u32 %s443_s30, 4  ;;  %p4519_p13 = pneg %p4493_p10  ;;  %s4510_s27 = int_to_ptr.vmem [resolvable:$true] %s450_s27 }
  0x2b   : > { %s4507_s13 = scalar_lea.hbm %s5143_s4, %s4501_s14  ;;  %s4157_s30 = scalar_lea.hbm %s5143_s4, 8192 }
  0x2c   : > { %s4152_s23 = scalar_lea.hbm %s4507_s13, 4096  ;;  %p4158_p2 = scmp.lt.u32.totalorder %s4507_s13, %s5143_s4 }
  0x2d   : > { %p4153_p12 = scmp.ne.s32.totalorder %s4507_s13, %s4152_s23  ;;  %p4159_p3 = scmp.lt.u32.totalorder %s4157_s30, %s4152_s23 }
  0x2e   : > { %p4161_p5 = scmp.lt.u32.totalorder %s4152_s23, %s4507_s13 }
  0x2f   : > { %p4155_p0 = pnand %p4519_p13, %p4153_p12  ;;  %p4160_p4 = por %p4159_p3, %p4158_p2 }
  0x31   : > { %p4156_p1 = pneg %p4155_p0  ;;  %p4162_p6 = por %p4161_p5, %p4160_p4 }
  0x33   : > { %p4163_p7 = pnand %p4162_p6, %p4156_p1 }
  0x35   : > { %4166 = shalt.err (!%p4163_p7)
}
  0x36   : > { %s4167_s19 = scalar_lea.vmem %s4510_s27, 4096  ;;  %s4348_s29 = smov [#allocation5]  }
  0x37   : > { %p4168_p8 = scmp.ne.s32.totalorder %s4510_s27, %s4167_s19  ;;  %s4172_s15 = sshll.u32 %s4348_s29, 4  ;;  %s4173_s15 = int_to_ptr.vmem [resolvable:$false] %s4172_s15 }
  0x38   : > { %s4174_s9 = scalar_lea.vmem %s4173_s15, 8192  ;;  %p4175_p11 = scmp.lt.s32.totalorder %s4510_s27, %s4173_s15 }
  0x39   : > { %p4170_p12 = pnand %p4168_p8, %p4519_p13  ;;  %p4176_p9 = scmp.lt.s32.totalorder %s4174_s9, %s4167_s19 }
  0x3b   : > { %p4171_p0 = pneg %p4170_p12  ;;  %p4177_p2 = por %p4176_p9, %p4175_p11 }
  0x3d   : > { %p4178_p3 = pnand %p4177_p2, %p4171_p0 }
  0x3f   : > { %4181 = shalt.err (!%p4178_p3)
}
  0x40   : > { %s5117_s11 = smov 64   ;;  %s5118_s23 = smov 4  }
  0x41   : > { %3786 = dma.hbm_to_vmem [thread:$0]  (!%p4493_p10), %s4507_s13, 4096, %s4510_s27, %s4513_s16, %s5117_s11, %s5117_s11, %s5118_s23  }
  0x42   : > { %p531_p9 = scmp.lt.s32.totalorder %s4346_s28, 5  ;;  %p5145_p11 = scmp.ge.s32.totalorder %s4346_s28, 1 }
  0x43   : > { %s3769_s19 = smul.u32 768, %s4486_s17  ;;  %s5147_s3 = sld [smem:[#allocation23_spill]] }
  0x44   : > { %p4549_p1 = pnand %p5145_p11, %p531_p9  ;;  %s3770_s29 = smul.u32 12288, %s4338_s26 }
  0x45   : > { %s422_s7 = scalar_lea.vmem [#allocation3], %s3769_s19  ;;  %s419_s27 = scalar_lea.sflag [#allocation4], %s4486_s17 }
  0x46   : > { %s5146_s30 = scalar_select %p4549_p1, 1, 0 }
  0x47   : > { %s429_s6 = sshll.u32 %s422_s7, 4  ;;  %s4560_s6 = int_to_ptr.vmem [resolvable:$true] %s429_s6 }
  0x49   : > { %s4558_s4 = scalar_lea.hbm %s5147_s3, %s3770_s29  ;;  %s4187_s15 = scalar_lea.hbm %s5147_s3, 24576 }
  0x4a   : > { %s4182_s13 = scalar_lea.hbm %s4558_s4, 12288  ;;  %p4188_p7 = scmp.lt.u32.totalorder %s4558_s4, %s5147_s3 }
  0x4b   : > { %p4183_p4 = scmp.ne.s32.totalorder %s4558_s4, %s4182_s13  ;;  %p4189_p8 = scmp.lt.u32.totalorder %s4187_s15, %s4182_s13 }
  0x4c   : > { %p4191_p0 = scmp.lt.u32.totalorder %s4182_s13, %s4558_s4 }
  0x4d   : > { %p4185_p5 = pnand %p4183_p4, %p4519_p13  ;;  %p4190_p12 = por %p4189_p8, %p4188_p7 }
  0x4f   : > { %p4186_p6 = pneg %p4185_p5  ;;  %p4192_p2 = por %p4191_p0, %p4190_p12 }
  0x51   : > { %p4193_p3 = pnand %p4192_p2, %p4186_p6 }
  0x53   : > { %4196 = shalt.err (!%p4193_p3)
}
  0x54   : > { %s4197_s7 = scalar_lea.vmem %s4560_s6, 12288  ;;  %s4351_s11 = smov [#allocation3]  }
  0x55   : > { %p4198_p9 = scmp.ne.s32.totalorder %s4560_s6, %s4197_s7  ;;  %s4202_s23 = sshll.u32 %s4351_s11, 4  ;;  %s4203_s23 = int_to_ptr.vmem [resolvable:$false] %s4202_s23 }
  0x56   : > { %s4204_s19 = scalar_lea.vmem %s4203_s23, 24576  ;;  %p4205_p5 = scmp.lt.s32.totalorder %s4560_s6, %s4203_s23 }
  0x57   : > { %p4200_p11 = pnand %p4198_p9, %p4519_p13  ;;  %p4206_p1 = scmp.lt.s32.totalorder %s4204_s19, %s4197_s7 }
  0x59   : > { %p4201_p4 = pneg %p4200_p11  ;;  %p4207_p7 = por %p4206_p1, %p4205_p5 }
  0x5b   : > { %p4208_p8 = pnand %p4207_p7, %p4201_p4 }
  0x5d   : > { %4211 = shalt.err (!%p4208_p8)
}
  0x5e   : > { %s4352_s13 = smov 768   ;;  %s4353_s15 = smov 48  }
  0x5f   : > { %3783 = dma.hbm_to_vmem [thread:$0]  (!%p4493_p10), %s4558_s4, 12288, %s4560_s6, %s419_s27, %s4352_s13, %s4352_s13, %s4353_s15  }
  0x60   : > { %s5148_s8 = sld [smem:[#allocation27_spill]]  ;;  %s482_s7 = scalar_lea.vmem [#allocation7], %s4498_s21 }
  0x61   : > { %s489_s23 = sshll.u32 %s482_s7, 4  ;;  %s4593_s23 = int_to_ptr.vmem [resolvable:$true] %s489_s23 }
  0x66   : > { %s4590_s11 = scalar_lea.hbm %s5148_s8, %s4501_s14  ;;  %s4217_s6 = scalar_lea.hbm %s5148_s8, 8192 }
  0x67   : > { %s4212_s19 = scalar_lea.hbm %s4590_s11, 4096  ;;  %p4218_p0 = scmp.lt.u32.totalorder %s4590_s11, %s5148_s8 }
  0x68   : > { %p4213_p1 = scmp.ne.s32.totalorder %s4590_s11, %s4212_s19  ;;  %p4219_p2 = scmp.lt.u32.totalorder %s4217_s6, %s4212_s19 }
  0x69   : > { %p4221_p9 = scmp.lt.u32.totalorder %s4212_s19, %s4590_s11 }
  0x6a   : > { %p4215_p6 = pnand %p4213_p1, %p4519_p13  ;;  %p4220_p3 = por %p4219_p2, %p4218_p0 }
  0x6c   : > { %p4216_p12 = pneg %p4215_p6  ;;  %p4222_p11 = por %p4221_p9, %p4220_p3 }
  0x6e   : > { %p4223_p4 = pnand %p4222_p11, %p4216_p12 }
  0x70   : > { %4226 = shalt.err (!%p4223_p4)
}
  0x71   : > { %s4227_s15 = scalar_lea.vmem %s4593_s23, 4096  ;;  %s4354_s3 = smov [#allocation7]  }
  0x72   : > { %p4228_p5 = scmp.ne.s32.totalorder %s4593_s23, %s4227_s15  ;;  %s4232_s29 = sshll.u32 %s4354_s3, 4  ;;  %s4233_s29 = int_to_ptr.vmem [resolvable:$false] %s4232_s29 }
  0x73   : > { %s4234_s9 = scalar_lea.vmem %s4233_s29, 8192  ;;  %p4235_p1 = scmp.lt.s32.totalorder %s4593_s23, %s4233_s29 }
  0x74   : > { %p4230_p7 = pnand %p4228_p5, %p4519_p13  ;;  %p4236_p6 = scmp.lt.s32.totalorder %s4234_s9, %s4227_s15 }
  0x76   : > { %p4231_p8 = pneg %p4230_p7  ;;  %p4237_p0 = por %p4236_p6, %p4235_p1 }
  0x78   : > { %p4238_p2 = pnand %p4237_p0, %p4231_p8 }
  0x7a   : > { %4241 = shalt.err (!%p4238_p2)
}
  0x7b   : > { %s4355_s7 = smov 256   ;;  %s4356_s19 = smov 16  }
  0x7c   : > { %3789 = dma.hbm_to_vmem [thread:$0]  (!%p4493_p10), %s4590_s11, 4096, %s4593_s23, %s4513_s16, %s4355_s7, %s4355_s7, %s4356_s19  }
  0x7d   : > { %s5149_s10 = sld [smem:[#allocation29_spill]]  ;;  %s510_s13 = scalar_lea.vmem [#allocation8], %s4498_s21 }
  0x7e   : > { %s517_s15 = sshll.u32 %s510_s13, 4  ;;  %s507_s3 = scalar_lea.sflag [#allocation9], %s4486_s17  ;;  %s4624_s15 = int_to_ptr.vmem [resolvable:$true] %s517_s15 }
  0x83   : > { %s4621_s27 = scalar_lea.hbm %s5149_s10, %s4501_s14  ;;  %s4247_s23 = scalar_lea.hbm %s5149_s10, 8192 }
  0x84   : > { %s4242_s29 = scalar_lea.hbm %s4621_s27, 4096  ;;  %p4248_p11 = scmp.lt.u32.totalorder %s4621_s27, %s5149_s10 }
  0x85   : > { %p4243_p12 = scmp.ne.s32.totalorder %s4621_s27, %s4242_s29  ;;  %p4249_p4 = scmp.lt.u32.totalorder %s4247_s23, %s4242_s29 }
  0x86   : > { %p4251_p7 = scmp.lt.u32.totalorder %s4242_s29, %s4621_s27 }
  0x87   : > { %p4245_p3 = pnand %p4243_p12, %p4519_p13  ;;  %p4250_p5 = por %p4249_p4, %p4248_p11 }
  0x89   : > { %p4246_p9 = pneg %p4245_p3  ;;  %p4252_p8 = por %p4251_p7, %p4250_p5 }
  0x8b   : > { %p4253_p1 = pnand %p4252_p8, %p4246_p9 }
  0x8d   : > { %4256 = shalt.err (!%p4253_p1)
}
  0x8e   : > { %s4257_s21 = scalar_lea.vmem %s4624_s15, 4096  ;;  %s4357_s7 = smov [#allocation8]  }
  0x8f   : > { %p4258_p6 = scmp.ne.s32.totalorder %s4624_s15, %s4257_s21  ;;  %s4262_s19 = sshll.u32 %s4357_s7, 4  ;;  %s4263_s19 = int_to_ptr.vmem [resolvable:$false] %s4262_s19 }
  0x90   : > { %s4264_s4 = scalar_lea.vmem %s4263_s19, 8192  ;;  %p4265_p12 = scmp.lt.s32.totalorder %s4624_s15, %s4263_s19 }
  0x91   : > { %p4260_p0 = pnand %p4258_p6, %p4519_p13  ;;  %p4266_p3 = scmp.lt.s32.totalorder %s4264_s4, %s4257_s21 }
  0x93   : > { %p4261_p2 = pneg %p4260_p0  ;;  %p4267_p11 = por %p4266_p3, %p4265_p12 }
  0x95   : > { %p4268_p4 = pnand %p4267_p11, %p4261_p2 }
  0x97   : > { %4271 = shalt.err (!%p4268_p4)
}
  0x98   : > { %s5150_s6 = smov 4   ;;  %s5151_s13 = smov 64  }
  0x99   : > { %3792 = dma.hbm_to_vmem [thread:$0]  (!%p4493_p10), %s4621_s27, 4096, %s4624_s15, %s507_s3, %s5151_s13, %s5151_s13, %s5150_s6  }
  0x9a   : > { %p5152_p13 = scmp.ne.s32.totalorder %s5146_s30, 0 }
  0x9c   : > { %535 = sbr.rel (%p5152_p13) target bundleno = 4323 (0x10e3), region = 68 }
  0xa3   : > { %s537_s12 = sand.u32 1, %s4322_s22   ;;  %p5153_p9 = scmp.ne.s32.totalorder %s5141_s18, 0 }
  0xa4   : > { %s3771_s29 = smul.u32 768, %s537_s12  ;;  %s538_s16 = scalar_lea.sflag [#allocation4], %s537_s12 }
  0xa6   : > { %s4656_s11 = scalar_lea.vmem [#allocation3], %s3771_s29 }
  0xa7   : > { %4305 = dma.done.wait (%p5153_p9), %s538_s16, 12288  }
  0xa8   : > { %4307 = vsyncadd (%p5153_p9), %s538_s16, 4294955008  ;;  %s5154_s17 = sadd.s32 4294967295, %s4346_s28   ;;  %s3330_s27 = sshll.u32 %s537_s12, 8 }
  0xa9   : > { %s546_s20 = sand.u32 1, %s5154_s17   ;;  %s4664_s30 = scalar_lea.vmem [#allocation5], %s3330_s27 }
  0xaa   : > { %s547_s15 = scalar_lea.sflag [#allocation6], %s546_s20 }
  0xab   : > { %4309 = dma.done.wait (%p5153_p9), %s547_s15, 8192  }
  0xac   : > { %4311 = vsyncadd (%p5153_p9), %s547_s15, 4294959104  ;;  %s4670_s3 = scalar_lea.vmem [#allocation7], %s3330_s27  ;;  %s565_s23 = scalar_lea.sflag [#allocation9], %s537_s12 }
  0xad   : > { %s4672_s14 = scalar_lea.vmem [#allocation8], %s3330_s27 }
  0xae   : > { %5155 = sst [smem:[#allocation21_spill]] %s4672_s14 }
  0xaf   : > { %4313 = dma.done.wait (%p5153_p9), %s565_s23, 4096  }
  0xb0   : > { %4315 = vsyncadd (%p5153_p9), %s565_s23, 4294963200  ;;  %p649_p10 = scmp.lt.s32.totalorder %s4334_s25, 1  ;;  %p653_p5 = scmp.lt.s32.totalorder %s4330_s24, 1 }
  0xb1   : > { %s5156_s0 = sld [smem:[#allocation22_spill]]  ;;  %s5157_s8 = sld [smem:[#allocation25_spill]] }
  0xb2   : > { %s5184_s25 = smov (!%p649_p10, %s4334_s25), 1  ;;  %s5158_s7 = sld [smem:[#allocation26_spill]] }
  0xb3   : > { %s4682_s9 = scalar_select %p653_p5, %s4330_s24, 1 }
  0xb4   : > { %s3333_s21 = sshll.u32 %s5184_s25, 2  ;;  %s5159_s6 = sld [smem:[#allocation30_spill]] }
  0xb5   : > { %s5160_s29 = sld [smem:[#allocation28_spill]]  ;;  %s5161_s27 = sld [smem:[#allocation31_spill]] }
  0xb6   : > { %p3336_p7 = scmp.ne.s32.totalorder %s4330_s24, 0 }
  0xb7   : > { %s652_s19 = scalar_lea.vmem %s5156_s0, %s3333_s21  ;;  %s664_s25 = scalar_lea.vmem %s5157_s8, %s4682_s9 }
  0xb8   : > { %s667_s18 = scalar_lea.vmem %s5158_s7, %s4682_s9  ;;  %s3334_s0 = sshll.u32 %s4682_s9, 2  ;;  %v684_v0 = vld [vmem:[%s652_s19] sm:$0xf] (!%p3336_p7) }
  0xb9   : > { %683 = sbr.rel (%p3336_p7) target bundleno = 192 (0xc0), region = 88  ;;  %v685_v1 = vunpack.c.l.bf16 (!%p3336_p7), %v684_v0 }
  0xba   : > { %s674_s13 = scalar_lea.vmem %s5159_s6, %s4682_s9 }
  0xbb   : > { %s4715_s16 = scalar_lea.vmem %s5160_s29, %s3334_s0  ;;  %s4720_s14 = scalar_lea.vmem %s5161_s27, %s3333_s21  ;;  %686 = vst [vmem:[#allocation2] sm:$0xff] (!%p3336_p7), %v685_v1 }
  0xc0 PF: > { %v3867_v3 = vld [vmem:[%s4656_s11 + $0x4] ss:$48 sps:$4 sm:$0xff]   ;;  %v3869_v4 = vld [vmem:[%s4656_s11 + $0xc] ss:$48 sps:$4 sm:$0xff]   ;;  %v3871_v5 = vld [vmem:[%s4656_s11] ss:$48 sps:$4 sm:$0xff]   ;;  %s5162_s10 = scalar_lea.vmem %s5100_s1, %s4682_s9  ;;  %s5163_s28 = scalar_lea.vmem %s5101_s2, %s4682_s9 }
  0xc1   : > { %v3872_v6 = vld [vmem:[%s4656_s11 + $0x8] ss:$48 sps:$4 sm:$0xff]   ;;  %v3873_v7 = vld [vmem:[%s4656_s11 + $0x64] ss:$48 sps:$4 sm:$0xff]   ;;  %v3875_v8 = vld [vmem:[%s4656_s11 + $0x6c] ss:$48 sps:$4 sm:$0xff]   ;;  %1293 = vmatprep.subr.bf16.mxu0 %v3867_v3  ;;  %1334 = vmatprep.subr.bf16.mxu1 %v3869_v4  ;;  %s5164_s21 = scalar_lea.vmem %s5104_s5, %s4682_s9 }
  0xc2   : > { %v687_v2 = vld [vmem:[#allocation2] sm:$0xff]  ;;  %1294 = vmatpush1.bf16.msra.mxu0 %v3871_v5  ;;  %1335 = vmatpush1.bf16.msra.mxu1 %v3872_v6  ;;  %v3877_v9 = vld [vmem:[%s4656_s11 + $0x60] ss:$48 sps:$4 sm:$0xff]   ;;  %v3879_v11 = vld [vmem:[%s4656_s11 + $0xc4] ss:$48 sps:$4 sm:$0xff]   ;;  %v4358_v41 = vmov 0  }
  0xc3   : > { %690 = vadd.xlane.f32.xlu0 %v687_v2  ;;  %v3878_v10 = vld [vmem:[%s4656_s11 + $0x68] ss:$48 sps:$4 sm:$0xff]   ;;  %1295 = vmatprep.subr.bf16.mxu0 %v3873_v7  ;;  %v3881_v12 = vld [vmem:[%s4656_s11 + $0xcc] ss:$48 sps:$4 sm:$0xff]   ;;  %v3883_v13 = vld [vmem:[%s4656_s11 + $0xc0] ss:$48 sps:$4 sm:$0xff]  }
  0xc4   : > { %1336 = vmatprep.subr.bf16.mxu1 %v3875_v8  ;;  %v3884_v14 = vld [vmem:[%s4656_s11 + $0xc8] ss:$48 sps:$4 sm:$0xff]   ;;  %v3885_v19 = vld [vmem:[%s4656_s11 + $0x124] ss:$48 sps:$4 sm:$0xff]   ;;  %v3887_v20 = vld [vmem:[%s4656_s11 + $0x12c] ss:$48 sps:$4 sm:$0xff]   ;;  %1325 = vmatprep.mubr.bf16.mxu0 %v4358_v41 }
  0xc5   : > { %v3889_v21 = vld [vmem:[%s4656_s11 + $0x120] ss:$48 sps:$4 sm:$0xff]   ;;  %v3890_v22 = vld [vmem:[%s4656_s11 + $0x128] ss:$48 sps:$4 sm:$0xff]   ;;  %v3891_v23 = vld [vmem:[%s4656_s11 + $0x184] ss:$48 sps:$4 sm:$0xff]   ;;  %1366 = vmatprep.mubr.bf16.mxu1 %v4358_v41 }
  0xc6   : > { %1296 = vmatpush1.bf16.msra.mxu0 %v3877_v9  ;;  %1337 = vmatpush1.bf16.msra.mxu1 %v3878_v10  ;;  %v3893_v24 = vld [vmem:[%s4656_s11 + $0x18c] ss:$48 sps:$4 sm:$0xff]   ;;  %v3895_v25 = vld [vmem:[%s4656_s11 + $0x180] ss:$48 sps:$4 sm:$0xff]   ;;  %v3896_v26 = vld [vmem:[%s4656_s11 + $0x188] ss:$48 sps:$4 sm:$0xff]  }
  0xc7   : > { %1297 = vmatprep.subr.bf16.mxu0 %v3879_v11  ;;  %1338 = vmatprep.subr.bf16.mxu1 %v3881_v12  ;;  %v3897_v27 = vld [vmem:[%s4656_s11 + $0x1e4] ss:$48 sps:$4 sm:$0xff]   ;;  %v3899_v28 = vld [vmem:[%s4656_s11 + $0x1ec] ss:$48 sps:$4 sm:$0xff]   ;;  %v3901_v29 = vld [vmem:[%s4656_s11 + $0x1e0] ss:$48 sps:$4 sm:$0xff]  }
  0xc8   : > { %v3902_v30 = vld [vmem:[%s4656_s11 + $0x1e8] ss:$48 sps:$4 sm:$0xff]   ;;  %v3903_v31 = vld [vmem:[%s4656_s11 + $0x244] ss:$48 sps:$4 sm:$0xff]   ;;  %v3905_v32 = vld [vmem:[%s4656_s11 + $0x24c] ss:$48 sps:$4 sm:$0xff]  }
  0xc9   : > { %v3907_v33 = vld [vmem:[%s4656_s11 + $0x240] ss:$48 sps:$4 sm:$0xff]   ;;  %v3908_v34 = vld [vmem:[%s4656_s11 + $0x248] ss:$48 sps:$4 sm:$0xff]   ;;  %v3909_v35 = vld [vmem:[%s4656_s11 + $0x2a4] ss:$48 sps:$4 sm:$0xff]  }
  0xca   : > { %1298 = vmatpush1.bf16.msra.mxu0 %v3883_v13  ;;  %1339 = vmatpush1.bf16.msra.mxu1 %v3884_v14  ;;  %v3911_v36 = vld [vmem:[%s4656_s11 + $0x2ac] ss:$48 sps:$4 sm:$0xff]   ;;  %v3913_v37 = vld [vmem:[%s4656_s11 + $0x2a0] ss:$48 sps:$4 sm:$0xff]   ;;  %v3914_v38 = vld [vmem:[%s4656_s11 + $0x2a8] ss:$48 sps:$4 sm:$0xff]  }
  0xcb   : > { %1299 = vmatprep.subr.bf16.mxu0 %v3885_v19  ;;  %1340 = vmatprep.subr.bf16.mxu1 %v3887_v20  ;;  %v3917_v39 = vld [vmem:[%s4656_s11 + $0x14] ss:$48 sps:$4 sm:$0xff]   ;;  %v3920_v40 = vld [vmem:[%s4656_s11 + $0x1c] ss:$48 sps:$4 sm:$0xff]   ;;  %v3337_v46 = vld [vmem:[%s5162_s10] ss:$0 sm:$0xff] }
  0xcc   : > { %v3338_v48 = vld [vmem:[%s5163_s28] ss:$0 sm:$0xff]  ;;  %v3915_v51 = vld [vmem:[%s4656_s11 + $0x10] ss:$48 sps:$4 sm:$0xff]   ;;  %v3923_v54 = vld [vmem:[%s4656_s11 + $0x74] ss:$48 sps:$4 sm:$0xff]  }
  0xcd   : > { %v3918_v52 = vld [vmem:[%s4656_s11 + $0x18] ss:$48 sps:$4 sm:$0xff]   ;;  %v3926_v55 = vld [vmem:[%s4656_s11 + $0x7c] ss:$48 sps:$4 sm:$0xff]   ;;  %v3921_v56 = vld [vmem:[%s4656_s11 + $0x70] ss:$48 sps:$4 sm:$0xff]  }
  0xce   : > { %1300 = vmatpush1.bf16.msra.mxu0 %v3889_v21  ;;  %1341 = vmatpush1.bf16.msra.mxu1 %v3890_v22  ;;  %v3924_v57 = vld [vmem:[%s4656_s11 + $0x78] ss:$48 sps:$4 sm:$0xff]   ;;  %v3929_v58 = vld [vmem:[%s4656_s11 + $0xd4] ss:$48 sps:$4 sm:$0xff]   ;;  %v3932_v59 = vld [vmem:[%s4656_s11 + $0xdc] ss:$48 sps:$4 sm:$0xff]  }
  0xcf   : > { %1301 = vmatprep.subr.bf16.mxu0 %v3891_v23  ;;  %1342 = vmatprep.subr.bf16.mxu1 %v3893_v24  ;;  %v3927_v60 = vld [vmem:[%s4656_s11 + $0xd0] ss:$48 sps:$4 sm:$0xff]   ;;  %v3930_v61 = vld [vmem:[%s4656_s11 + $0xd8] ss:$48 sps:$4 sm:$0xff]   ;;  %v3935_v62 = vld [vmem:[%s4656_s11 + $0x134] ss:$48 sps:$4 sm:$0xff]  }
  0xd0   : > { %v3938_v63 = vld [vmem:[%s4656_s11 + $0x13c] ss:$48 sps:$4 sm:$0xff]   ;;  %v3933_v0 = vld [vmem:[%s4656_s11 + $0x130] ss:$48 sps:$4 sm:$0xff]   ;;  %v3936_v1 = vld [vmem:[%s4656_s11 + $0x138] ss:$48 sps:$4 sm:$0xff]  }
  0xd1   : > { %v3944_v3 = vld [vmem:[%s4656_s11 + $0x19c] ss:$48 sps:$4 sm:$0xff]   ;;  %v3939_v4 = vld [vmem:[%s4656_s11 + $0x190] ss:$48 sps:$4 sm:$0xff]   ;;  %v3942_v5 = vld [vmem:[%s4656_s11 + $0x198] ss:$48 sps:$4 sm:$0xff]  }
  0xd2   : > { %1302 = vmatpush1.bf16.msra.mxu0 %v3895_v25  ;;  %1343 = vmatpush1.bf16.msra.mxu1 %v3896_v26  ;;  %v3947_v6 = vld [vmem:[%s4656_s11 + $0x1f4] ss:$48 sps:$4 sm:$0xff]   ;;  %v3950_v7 = vld [vmem:[%s4656_s11 + $0x1fc] ss:$48 sps:$4 sm:$0xff]   ;;  %v3945_v8 = vld [vmem:[%s4656_s11 + $0x1f0] ss:$48 sps:$4 sm:$0xff]  }
  0xd3   : > { %1303 = vmatprep.subr.bf16.mxu0 %v3897_v27  ;;  %1344 = vmatprep.subr.bf16.mxu1 %v3899_v28  ;;  %v3948_v9 = vld [vmem:[%s4656_s11 + $0x1f8] ss:$48 sps:$4 sm:$0xff]   ;;  %v3953_v10 = vld [vmem:[%s4656_s11 + $0x254] ss:$48 sps:$4 sm:$0xff]   ;;  %v3956_v11 = vld [vmem:[%s4656_s11 + $0x25c] ss:$48 sps:$4 sm:$0xff]  }
  0xd4   : > { %v3951_v12 = vld [vmem:[%s4656_s11 + $0x250] ss:$48 sps:$4 sm:$0xff]   ;;  %v3954_v13 = vld [vmem:[%s4656_s11 + $0x258] ss:$48 sps:$4 sm:$0xff]   ;;  %v3959_v14 = vld [vmem:[%s4656_s11 + $0x2b4] ss:$48 sps:$4 sm:$0xff]  }
  0xd5   : > { %v3968_v19 = vld [vmem:[%s4656_s11 + $0x2c] ss:$48 sps:$4 sm:$0xff]   ;;  %v3963_v20 = vld [vmem:[%s4656_s11 + $0x20] ss:$48 sps:$4 sm:$0xff]   ;;  %v3966_v21 = vld [vmem:[%s4656_s11 + $0x28] ss:$48 sps:$4 sm:$0xff]  }
  0xd6   : > { %1304 = vmatpush1.bf16.msra.mxu0 %v3901_v29  ;;  %1345 = vmatpush1.bf16.msra.mxu1 %v3902_v30  ;;  %v3971_v22 = vld [vmem:[%s4656_s11 + $0x84] ss:$48 sps:$4 sm:$0xff]   ;;  %v3974_v23 = vld [vmem:[%s4656_s11 + $0x8c] ss:$48 sps:$4 sm:$0xff]   ;;  %v3969_v24 = vld [vmem:[%s4656_s11 + $0x80] ss:$48 sps:$4 sm:$0xff]  }
  0xd7   : > { %1305 = vmatprep.subr.bf16.mxu0 %v3903_v31  ;;  %1346 = vmatprep.subr.bf16.mxu1 %v3905_v32  ;;  %v3972_v25 = vld [vmem:[%s4656_s11 + $0x88] ss:$48 sps:$4 sm:$0xff]   ;;  %v3977_v26 = vld [vmem:[%s4656_s11 + $0xe4] ss:$48 sps:$4 sm:$0xff]   ;;  %v3980_v27 = vld [vmem:[%s4656_s11 + $0xec] ss:$48 sps:$4 sm:$0xff]  }
  0xd8   : > { %v3975_v28 = vld [vmem:[%s4656_s11 + $0xe0] ss:$48 sps:$4 sm:$0xff]   ;;  %v3978_v29 = vld [vmem:[%s4656_s11 + $0xe8] ss:$48 sps:$4 sm:$0xff]   ;;  %v3983_v30 = vld [vmem:[%s4656_s11 + $0x144] ss:$48 sps:$4 sm:$0xff]  }
  0xd9   : > { %v3986_v31 = vld [vmem:[%s4656_s11 + $0x14c] ss:$48 sps:$4 sm:$0xff]   ;;  %v3981_v32 = vld [vmem:[%s4656_s11 + $0x140] ss:$48 sps:$4 sm:$0xff]   ;;  %vm4360_vm0 = vmmov 0   ;;  %vm1663_vm1 = vcmask 1043456  }
  0xda   : > { %1306 = vmatpush1.bf16.msra.mxu0 %v3907_v33  ;;  %1347 = vmatpush1.bf16.msra.mxu1 %v3908_v34  ;;  %v3984_v33 = vld [vmem:[%s4656_s11 + $0x148] ss:$48 sps:$4 sm:$0xff]   ;;  %v3989_v34 = vld [vmem:[%s4656_s11 + $0x1a4] ss:$48 sps:$4 sm:$0xff]   ;;  %vm1647_vm2 = vcmask 64512   ;;  %s5165_s19 = sld [smem:[#allocation21_spill]] }
  0xdb   : > { %1307 = vmatprep.subr.bf16.mxu0 %v3909_v35  ;;  %1348 = vmatprep.subr.bf16.mxu1 %v3911_v36  ;;  %v3992_v35 = vld [vmem:[%s4656_s11 + $0x1ac] ss:$48 sps:$4 sm:$0xff]   ;;  %v3987_v36 = vld [vmem:[%s4656_s11 + $0x1a0] ss:$48 sps:$4 sm:$0xff]   ;;  %p3539_p8 = scmp.ne.s32.totalorder %s4330_s24, 1 }
  0xde   : > { %1308 = vmatpush1.bf16.msra.mxu0 %v3913_v37  ;;  %1349 = vmatpush1.bf16.msra.mxu1 %v3914_v38  ;;  %v3990_v37 = vld [vmem:[%s4656_s11 + $0x1a8] ss:$48 sps:$4 sm:$0xff]   ;;  %v3995_v38 = vld [vmem:[%s4656_s11 + $0x204] ss:$48 sps:$4 sm:$0xff]  }
  0xdf   : > { %1375 = vmatprep.subr.bf16.mxu0 %v3917_v39  ;;  %1416 = vmatprep.subr.bf16.mxu1 %v3920_v40  ;;  %v3998_v39 = vld [vmem:[%s4656_s11 + $0x20c] ss:$48 sps:$4 sm:$0xff]   ;;  %v3993_v40 = vld [vmem:[%s4656_s11 + $0x200] ss:$48 sps:$4 sm:$0xff]  }
 0x150   : > { %v691_v15 = vpop.xlane.xlu0 %690 }
 0x151   : > { %v693_v16 = vmul.f32 0.0078125, %v691_v15  ;;  %v3962_v15 = vld [vmem:[%s4656_s11 + $0x2bc] ss:$48 sps:$4 sm:$0xff]  }
 0x153   : > { %v694_v17 = vsub.f32 %v687_v2, %v693_v16  ;;  %v3941_v2 = vld [vmem:[%s4656_s11 + $0x194] ss:$48 sps:$4 sm:$0xff]   ;;  %v3957_v16 = vld [vmem:[%s4656_s11 + $0x2b0] ss:$48 sps:$4 sm:$0xff]  }
 0x155   : > { %v695_v18 = vmul.f32 %v694_v17, %v694_v17 }
 0x157   : > { %696 = vadd.xlane.f32.xlu0 %v695_v18  ;;  %v3965_v18 = vld [vmem:[%s4656_s11 + $0x24] ss:$48 sps:$4 sm:$0xff]  }
 0x1e4   : > { %v697_v42 = vpop.xlane.xlu0 %696 }
 0x1e5   : > { %v698_v43 = vmul.f32 0.0078125, %v697_v42  ;;  %v3996_v42 = vld [vmem:[%s4656_s11 + $0x208] ss:$48 sps:$4 sm:$0xff]  }
 0x1e7   : > { %v699_v44 = vadd.f32 1e-05, %v698_v43  ;;  %v4001_v43 = vld [vmem:[%s4656_s11 + $0x264] ss:$48 sps:$4 sm:$0xff]  }
 0x1e9   : > { %4123 = vrsqrt.f32 %v699_v44  ;;  %v4004_v44 = vld [vmem:[%s4656_s11 + $0x26c] ss:$48 sps:$4 sm:$0xff]  }
 0x1f3   : > { %v4124_v45 = vpop.eup %4123 }
 0x1f4   : > { %v701_v47 = vmul.f32 %v4124_v45, %v694_v17  ;;  %v3960_v17 = vld [vmem:[%s4656_s11 + $0x2b8] ss:$48 sps:$4 sm:$0xff]   ;;  %v3999_v45 = vld [vmem:[%s4656_s11 + $0x260] ss:$48 sps:$4 sm:$0xff]  }
 0x1f6   : > { %v708_v49 = vmul.f32 %v3337_v46, %v701_v47  ;;  %v4002_v46 = vld [vmem:[%s4656_s11 + $0x268] ss:$48 sps:$4 sm:$0xff]   ;;  %v4007_v47 = vld [vmem:[%s4656_s11 + $0x2c4] ss:$48 sps:$4 sm:$0xff]  }
 0x1f8   : > { %v715_v50 = vadd.f32 %v3338_v48, %v708_v49  ;;  %v4010_v48 = vld [vmem:[%s4656_s11 + $0x2cc] ss:$48 sps:$4 sm:$0xff]   ;;  %v4005_v49 = vld [vmem:[%s4656_s11 + $0x2c0] ss:$48 sps:$4 sm:$0xff]  }
 0x1fa   : > { %v4771_v53 = vpack.c.bf16 %v715_v50, %v715_v50  ;;  %v4008_v50 = vld [vmem:[%s4656_s11 + $0x2c8] ss:$48 sps:$4 sm:$0xff]  }
 0x1fc   : > { %1326 = vmatmul.mubr.bf16.vlgmr.msra.gmra.mrb[0].mxu0 %v4771_v53  ;;  %1367 = vmatmul.mubr.bf16.vlgmr.msra.gmra.mrb[0].mxu1 %v4771_v53 }
 0x1fd   : > { %1376 = vmatpush1.bf16.msra.mxu0 %v3915_v51  ;;  %1417 = vmatpush1.bf16.msra.mxu1 %v3918_v52  ;;  %v4359_v51 = vmov 0.0  }
 0x1fe   : > { %1377 = vmatprep.subr.bf16.mxu0 %v3923_v54  ;;  %1418 = vmatprep.subr.bf16.mxu1 %v3926_v55 }
 0x1ff   : > { %1407 = vmatprep.mubr.bf16.mxu0 %v4358_v41  ;;  %1448 = vmatprep.mubr.bf16.mxu1 %v4358_v41 }
 0x201   : > { %1378 = vmatpush1.bf16.msra.mxu0 %v3921_v56  ;;  %1419 = vmatpush1.bf16.msra.mxu1 %v3924_v57 }
 0x202   : > { %1379 = vmatprep.subr.bf16.mxu0 %v3929_v58  ;;  %1420 = vmatprep.subr.bf16.mxu1 %v3932_v59 }
 0x205   : > { %1380 = vmatpush1.bf16.msra.mxu0 %v3927_v60  ;;  %1421 = vmatpush1.bf16.msra.mxu1 %v3930_v61 }
 0x206   : > { %1381 = vmatprep.subr.bf16.mxu0 %v3935_v62  ;;  %1422 = vmatprep.subr.bf16.mxu1 %v3938_v63 }
 0x209   : > { %1382 = vmatpush1.bf16.msra.mxu0 %v3933_v0  ;;  %1423 = vmatpush1.bf16.msra.mxu1 %v3936_v1 }
 0x20a   : > { %1383 = vmatprep.subr.bf16.mxu0 %v3941_v2  ;;  %1424 = vmatprep.subr.bf16.mxu1 %v3944_v3 }
 0x20d   : > { %1384 = vmatpush1.bf16.msra.mxu0 %v3939_v4  ;;  %1425 = vmatpush1.bf16.msra.mxu1 %v3942_v5 }
 0x20e   : > { %1385 = vmatprep.subr.bf16.mxu0 %v3947_v6  ;;  %1426 = vmatprep.subr.bf16.mxu1 %v3950_v7 }
 0x211   : > { %1386 = vmatpush1.bf16.msra.mxu0 %v3945_v8  ;;  %1427 = vmatpush1.bf16.msra.mxu1 %v3948_v9 }
 0x212   : > { %1387 = vmatprep.subr.bf16.mxu0 %v3953_v10  ;;  %1428 = vmatprep.subr.bf16.mxu1 %v3956_v11 }
 0x215   : > { %1388 = vmatpush1.bf16.msra.mxu0 %v3951_v12  ;;  %1429 = vmatpush1.bf16.msra.mxu1 %v3954_v13 }
 0x216   : > { %1389 = vmatprep.subr.bf16.mxu0 %v3959_v14  ;;  %1430 = vmatprep.subr.bf16.mxu1 %v3962_v15 }
 0x219   : > { %1390 = vmatpush1.bf16.msra.mxu0 %v3957_v16  ;;  %1431 = vmatpush1.bf16.msra.mxu1 %v3960_v17 }
 0x21a   : > { %1457 = vmatprep.subr.bf16.mxu0 %v3965_v18  ;;  %1498 = vmatprep.subr.bf16.mxu1 %v3968_v19 }
 0x21c   : > { %1408 = vmatmul.mubr.bf16.vlgmr.msra.gmra.mrb[4].mxu0 %v4771_v53  ;;  %1449 = vmatmul.mubr.bf16.vlgmr.msra.gmra.mrb[4].mxu1 %v4771_v53 }
 0x21d   : > { %1458 = vmatpush1.bf16.msra.mxu0 %v3963_v20  ;;  %1499 = vmatpush1.bf16.msra.mxu1 %v3966_v21 }
 0x21e   : > { %1459 = vmatprep.subr.bf16.mxu0 %v3971_v22  ;;  %1500 = vmatprep.subr.bf16.mxu1 %v3974_v23 }
 0x21f   : > { %1489 = vmatprep.mubr.bf16.mxu0 %v4358_v41  ;;  %1530 = vmatprep.mubr.bf16.mxu1 %v4358_v41 }
 0x221   : > { %1460 = vmatpush1.bf16.msra.mxu0 %v3969_v24  ;;  %1501 = vmatpush1.bf16.msra.mxu1 %v3972_v25 }
 0x222   : > { %1461 = vmatprep.subr.bf16.mxu0 %v3977_v26  ;;  %1502 = vmatprep.subr.bf16.mxu1 %v3980_v27 }
 0x225   : > { %1462 = vmatpush1.bf16.msra.mxu0 %v3975_v28  ;;  %1503 = vmatpush1.bf16.msra.mxu1 %v3978_v29 }
 0x226   : > { %1463 = vmatprep.subr.bf16.mxu0 %v3983_v30  ;;  %1504 = vmatprep.subr.bf16.mxu1 %v3986_v31 }
 0x229   : > { %1464 = vmatpush1.bf16.msra.mxu0 %v3981_v32  ;;  %1505 = vmatpush1.bf16.msra.mxu1 %v3984_v33 }
 0x22a   : > { %1465 = vmatprep.subr.bf16.mxu0 %v3989_v34  ;;  %1506 = vmatprep.subr.bf16.mxu1 %v3992_v35 }
 0x22d   : > { %1466 = vmatpush1.bf16.msra.mxu0 %v3987_v36  ;;  %1507 = vmatpush1.bf16.msra.mxu1 %v3990_v37 }
 0x22e   : > { %1467 = vmatprep.subr.bf16.mxu0 %v3995_v38  ;;  %1508 = vmatprep.subr.bf16.mxu1 %v3998_v39 }
 0x231   : > { %1468 = vmatpush1.bf16.msra.mxu0 %v3993_v40  ;;  %1509 = vmatpush1.bf16.msra.mxu1 %v3996_v42 }
 0x232   : > { %1469 = vmatprep.subr.bf16.mxu0 %v4001_v43  ;;  %1510 = vmatprep.subr.bf16.mxu1 %v4004_v44 }
 0x235   : > { %1470 = vmatpush1.bf16.msra.mxu0 %v3999_v45  ;;  %1511 = vmatpush1.bf16.msra.mxu1 %v4002_v46 }
 0x236   : > { %1471 = vmatprep.subr.bf16.mxu0 %v4007_v47  ;;  %1512 = vmatprep.subr.bf16.mxu1 %v4010_v48 }
 0x239   : > { %1472 = vmatpush1.bf16.msra.mxu0 %v4005_v49  ;;  %1513 = vmatpush1.bf16.msra.mxu1 %v4008_v50 }
 0x23a   : > { %3641 = vmatprep.subr.bf16.mxu0 %v4359_v51  ;;  %3659 = vmatprep.subr.bf16.mxu1 %v4359_v51 }
 0x23c   : > { %1490 = vmatmul.mubr.bf16.vlgmr.msra.gmra.mrb[8].mxu0 %v4771_v53  ;;  %1531 = vmatmul.mubr.bf16.vlgmr.msra.gmra.mrb[8].mxu1 %v4771_v53 }
 0x23d   : > { %3643 = vmatprep.mubr.msk.bf16.mxu0 %vm4360_vm0, %v4359_v51  ;;  %3661 = vmatprep.mubr.msk.bf16.mxu1 %vm4360_vm0, %v4359_v51 }
 0x2cf   : > { %v1327_v52 = vpop.f32.mrb[0].mxu0  ;;  %v4849_v54 = vpop.f32.mrb[0].mxu1 }
 0x2d0   : > { %v4851_v55 = vpop.f32.mrb[1].mxu0  ;;  %v4853_v56 = vpop.f32.mrb[1].mxu1  ;;  %v1603_v5 = vmul.f32 0.125, %v1327_v52 }
 0x2d1   : > { %v1331_v53 = vpop.f32.mrb[2].mxu0  ;;  %v1372_v57 = vpop.f32.mrb[2].mxu1  ;;  %v1708_v38 = vmul.f32 0.125, %v4851_v55 }
 0x2d2   : > { %v1332_v58 = vpop.f32.mrb[3].mxu0  ;;  %v1373_v59 = vpop.f32.mrb[3].mxu1  ;;  %v1604_v6 = vpack.c.bf16 %v1603_v5, %v1603_v5 }
 0x2d3   : > { %v1709_v39 = vpack.c.bf16 %v1708_v38, %v1708_v38  ;;  %v4019_v58 = vld [vmem:[%s4664_s30 + $0x40] sm:$0xff]   ;;  %v4020_v59 = vld [vmem:[%s4664_s30 + $0x48] sm:$0xff]  }
 0x2ef   : > { %v1409_v60 = vpop.f32.mrb[4].mxu0  ;;  %v4855_v61 = vpop.f32.mrb[4].mxu1 }
 0x2f0   : > { %v1605_v62 = vpack.c.bf16 %v1409_v60, %v1409_v60  ;;  %v1411_v63 = vpop.f32.mrb[5].mxu0  ;;  %v4857_v0 = vpop.f32.mrb[5].mxu1  ;;  %v4021_v60 = vld [vmem:[%s4664_s30 + $0x50] sm:$0xff]  }
 0x2f1   : > { %v1413_v1 = vpop.f32.mrb[6].mxu0  ;;  %v1454_v2 = vpop.f32.mrb[6].mxu1  ;;  %v1710_v37 = vpack.c.bf16 %v1411_v63, %v1411_v63  ;;  %v4023_v63 = vld [vmem:[%s4664_s30 + $0x60] sm:$0xff]  }
 0x2f2   : > { %v1414_v3 = vpop.f32.mrb[7].mxu0  ;;  %v1455_v4 = vpop.f32.mrb[7].mxu1  ;;  %3642 = vmatpush3.bf16.xpose.msra.mxu0 %v1605_v62  ;;  %v4022_v62 = vld [vmem:[%s4664_s30 + $0x58] sm:$0xff]   ;;  %v4024_v1 = vld [vmem:[%s4664_s30 + $0x68] sm:$0xff]   ;;  %v4025_v2 = vld [vmem:[%s4664_s30 + $0x70] sm:$0xff]  }
 0x2f3   : > { %3647 = vmatprep.subr.bf16.mxu0 %v4359_v51  ;;  %v4026_v3 = vld [vmem:[%s4664_s30 + $0x78] sm:$0xff]  }
 0x2f9   : > { %3644 = vmatmul.mubr.bf16.vlgmr.msra.gmra.mrb[12].mxu0 %v1604_v6 }
 0x2fa   : > { %3649 = vmatprep.mubr.msk.bf16.mxu0 %vm4360_vm0, %v4359_v51 }
 0x30f   : > { %v1491_v7 = vpop.f32.mrb[8].mxu0  ;;  %v1532_v8 = vpop.f32.mrb[8].mxu1 }
 0x310   : > { %v1606_v9 = vpack.c.bf16 %v1491_v7, %v1491_v7  ;;  %v1990_v10 = vpack.c.bf16 %v1532_v8, %v1532_v8  ;;  %v1493_v11 = vpop.f32.mrb[9].mxu0  ;;  %v1534_v12 = vpop.f32.mrb[9].mxu1  ;;  %v4011_v7 = vld [vmem:[%s4664_s30] sm:$0xff]  }
 0x311   : > { %v1711_v13 = vpack.c.bf16 %v1493_v11, %v1493_v11  ;;  %v2182_v14 = vpack.c.bf16 %v1534_v12, %v1534_v12  ;;  %v1495_v15 = vpop.f32.mrb[10].mxu0  ;;  %v1536_v16 = vpop.f32.mrb[10].mxu1  ;;  %v4014_v11 = vld [vmem:[%s4664_s30 + $0x18] sm:$0xff]   ;;  %v4015_v12 = vld [vmem:[%s4664_s30 + $0x20] sm:$0xff]  }
 0x312   : > { %v1665_v17 = vsel %vm1663_vm1, %v1606_v9, 0  ;;  %v4862_v18 = vsel %vm1663_vm1, %v1990_v10, 0  ;;  %v1496_v19 = vpop.f32.mrb[11].mxu0  ;;  %v1537_v20 = vpop.f32.mrb[11].mxu1  ;;  %v4012_v9 = vld [vmem:[%s4664_s30 + $0x8] sm:$0xff]   ;;  %v4013_v10 = vld [vmem:[%s4664_s30 + $0x10] sm:$0xff]  }
 0x313   : > { %v1768_v21 = vsel %vm1663_vm1, %v1711_v13, 0  ;;  %v4864_v22 = vsel %vm1663_vm1, %v2182_v14, 0  ;;  %3648 = vmatpush3.bf16.msra.mxu0 %v1665_v17  ;;  %v4016_v13 = vld [vmem:[%s4664_s30 + $0x28] sm:$0xff]   ;;  %v4017_v14 = vld [vmem:[%s4664_s30 + $0x30] sm:$0xff]   ;;  %v4018_v15 = vld [vmem:[%s4664_s30 + $0x38] sm:$0xff]  }
 0x314   : > { %3660 = vmatpush3.bf16.msra.mxu1 %v1768_v21  ;;  %3653 = vmatprep.subr.bf16.mxu0 %v4359_v51  ;;  %v1989_v21 = vpack.c.bf16 %v4855_v61, %v4855_v61 }
 0x315   : > { %3685 = vmatprep.subr.bf16.mxu1 %v4359_v51 }
 0x3cc   : > { %v1641_v23 = vpop.f32.mrb[12].mxu0 }
 0x3cd   : > { %v3645_v24 = vpop.f32.mrb[13].mxu0  ;;  %v1648_v25 = vsel %vm1647_vm2, %v1641_v23, -inf }
 0x3ce   : > { %1649 = vmax.xlane.f32.xlu1 %v1648_v25  ;;  %v1644_v26 = vpop.f32.mrb[14].mxu0 }
 0x3cf   : > { %v3646_v27 = vpop.f32.mrb[15].mxu0 }
 0x45b   : > { %v1650_v28 = vpop.xlane.xlu1 %1649 }
 0x45c   : > { %v1651_v29 = vsub.f32 %v1641_v23, %v1650_v28 }
 0x45e   : > { %v1652_v30 = vmul.f32 1.442695, %v1651_v29 }
 0x460   : > { %4125 = vpow2.f32 %v1652_v30 }
 0x46a   : > { %v4126_v31 = vpop.eup %4125 }
 0x46b   : > { %v1654_v32 = vsel %vm1647_vm2, %v4126_v31, 0.0 }
 0x46c   : > { %1655 = vadd.xlane.f32.xlu1 %v1654_v32 }
 0x4f9   : > { %v1656_v33 = vpop.xlane.xlu1 %1655 }
 0x4fa   : > { %4127 = vrcp.f32 %v1656_v33 }
 0x504   : > { %v4128_v34 = vpop.eup %4127 }
 0x505   : > { %v1658_v35 = vmul.f32 %v4128_v34, %v4126_v31 }
 0x507   : > { %v1659_v36 = vpack.c.bf16 %v1658_v35, %v1658_v35 }
 0x509   : > { %3650 = vmatmul.mubr.msk.bf16.vlgmr.msra.gmra.mrb[16].mxu0 %vm1647_vm2, %v1659_v36 }
 0x50a   : > { %3654 = vmatpush3.bf16.xpose.msra.mxu0 %v1710_v37  ;;  %3655 = vmatprep.mubr.msk.bf16.mxu0 %vm4360_vm0, %v4359_v51 }
 0x50b   : > { %3665 = vmatprep.subr.bf16.mxu0 %v4359_v51 }
 0x511   : > { %3656 = vmatmul.mubr.bf16.vlgmr.msra.gmra.mrb[20].mxu0 %v1709_v39 }
 0x512   : > { %3681 = vmatprep.mubr.msk.bf16.mxu0 %vm4360_vm0, %v4359_v51  ;;  %3666 = vmatpush3.bf16.msra.mxu0 %v4019_v58  ;;  %v2181_v58 = vpack.c.bf16 %v4857_v0, %v4857_v0  ;;  %v4034_v0 = vld [vmem:[%s4664_s30 + $0xb8] sm:$0xff]  }
 0x513   : > { %3667 = vmatprep.subr.bf16.mxu0 %v4359_v51 }
 0x516   : > { %3668 = vmatpush3.bf16.msra.mxu0 %v4020_v59  ;;  %v2179_v59 = vmul.f32 0.125, %v4853_v56 }
 0x517   : > { %3669 = vmatprep.subr.bf16.mxu0 %v4359_v51 }
 0x51a   : > { %3670 = vmatpush3.bf16.msra.mxu0 %v4021_v60  ;;  %v2180_v60 = vpack.c.bf16 %v2179_v59, %v2179_v59 }
 0x51b   : > { %3671 = vmatprep.subr.bf16.mxu0 %v4359_v51 }
 0x51e   : > { %3672 = vmatpush3.bf16.msra.mxu0 %v4022_v62 }
 0x51f   : > { %3673 = vmatprep.subr.bf16.mxu0 %v4359_v51 }
 0x522   : > { %3674 = vmatpush3.bf16.msra.mxu0 %v4023_v63 }
 0x523   : > { %3675 = vmatprep.subr.bf16.mxu0 %v4359_v51 }
 0x526   : > { %3676 = vmatpush3.bf16.msra.mxu0 %v4024_v1 }
 0x527   : > { %3677 = vmatprep.subr.bf16.mxu0 %v4359_v51 }
 0x52a   : > { %3678 = vmatpush3.bf16.msra.mxu0 %v4025_v2 }
 0x52b   : > { %3679 = vmatprep.subr.bf16.mxu0 %v4359_v51 }
 0x52e   : > { %3680 = vmatpush3.bf16.msra.mxu0 %v4026_v3 }
 0x52f   : > { %3705 = vmatprep.subr.bf16.mxu0 %v4359_v51 }
 0x5dc   : > { %v4877_v40 = vpop.f32.mrb[16].mxu0 }
 0x5dd   : > { %v3651_v42 = vpop.f32.mrb[17].mxu0  ;;  %v1707_v16 = vpack.c.bf16 %v4877_v40, %v4877_v40 }
 0x5de   : > { %v1704_v43 = vpop.f32.mrb[18].mxu0 }
 0x5df   : > { %v3652_v44 = vpop.f32.mrb[19].mxu0 }
 0x5e0   : > { %v4027_v44 = vld [vmem:[%s4664_s30 + $0x80] sm:$0xff]  }
 0x5e4   : > { %v1746_v45 = vpop.f32.mrb[20].mxu0 }
 0x5e5   : > { %v3657_v46 = vpop.f32.mrb[21].mxu0  ;;  %v1752_v47 = vsel %vm1647_vm2, %v1746_v45, -inf }
 0x5e6   : > { %1753 = vmax.xlane.f32.xlu0 %v1752_v47  ;;  %v1749_v48 = vpop.f32.mrb[22].mxu0  ;;  %v4029_v46 = vld [vmem:[%s4664_s30 + $0x90] sm:$0xff]   ;;  %v4030_v47 = vld [vmem:[%s4664_s30 + $0x98] sm:$0xff]  }
 0x5e7   : > { %v3658_v49 = vpop.f32.mrb[23].mxu0  ;;  %v4031_v48 = vld [vmem:[%s4664_s30 + $0xa0] sm:$0xff]  }
 0x5e8   : > { %v4032_v49 = vld [vmem:[%s4664_s30 + $0xa8] sm:$0xff]  }
 0x673   : > { %v1754_v50 = vpop.xlane.xlu0 %1753 }
 0x674   : > { %v1755_v52 = vsub.f32 %v1746_v45, %v1754_v50  ;;  %v4028_v45 = vld [vmem:[%s4664_s30 + $0x88] sm:$0xff]   ;;  %v4033_v50 = vld [vmem:[%s4664_s30 + $0xb0] sm:$0xff]  }
 0x676   : > { %v1756_v55 = vmul.f32 1.442695, %v1755_v52 }
 0x678   : > { %4129 = vpow2.f32 %v1756_v55 }
 0x682   : > { %v4130_v53 = vpop.eup %4129 }
 0x683   : > { %v1758_v57 = vsel %vm1647_vm2, %v4130_v53, 0.0 }
 0x684   : > { %1759 = vadd.xlane.f32.xlu1 %v1758_v57 }
 0x711   : > { %v1760_v4 = vpop.xlane.xlu1 %1759 }
 0x712   : > { %4131 = vrcp.f32 %v1760_v4 }
 0x71c   : > { %v4132_v5 = vpop.eup %4131 }
 0x71d   : > { %v1762_v6 = vmul.f32 %v4132_v5, %v4130_v53 }
 0x71f   : > { %v1763_v8 = vpack.c.bf16 %v1762_v6, %v1762_v6 }
 0x721   : > { %3662 = vmatmul.mubr.msk.bf16.vlgmr.msra.gmra.mrb[12].mxu1 %vm1647_vm2, %v1763_v8 }
 0x722   : > { %3686 = vmatpush3.bf16.msra.mxu1 %v4011_v7  ;;  %3701 = vmatprep.mubr.msk.bf16.mxu1 %vm4360_vm0, %v4359_v51 }
 0x723   : > { %3687 = vmatprep.subr.bf16.mxu1 %v4359_v51 }
 0x726   : > { %3688 = vmatpush3.bf16.msra.mxu1 %v4012_v9 }
 0x727   : > { %3689 = vmatprep.subr.bf16.mxu1 %v4359_v51 }
 0x72a   : > { %3690 = vmatpush3.bf16.msra.mxu1 %v4013_v10 }
 0x72b   : > { %3691 = vmatprep.subr.bf16.mxu1 %v4359_v51 }
 0x72e   : > { %3692 = vmatpush3.bf16.msra.mxu1 %v4014_v11 }
 0x72f   : > { %3693 = vmatprep.subr.bf16.mxu1 %v4359_v51 }
 0x732   : > { %3694 = vmatpush3.bf16.msra.mxu1 %v4015_v12 }
 0x733   : > { %3695 = vmatprep.subr.bf16.mxu1 %v4359_v51 }
 0x736   : > { %3696 = vmatpush3.bf16.msra.mxu1 %v4016_v13 }
 0x737   : > { %3697 = vmatprep.subr.bf16.mxu1 %v4359_v51 }
 0x73a   : > { %3698 = vmatpush3.bf16.msra.mxu1 %v4017_v14 }
 0x73b   : > { %3699 = vmatprep.subr.bf16.mxu1 %v4359_v51 }
 0x73e   : > { %3700 = vmatpush3.bf16.msra.mxu1 %v4018_v15 }
 0x73f   : > { %3711 = vmatprep.subr.bf16.mxu1 %v4359_v51 }
 0x741   : > { %3702 = vmatmul.mubr.bf16.vlgmr.msra.gmra.mrb[16].mxu1 %v1707_v16 }
 0x742   : > { %3712 = vmatpush3.bf16.msra.mxu1 %v4862_v18  ;;  %3713 = vmatprep.mubr.msk.bf16.mxu1 %vm4360_vm0, %v4359_v51  ;;  %v1987_v18 = vmul.f32 0.125, %v4849_v54 }
 0x743   : > { %3737 = vmatprep.subr.bf16.mxu1 %v4359_v51 }
 0x744   : > { %v1988_v25 = vpack.c.bf16 %v1987_v18, %v1987_v18  ;;  %v4037_v18 = vld [vmem:[%s4664_s30 + $0xd0] sm:$0xff]  }
 0x7f4   : > { %v1804_v17 = vpop.f32.mrb[12].mxu1 }
 0x7f5   : > { %v1810_v19 = vpack.c.bf16 %v1804_v17, %v1804_v17  ;;  %v3663_v20 = vpop.f32.mrb[13].mxu1 }
 0x7f6   : > { %v1807_v23 = vpop.f32.mrb[14].mxu1 }
 0x7f7   : > { %v3664_v24 = vpop.f32.mrb[15].mxu1  ;;  %3682 = vmatmul.mubr.bf16.vlgmr.msra.gmra.mrb[24].mxu0 %v1810_v19 }
 0x7f8   : > { %3706 = vmatpush3.bf16.xpose.msra.mxu0 %v1989_v21  ;;  %3707 = vmatprep.mubr.msk.bf16.mxu0 %vm4360_vm0, %v4359_v51  ;;  %v4035_v21 = vld [vmem:[%s4664_s30 + $0xc0] sm:$0xff]   ;;  %v4036_v24 = vld [vmem:[%s4664_s30 + $0xc8] sm:$0xff]  }
 0x7f9   : > { %3717 = vmatprep.subr.bf16.mxu0 %v4359_v51 }
 0x7ff   : > { %3708 = vmatmul.mubr.bf16.vlgmr.msra.gmra.mrb[28].mxu0 %v1988_v25  ;;  %v4038_v25 = vld [vmem:[%s4664_s30 + $0xd8] sm:$0xff]  }
 0x800   : > { %3733 = vmatprep.mubr.msk.bf16.mxu0 %vm4360_vm0, %v4359_v51  ;;  %3718 = vmatpush3.bf16.msra.mxu0 %v4027_v44  ;;  %v4048_v44 = vld [vmem:[%s4670_s3 + $0xc] ss:$16 sps:$4 sm:$0xff]  }
 0x801   : > { %3719 = vmatprep.subr.bf16.mxu0 %v4359_v51 }
 0x804   : > { %3720 = vmatpush3.bf16.msra.mxu0 %v4028_v45  ;;  %v4051_v45 = vld [vmem:[%s4670_s3 + $0x24] ss:$16 sps:$4 sm:$0xff]  }
 0x805   : > { %3721 = vmatprep.subr.bf16.mxu0 %v4359_v51 }
 0x808   : > { %3722 = vmatpush3.bf16.msra.mxu0 %v4029_v46  ;;  %v4054_v46 = vld [vmem:[%s4670_s3 + $0x2c] ss:$16 sps:$4 sm:$0xff]  }
 0x809   : > { %3723 = vmatprep.subr.bf16.mxu0 %v4359_v51 }
 0x80c   : > { %3724 = vmatpush3.bf16.msra.mxu0 %v4030_v47  ;;  %v4049_v47 = vld [vmem:[%s4670_s3 + $0x20] ss:$16 sps:$4 sm:$0xff]  }
 0x80d   : > { %3725 = vmatprep.subr.bf16.mxu0 %v4359_v51 }
 0x810   : > { %3726 = vmatpush3.bf16.msra.mxu0 %v4031_v48  ;;  %v4052_v48 = vld [vmem:[%s4670_s3 + $0x28] ss:$16 sps:$4 sm:$0xff]  }
 0x811   : > { %3727 = vmatprep.subr.bf16.mxu0 %v4359_v51 }
 0x814   : > { %v1981_v26 = vpop.f32.mrb[16].mxu1  ;;  %3728 = vmatpush3.bf16.msra.mxu0 %v4032_v49  ;;  %v4057_v49 = vld [vmem:[%s4670_s3 + $0x44] ss:$16 sps:$4 sm:$0xff]  }
 0x815   : > { %v3703_v27 = vpop.f32.mrb[17].mxu1  ;;  %3729 = vmatprep.subr.bf16.mxu0 %v4359_v51 }
 0x816   : > { %v1984_v28 = vpop.f32.mrb[18].mxu1  ;;  %v4040_v27 = vld [vmem:[%s4664_s30 + $0xe8] sm:$0xff]  }
 0x817   : > { %v3704_v61 = vpop.f32.mrb[19].mxu1  ;;  %v4041_v28 = vld [vmem:[%s4664_s30 + $0xf0] sm:$0xff]  }
 0x818   : > { %3730 = vmatpush3.bf16.msra.mxu0 %v4033_v50  ;;  %v4042_v61 = vld [vmem:[%s4664_s30 + $0xf8] sm:$0xff]  }
 0x819   : > { %3731 = vmatprep.subr.bf16.mxu0 %v4359_v51  ;;  %v4060_v50 = vld [vmem:[%s4670_s3 + $0x4c] ss:$16 sps:$4 sm:$0xff]  }
 0x81c   : > { %3732 = vmatpush3.bf16.msra.mxu0 %v4034_v0  ;;  %v4066_v0 = vld [vmem:[%s4670_s3 + $0x6c] ss:$16 sps:$4 sm:$0xff]  }
 0x8ca   : > { %v1893_v29 = vpop.f32.mrb[24].mxu0 }
 0x8cb   : > { %v4930_v30 = vadd.f32 %v1981_v26, %v1893_v29  ;;  %v3683_v31 = vpop.f32.mrb[25].mxu0  ;;  %v4039_v26 = vld [vmem:[%s4664_s30 + $0xe0] sm:$0xff]  }
 0x8cc   : > { %v1896_v32 = vpop.f32.mrb[26].mxu0 }
 0x8cd   : > { %v3684_v33 = vpop.f32.mrb[27].mxu0 }
 0x8d2   : > { %v2025_v54 = vpop.f32.mrb[28].mxu0 }
 0x8d3   : > { %v3709_v34 = vpop.f32.mrb[29].mxu0  ;;  %v2031_v35 = vsel %vm1647_vm2, %v2025_v54, -inf }
 0x8d4   : > { %2032 = vmax.xlane.f32.xlu0 %v2031_v35  ;;  %v2028_v36 = vpop.f32.mrb[30].mxu0 }
 0x8d5   : > { %v3710_v37 = vpop.f32.mrb[31].mxu0  ;;  %v3471_v36 = vld [vmem:[%s5164_s21] ss:$0 sm:$0xff] }
 0x8d6   : > { %v4151_v37 = vld [vmem:[#allocation2] sm:$0xff] }
 0x961   : > { %v2033_v38 = vpop.xlane.xlu0 %2032 }
 0x962   : > { %v2034_v39 = vsub.f32 %v2025_v54, %v2033_v38 }
 0x964   : > { %v2035_v40 = vmul.f32 1.442695, %v2034_v39 }
 0x966   : > { %4133 = vpow2.f32 %v2035_v40 }
 0x970   : > { %v4134_v42 = vpop.eup %4133 }
 0x971   : > { %v2037_v43 = vsel %vm1647_vm2, %v4134_v42, 0.0 }
 0x972   : > { %2038 = vadd.xlane.f32.xlu1 %v2037_v43  ;;  %v4046_v43 = vld [vmem:[%s4670_s3 + $0x8] ss:$16 sps:$4 sm:$0xff]  }
 0x9ff   : > { %v2039_v52 = vpop.xlane.xlu1 %2038 }
 0xa00   : > { %4135 = vrcp.f32 %v2039_v52  ;;  %v4055_v52 = vld [vmem:[%s4670_s3 + $0x40] ss:$16 sps:$4 sm:$0xff]  }
 0xa0a   : > { %v4136_v55 = vpop.eup %4135 }
 0xa0b   : > { %v2041_v53 = vmul.f32 %v4136_v55, %v4134_v42  ;;  %v4045_v42 = vld [vmem:[%s4670_s3 + $0x4] ss:$16 sps:$4 sm:$0xff]   ;;  %v4058_v55 = vld [vmem:[%s4670_s3 + $0x48] ss:$16 sps:$4 sm:$0xff]  }
 0xa0c   : > { %2622 = vmatprep.subr.bf16.mxu0 %v4045_v42  ;;  %v4109_v42 = vld [vmem:[%s5165_s19 + $0x20] sm:$0xff]  }
 0xa0d   : > { %v2042_v57 = vpack.c.bf16 %v2041_v53, %v2041_v53 }
 0xa0f   : > { %3714 = vmatmul.mubr.msk.bf16.vlgmr.msra.gmra.mrb[20].mxu1 %vm1647_vm2, %v2042_v57 }
 0xa10   : > { %3738 = vmatpush3.bf16.xpose.msra.mxu1 %v2181_v58  ;;  %3739 = vmatprep.mubr.msk.bf16.mxu1 %vm4360_vm0, %v4359_v51 }
 0xa11   : > { %3743 = vmatprep.subr.bf16.mxu1 %v4359_v51 }
 0xa17   : > { %3740 = vmatmul.mubr.bf16.vlgmr.msra.gmra.mrb[24].mxu1 %v2180_v60  ;;  %v4063_v60 = vld [vmem:[%s4670_s3 + $0x64] ss:$16 sps:$4 sm:$0xff]  }
 0xa18   : > { %3744 = vmatpush3.bf16.msra.mxu1 %v4864_v22  ;;  %3745 = vmatprep.mubr.msk.bf16.mxu1 %vm4360_vm0, %v4359_v51 }
 0xa19   : > { %3749 = vmatprep.subr.bf16.mxu1 %v4359_v51 }
 0xae2   : > { %v2083_v62 = vpop.f32.mrb[20].mxu1 }
 0xae3   : > { %v2089_v63 = vpack.c.bf16 %v2083_v62, %v2083_v62  ;;  %v3715_v1 = vpop.f32.mrb[21].mxu1  ;;  %v4061_v62 = vld [vmem:[%s4670_s3 + $0x60] ss:$16 sps:$4 sm:$0xff]  }
 0xae4   : > { %v2086_v2 = vpop.f32.mrb[22].mxu1  ;;  %v4069_v1 = vld [vmem:[%s4670_s3 + $0x84] ss:$16 sps:$4 sm:$0xff]  }
 0xae5   : > { %v3716_v3 = vpop.f32.mrb[23].mxu1  ;;  %3734 = vmatmul.mubr.bf16.vlgmr.msra.gmra.mrb[32].mxu0 %v2089_v63  ;;  %v4064_v63 = vld [vmem:[%s4670_s3 + $0x68] ss:$16 sps:$4 sm:$0xff]   ;;  %v4072_v2 = vld [vmem:[%s4670_s3 + $0x8c] ss:$16 sps:$4 sm:$0xff]  }
 0xae6   : > { %2654 = vmatprep.mubr.bf16.mxu0 %v4358_v41  ;;  %v4067_v3 = vld [vmem:[%s4670_s3 + $0x80] ss:$16 sps:$4 sm:$0xff]  }
 0xaea   : > { %v2217_v56 = vpop.f32.mrb[24].mxu1 }
 0xaeb   : > { %v3741_v4 = vpop.f32.mrb[25].mxu1  ;;  %v2223_v5 = vsel %vm1647_vm2, %v2217_v56, -inf }
 0xaec   : > { %2224 = vmax.xlane.f32.xlu0 %v2223_v5  ;;  %v2220_v22 = vpop.f32.mrb[26].mxu1  ;;  %v4075_v4 = vld [vmem:[%s4670_s3 + $0xa4] ss:$16 sps:$4 sm:$0xff]   ;;  %v4078_v5 = vld [vmem:[%s4670_s3 + $0xac] ss:$16 sps:$4 sm:$0xff]  }
 0xaed   : > { %v3742_v6 = vpop.f32.mrb[27].mxu1  ;;  %v4073_v22 = vld [vmem:[%s4670_s3 + $0xa0] ss:$16 sps:$4 sm:$0xff]  }
 0xaee   : > { %v4076_v6 = vld [vmem:[%s4670_s3 + $0xa8] ss:$16 sps:$4 sm:$0xff]  }
 0xb79   : > { %v2225_v7 = vpop.xlane.xlu0 %2224 }
 0xb7a   : > { %v2226_v8 = vsub.f32 %v2217_v56, %v2225_v7  ;;  %v4070_v56 = vld [vmem:[%s4670_s3 + $0x88] ss:$16 sps:$4 sm:$0xff]   ;;  %v4081_v7 = vld [vmem:[%s4670_s3 + $0xc4] ss:$16 sps:$4 sm:$0xff]  }
 0xb7c   : > { %v2227_v9 = vmul.f32 1.442695, %v2226_v8  ;;  %v4084_v8 = vld [vmem:[%s4670_s3 + $0xcc] ss:$16 sps:$4 sm:$0xff]  }
 0xb7e   : > { %4137 = vpow2.f32 %v2227_v9  ;;  %v4079_v9 = vld [vmem:[%s4670_s3 + $0xc0] ss:$16 sps:$4 sm:$0xff]  }
 0xb88   : > { %v4138_v10 = vpop.eup %4137 }
 0xb89   : > { %v2229_v11 = vsel %vm1647_vm2, %v4138_v10, 0.0 }
 0xb8a   : > { %2230 = vadd.xlane.f32.xlu1 %v2229_v11  ;;  %v4087_v11 = vld [vmem:[%s4670_s3 + $0xe4] ss:$16 sps:$4 sm:$0xff]  }
 0xbb8   : > { %v2172_v12 = vpop.f32.mrb[32].mxu0 }
 0xbb9   : > { %v2178_v13 = vadd.f32 %v2172_v12, %v4930_v30  ;;  %v3735_v14 = vpop.f32.mrb[33].mxu0  ;;  %v4090_v12 = vld [vmem:[%s4670_s3 + $0xec] ss:$16 sps:$4 sm:$0xff]  }
 0xbba   : > { %v2175_v15 = vpop.f32.mrb[34].mxu0  ;;  %v4088_v14 = vld [vmem:[%s4670_s3 + $0xe8] ss:$16 sps:$4 sm:$0xff]  }
 0xbbb   : > { %v3736_v16 = vpop.f32.mrb[35].mxu0 }
 0xc17   : > { %v2231_v17 = vpop.xlane.xlu1 %2230 }
 0xc18   : > { %4139 = vrcp.f32 %v2231_v17 }
 0xc22   : > { %v4140_v19 = vpop.eup %4139 }
 0xc23   : > { %v2233_v20 = vmul.f32 %v4140_v19, %v4138_v10  ;;  %v4082_v10 = vld [vmem:[%s4670_s3 + $0xc8] ss:$16 sps:$4 sm:$0xff]  }
 0xc25   : > { %v2234_v23 = vpack.c.bf16 %v2233_v20, %v2233_v20  ;;  %v3472_v20 = vld [vmem:[%s664_s25] ss:$0 sm:$0xff] }
 0xc27   : > { %3746 = vmatmul.mubr.msk.bf16.vlgmr.msra.gmra.mrb[28].mxu1 %vm1647_vm2, %v2234_v23  ;;  %v3473_v23 = vld [vmem:[%s667_s18] ss:$0 sm:$0xff] }
 0xc28   : > { %3750 = vmatpush3.bf16.msra.mxu1 %v4035_v21  ;;  %3765 = vmatprep.mubr.msk.bf16.mxu1 %vm4360_vm0, %v4359_v51 }
 0xc29   : > { %3751 = vmatprep.subr.bf16.mxu1 %v4359_v51 }
 0xc2c   : > { %3752 = vmatpush3.bf16.msra.mxu1 %v4036_v24 }
 0xc2d   : > { %3753 = vmatprep.subr.bf16.mxu1 %v4359_v51 }
 0xc30   : > { %3754 = vmatpush3.bf16.msra.mxu1 %v4037_v18 }
 0xc31   : > { %3755 = vmatprep.subr.bf16.mxu1 %v4359_v51 }
 0xc34   : > { %3756 = vmatpush3.bf16.msra.mxu1 %v4038_v25 }
 0xc35   : > { %3757 = vmatprep.subr.bf16.mxu1 %v4359_v51 }
 0xc38   : > { %3758 = vmatpush3.bf16.msra.mxu1 %v4039_v26  ;;  %v4091_v26 = vld [vmem:[%s5165_s19 + $0x40] sm:$0xff]  }
 0xc39   : > { %3759 = vmatprep.subr.bf16.mxu1 %v4359_v51 }
 0xc3c   : > { %3760 = vmatpush3.bf16.msra.mxu1 %v4040_v27  ;;  %v4092_v27 = vld [vmem:[%s5165_s19 + $0xc0] sm:$0xff]  }
 0xc3d   : > { %3761 = vmatprep.subr.bf16.mxu1 %v4359_v51 }
 0xc40   : > { %3762 = vmatpush3.bf16.msra.mxu1 %v4041_v28  ;;  %v4093_v28 = vld [vmem:[%s5165_s19] sm:$0xff]  }
 0xc41   : > { %3763 = vmatprep.subr.bf16.mxu1 %v4359_v51 }
 0xc44   : > { %3764 = vmatpush3.bf16.msra.mxu1 %v4042_v61  ;;  %v4094_v61 = vld [vmem:[%s5165_s19 + $0x80] sm:$0xff]  }
 0xc45   : > { %2663 = vmatprep.subr.bf16.mxu1 %v4048_v44  ;;  %v4111_v44 = vld [vmem:[%s5165_s19 + $0x68] sm:$0xff]  }
 0xcfa   : > { %v2275_v29 = vpop.f32.mrb[28].mxu1 }
 0xcfb   : > { %v2281_v30 = vpack.c.bf16 %v2275_v29, %v2275_v29  ;;  %v3747_v31 = vpop.f32.mrb[29].mxu1  ;;  %v4095_v29 = vld [vmem:[%s5165_s19 + $0x48] sm:$0xff]  }
 0xcfc   : > { %v2278_v32 = vpop.f32.mrb[30].mxu1  ;;  %v4097_v31 = vld [vmem:[%s5165_s19 + $0x8] sm:$0xff]  }
 0xcfd   : > { %v3748_v33 = vpop.f32.mrb[31].mxu1  ;;  %3766 = vmatmul.mubr.bf16.vlgmr.msra.gmra.mrb[32].mxu1 %v2281_v30  ;;  %v4096_v30 = vld [vmem:[%s5165_s19 + $0xc8] sm:$0xff]  }
 0xcfe   : > { %2695 = vmatprep.mubr.bf16.mxu1 %v4358_v41  ;;  %v4043_v41 = vld [vmem:[%s4670_s3] ss:$16 sps:$4 sm:$0xff]   ;;  %2664 = vmatpush1.bf16.msra.mxu1 %v4046_v43  ;;  %v4099_v33 = vld [vmem:[%s5165_s19 + $0x50] sm:$0xff]   ;;  %v4110_v43 = vld [vmem:[%s5165_s19 + $0xa0] sm:$0xff]  }
 0xcff   : > { %2623 = vmatpush1.bf16.msra.mxu0 %v4043_v41  ;;  %2665 = vmatprep.subr.bf16.mxu1 %v4054_v46  ;;  %v4098_v32 = vld [vmem:[%s5165_s19 + $0x88] sm:$0xff]   ;;  %v4108_v41 = vld [vmem:[%s5165_s19 + $0xe0] sm:$0xff]  }
 0xd00   : > { %2624 = vmatprep.subr.bf16.mxu0 %v4051_v45  ;;  %v4112_v45 = vld [vmem:[%s5165_s19 + $0xe8] sm:$0xff]  }
 0xd01   : > { %v4113_v46 = vld [vmem:[%s5165_s19 + $0x28] sm:$0xff]  }
 0xd02   : > { %2666 = vmatpush1.bf16.msra.mxu1 %v4052_v48  ;;  %v4115_v48 = vld [vmem:[%s5165_s19 + $0x70] sm:$0xff]  }
 0xd03   : > { %2625 = vmatpush1.bf16.msra.mxu0 %v4049_v47  ;;  %2667 = vmatprep.subr.bf16.mxu1 %v4060_v50  ;;  %v4114_v47 = vld [vmem:[%s5165_s19 + $0xa8] sm:$0xff]   ;;  %v4117_v50 = vld [vmem:[%s5165_s19 + $0x30] sm:$0xff]  }
 0xd04   : > { %2626 = vmatprep.subr.bf16.mxu0 %v4057_v49  ;;  %v4116_v49 = vld [vmem:[%s5165_s19 + $0xf0] sm:$0xff]  }
 0xd06   : > { %2668 = vmatpush1.bf16.msra.mxu1 %v4058_v55  ;;  %v4119_v55 = vld [vmem:[%s5165_s19 + $0x78] sm:$0xff]  }
 0xd07   : > { %2627 = vmatpush1.bf16.msra.mxu0 %v4055_v52  ;;  %2669 = vmatprep.subr.bf16.mxu1 %v4066_v0  ;;  %v4118_v52 = vld [vmem:[%s5165_s19 + $0xb0] sm:$0xff]  }
 0xd08   : > { %2628 = vmatprep.subr.bf16.mxu0 %v4063_v60 }
 0xd0a   : > { %2670 = vmatpush1.bf16.msra.mxu1 %v4064_v63  ;;  %v2440_v63 = vld [vmem:[%s4715_s16] sm:$0xf] }
 0xd0b   : > { %2629 = vmatpush1.bf16.msra.mxu0 %v4061_v62  ;;  %2671 = vmatprep.subr.bf16.mxu1 %v4072_v2 }
 0xd0c   : > { %2630 = vmatprep.subr.bf16.mxu0 %v4069_v1 }
 0xd0e   : > { %2672 = vmatpush1.bf16.msra.mxu1 %v4070_v56 }
 0xd0f   : > { %2631 = vmatpush1.bf16.msra.mxu0 %v4067_v3  ;;  %2673 = vmatprep.subr.bf16.mxu1 %v4078_v5 }
 0xd10   : > { %2632 = vmatprep.subr.bf16.mxu0 %v4075_v4 }
 0xd12   : > { %2674 = vmatpush1.bf16.msra.mxu1 %v4076_v6 }
 0xd13   : > { %2633 = vmatpush1.bf16.msra.mxu0 %v4073_v22  ;;  %2675 = vmatprep.subr.bf16.mxu1 %v4084_v8 }
 0xd14   : > { %2634 = vmatprep.subr.bf16.mxu0 %v4081_v7 }
 0xd16   : > { %2676 = vmatpush1.bf16.msra.mxu1 %v4082_v10 }
 0xd17   : > { %2635 = vmatpush1.bf16.msra.mxu0 %v4079_v9  ;;  %2677 = vmatprep.subr.bf16.mxu1 %v4090_v12 }
 0xd18   : > { %2636 = vmatprep.subr.bf16.mxu0 %v4087_v11 }
 0xd1a   : > { %2678 = vmatpush1.bf16.msra.mxu1 %v4088_v14 }
 0xd1b   : > { %3619 = vmatprep.subr.bf16.mxu1 %v4092_v27 }
 0xdd0   : > { %v2364_v54 = vpop.f32.mrb[32].mxu1 }
 0xdd1   : > { %v2370_v34 = vadd.f32 %v2364_v54, %v2178_v13  ;;  %v3767_v35 = vpop.f32.mrb[33].mxu1  ;;  %v4085_v13 = vld [vmem:[%s4670_s3 + $0xe0] ss:$16 sps:$4 sm:$0xff]   ;;  %v4100_v54 = vld [vmem:[%s5165_s19 + $0xd0] sm:$0xff]  }
 0xdd2   : > { %v2367_v51 = vpop.f32.mrb[34].mxu1  ;;  %2637 = vmatpush1.bf16.msra.mxu0 %v4085_v13  ;;  %v4102_v35 = vld [vmem:[%s5165_s19 + $0x90] sm:$0xff]  }
 0xdd3   : > { %v2371_v38 = vadd.f32 %v4151_v37, %v2370_v34  ;;  %v3768_v39 = vpop.f32.mrb[35].mxu1  ;;  %3597 = vmatprep.subr.bf16.mxu0 %v4091_v26  ;;  %v4101_v34 = vld [vmem:[%s5165_s19 + $0x10] sm:$0xff]   ;;  %v4103_v51 = vld [vmem:[%s5165_s19 + $0x58] sm:$0xff]  }
 0xdd4   : > { %v4105_v37 = vld [vmem:[%s5165_s19 + $0x18] sm:$0xff]   ;;  %v4107_v39 = vld [vmem:[%s5165_s19 + $0x60] sm:$0xff]  }
 0xdd5   : > { %v4988_v40 = vadd.f32 %v3471_v36, %v2371_v38  ;;  %v4104_v36 = vld [vmem:[%s5165_s19 + $0xd8] sm:$0xff]  }
 0xdd6   : > { %v4106_v38 = vld [vmem:[%s5165_s19 + $0x98] sm:$0xff]  }
 0xdd7   : > { %2382 = vadd.xlane.f32.xlu0 %v4988_v40 }
 0xe64   : > { %v2383_v53 = vpop.xlane.xlu0 %2382 }
 0xe65   : > { %v2384_v57 = vmul.f32 0.0078125, %v2383_v53  ;;  %v4120_v53 = vld [vmem:[%s5165_s19 + $0xf8] sm:$0xff]  }
 0xe67   : > { %v2385_v58 = vsub.f32 %v4988_v40, %v2384_v57  ;;  %v4121_v57 = vld [vmem:[%s5165_s19 + $0x38] sm:$0xff]  }
 0xe69   : > { %v2386_v59 = vmul.f32 %v2385_v58, %v2385_v58 }
 0xe6b   : > { %2387 = vadd.xlane.f32.xlu1 %v2386_v59  ;;  %v2442_v59 = vlaneseq }
 0xe6d   : > { %v2443_v60 = vshrl.u32 %v2442_v59, 7 }
 0xe6f   : > { %v2444_v0 = vsub.s32 0, %v2443_v60  ;;  %v2452_v62 = vsub.s32 2, %v2443_v60  ;;  %v2448_v1 = vsub.s32 1, %v2443_v60  ;;  %v2456_v2 = vsub.s32 3, %v2443_v60 }
 0xe71   : > { %v2445_v3 = vrot.slane %v2440_v63, %v2444_v0  ;;  %v2453_v56 = vrot.slane %v2440_v63, %v2452_v62  ;;  %v2449_v4 = vrot.slane %v2440_v63, %v2448_v1  ;;  %v2457_v5 = vrot.slane %v2440_v63, %v2456_v2  ;;  %v3506_v0 = vld [vmem:[%s674_s13] ss:$0 sm:$0xff] }
 0xef8   : > { %v2388_v15 = vpop.xlane.xlu1 %2387 }
 0xef9   : > { %v2389_v16 = vmul.f32 0.0078125, %v2388_v15 }
 0xefb   : > { %v2390_v17 = vadd.f32 1e-05, %v2389_v16 }
 0xefd   : > { %4141 = vrsqrt.f32 %v2390_v17 }
 0xf07   : > { %v4142_v19 = vpop.eup %4141 }
 0xf08   : > { %v2392_v21 = vmul.f32 %v4142_v19, %v2385_v58  ;;  %v4122_v58 = vld [vmem:[%s5165_s19 + $0xb8] sm:$0xff]  }
 0xf0a   : > { %v2399_v24 = vmul.f32 %v3472_v20, %v2392_v21 }
 0xf0c   : > { %v2406_v18 = vadd.f32 %v3473_v23, %v2399_v24 }
 0xf0e   : > { %v2407_v25 = vpack.c.bf16 %v2406_v18, %v2406_v18 }
 0xf10   : > { %2655 = vmatmul.mubr.bf16.vlgmr.msra.gmra.mrb[36].mxu0 %v2407_v25  ;;  %2696 = vmatmul.mubr.bf16.vlgmr.msra.gmra.mrb[36].mxu1 %v2407_v25 }
 0xf11   : > { %3598 = vmatpush3.bf16.msra.mxu0 %v4093_v28  ;;  %3620 = vmatpush3.bf16.msra.mxu1 %v4094_v61 }
 0xf12   : > { %3599 = vmatprep.subr.bf16.mxu0 %v4095_v29  ;;  %3621 = vmatprep.subr.bf16.mxu1 %v4096_v30 }
 0xf15   : > { %3600 = vmatpush3.bf16.msra.mxu0 %v4097_v31  ;;  %3622 = vmatpush3.bf16.msra.mxu1 %v4098_v32 }
 0xf16   : > { %3601 = vmatprep.subr.bf16.mxu0 %v4099_v33  ;;  %3623 = vmatprep.subr.bf16.mxu1 %v4100_v54 }
 0xf19   : > { %3602 = vmatpush3.bf16.msra.mxu0 %v4101_v34  ;;  %3624 = vmatpush3.bf16.msra.mxu1 %v4102_v35 }
 0xf1a   : > { %3603 = vmatprep.subr.bf16.mxu0 %v4103_v51  ;;  %3625 = vmatprep.subr.bf16.mxu1 %v4104_v36 }
 0xf1d   : > { %3604 = vmatpush3.bf16.msra.mxu0 %v4105_v37  ;;  %3626 = vmatpush3.bf16.msra.mxu1 %v4106_v38 }
 0xf1e   : > { %3605 = vmatprep.subr.bf16.mxu0 %v4107_v39  ;;  %3627 = vmatprep.subr.bf16.mxu1 %v4108_v41 }
 0xf21   : > { %3606 = vmatpush3.bf16.msra.mxu0 %v4109_v42  ;;  %3628 = vmatpush3.bf16.msra.mxu1 %v4110_v43 }
 0xf22   : > { %3607 = vmatprep.subr.bf16.mxu0 %v4111_v44  ;;  %3629 = vmatprep.subr.bf16.mxu1 %v4112_v45 }
 0xf25   : > { %3608 = vmatpush3.bf16.msra.mxu0 %v4113_v46  ;;  %3630 = vmatpush3.bf16.msra.mxu1 %v4114_v47 }
 0xf26   : > { %3609 = vmatprep.subr.bf16.mxu0 %v4115_v48  ;;  %3631 = vmatprep.subr.bf16.mxu1 %v4116_v49 }
 0xf29   : > { %3610 = vmatpush3.bf16.msra.mxu0 %v4117_v50  ;;  %3632 = vmatpush3.bf16.msra.mxu1 %v4118_v52 }
 0xf2a   : > { %3611 = vmatprep.subr.bf16.mxu0 %v4119_v55  ;;  %3633 = vmatprep.subr.bf16.mxu1 %v4120_v53 }
 0xf2d   : > { %3612 = vmatpush3.bf16.msra.mxu0 %v4121_v57  ;;  %3634 = vmatpush3.bf16.msra.mxu1 %v4122_v58 }
 0xfe3   : > { %v2656_v22 = vpop.f32.mrb[36].mxu0  ;;  %v2697_v6 = vpop.f32.mrb[36].mxu1 }
 0xfe4   : > { %v2657_v7 = vadd.f32 %v2656_v22, %v2445_v3  ;;  %v2698_v8 = vadd.f32 %v2697_v6, %v2453_v56  ;;  %v2658_v9 = vpop.f32.mrb[37].mxu0  ;;  %v2699_v10 = vpop.f32.mrb[37].mxu1 }
 0xfe5   : > { %v2659_v11 = vadd.f32 %v2658_v9, %v2449_v4  ;;  %v2700_v12 = vadd.f32 %v2699_v10, %v2457_v5  ;;  %v2660_v13 = vpop.f32.mrb[38].mxu0  ;;  %v2701_v14 = vpop.f32.mrb[38].mxu1 }
 0xfe6   : > { %v2708_v15 = vmul.f32 0.044715, %v2657_v7  ;;  %v2710_v16 = vmul.f32 0.044715, %v2698_v8  ;;  %v2661_v17 = vpop.f32.mrb[39].mxu0  ;;  %v2702_v19 = vpop.f32.mrb[39].mxu1 }
 0xfe7   : > { %v2709_v20 = vmul.f32 0.044715, %v2659_v11  ;;  %v2711_v21 = vmul.f32 0.044715, %v2700_v12  ;;  %v2704_v37 = vmul.f32 0.5, %v2657_v7  ;;  %v2705_v41 = vmul.f32 0.5, %v2659_v11 }
 0xfe8   : > { %v2712_v23 = vmul.f32 %v2708_v15, %v2657_v7  ;;  %v2714_v24 = vmul.f32 %v2710_v16, %v2698_v8  ;;  %v2707_v44 = vmul.f32 0.5, %v2700_v12  ;;  %v2706_v48 = vmul.f32 0.5, %v2698_v8 }
 0xfe9   : > { %v2713_v18 = vmul.f32 %v2709_v20, %v2659_v11  ;;  %v2715_v25 = vmul.f32 %v2711_v21, %v2700_v12 }
 0xfea   : > { %v2716_v26 = vmul.f32 %v2712_v23, %v2657_v7  ;;  %v2718_v27 = vmul.f32 %v2714_v24, %v2698_v8 }
 0xfeb   : > { %v2717_v28 = vmul.f32 %v2713_v18, %v2659_v11  ;;  %v2719_v61 = vmul.f32 %v2715_v25, %v2700_v12 }
 0xfec   : > { %v2720_v29 = vadd.f32 %v2716_v26, %v2657_v7  ;;  %v2722_v30 = vadd.f32 %v2718_v27, %v2698_v8 }
 0xfed   : > { %v2721_v31 = vadd.f32 %v2717_v28, %v2659_v11  ;;  %v2723_v32 = vadd.f32 %v2719_v61, %v2700_v12 }
 0xfee   : > { %v2724_v33 = vmul.f32 0.7978846, %v2720_v29  ;;  %v2726_v35 = vmul.f32 0.7978846, %v2722_v30 }
 0xfef   : > { %v2725_v54 = vmul.f32 0.7978846, %v2721_v31  ;;  %v2727_v34 = vmul.f32 0.7978846, %v2723_v32 }
 0xff0   : > { %4143 = vtanh.f32 %v2724_v33 }
 0xff1   : > { %4145 = vtanh.f32 %v2725_v54 }
 0xff2   : > { %4147 = vtanh.f32 %v2727_v34 }
 0xff3   : > { %4149 = vtanh.f32 %v2726_v35 }
 0xffa   : > { %v4144_v51 = vpop.eup %4143 }
 0xffb   : > { %v4146_v36 = vpop.eup %4145  ;;  %v2732_v38 = vadd.f32 1.0, %v4144_v51 }
 0xffc   : > { %v4148_v39 = vpop.eup %4147  ;;  %v2733_v42 = vadd.f32 1.0, %v4146_v36 }
 0xffd   : > { %v4150_v43 = vpop.eup %4149  ;;  %v2735_v45 = vadd.f32 1.0, %v4148_v39  ;;  %v2736_v46 = vmul.f32 %v2732_v38, %v2704_v37 }
 0xffe   : > { %v2737_v47 = vmul.f32 %v2733_v42, %v2705_v41  ;;  %v2734_v49 = vadd.f32 1.0, %v4150_v43 }
 0xfff   : > { %v2739_v50 = vmul.f32 %v2735_v45, %v2707_v44  ;;  %v2740_v57 = vpack.c.bf16 %v2736_v46, %v2736_v46 }
0x1000   : > { %v2741_v52 = vpack.c.bf16 %v2737_v47, %v2737_v47  ;;  %v2738_v55 = vmul.f32 %v2734_v49, %v2706_v48 }
0x1001   : > { %v2743_v53 = vpack.c.bf16 %v2739_v50, %v2739_v50 }
0x1002   : > { %3039 = vmatprep.mubr.bf16.mxu0 %v2741_v52  ;;  %v2742_v58 = vpack.c.bf16 %v2738_v55, %v2738_v55 }
0x1003   : > { %3079 = vmatprep.mubr.bf16.mxu1 %v2743_v53  ;;  %3040 = vmatmul.mubr.bf16.vlgmr.msra.gmra.mrb[40].mxu0 %v2740_v57 }
0x1004   : > { %3080 = vmatmul.mubr.bf16.vlgmr.msra.gmra.mrb[40].mxu1 %v2742_v58 }
0x10d6   : > { %v3613_v59 = vpop.f32.mrb[40].mxu0 }
0x10d7   : > { %v3635_v60 = vpop.f32.mrb[40].mxu1  ;;  %v3614_v62 = vpop.f32.mrb[41].mxu0 }
0x10d8   : > { %v3615_v63 = vadd.f32 %v3614_v62, %v3613_v59  ;;  %v3636_v1 = vpop.f32.mrb[41].mxu1  ;;  %v3616_v2 = vpop.f32.mrb[42].mxu0 }
0x10d9   : > { %v3637_v3 = vadd.f32 %v3636_v1, %v3635_v60  ;;  %v3638_v56 = vpop.f32.mrb[42].mxu1  ;;  %v3617_v4 = vpop.f32.mrb[43].mxu0 }
0x10da   : > { %v3042_v5 = vadd.f32 %v3615_v63, %v3506_v0  ;;  %v3639_v22 = vpop.f32.mrb[43].mxu1  ;;  %3092 = sbr.rel (%p3539_p8) target bundleno = 4323 (0x10e3), region = 92 }
0x10dc   : > { %v3082_v6 = vadd.f32 %v3637_v3, %v3042_v5 }
0x10de   : > { %v3087_v7 = vadd.f32 %v3082_v6, %v4988_v40 }
0x10e0   : > { %3088 = vst [vmem:[#allocation2] sm:$0xff] %v3087_v7  ;;  %v3093_v8 = vpack.c.bf16 (!%p3539_p8), %v3087_v7, %v3087_v7 }
0x10e2   : > { %3094 = vst [vmem:[%s4720_s14] sm:$0xf] %v3093_v8 }
0x10e3 PF: > { %s5169_s9 = sld [smem:[#allocation17_spill]]  ;;  %s5170_s21 = sld [smem:[#allocation13_spill]] }
0x10e4   : > { %s5171_s22 = sld [smem:[#allocation14_spill]]  ;;  %s5172_s23 = sld [smem:[#allocation20_spill]] }
0x10e5   : > { %s5173_s24 = sld [smem:[#allocation15_spill]]  ;;  %s5174_s25 = sld [smem:[#allocation16_spill]] }
0x10e6   : > { %s5175_s26 = sld [smem:[#allocation18_spill]]  ;;  %s5176_s27 = sld [smem:[#allocation19_spill]] }
0x10e9   : > { %s31_s28 = sadd.s32 1, %s5169_s9  }
0x10ea   : > { %p28_p1 = scmp.ge.s32.totalorder %s31_s28, 6  }
0x10ec   :  { %30 = sbr.rel (!%p28_p1) target bundleno = 20 (0x14), region = 177 }
0x10f3   :  { %3114 = vsyncpa [#allocation4], 1 }
0x10f4   :  { %3116 = vsyncpa [#allocation4 + $0x1], 1 }
0x10f5   :  { %3117 = vsyncpa [#allocation6], 1 }
0x10f6   :  { %3119 = vsyncpa [#allocation6 + $0x1], 1 }
0x10f7   :  { %3120 = vsyncpa [#allocation9], 1 }
0x10f8   :  { %3122 = vsyncpa [#allocation9 + $0x1], 1 }

</bundles_post_ra>
